<compile_context>
chip_gen: v7x
topology: tpu7x:2x2x1
jax: 0.10.0
libtpu: 0.0.40
codegen_flags: <defaults>
</compile_context>

<pallas_src>
import jax
import jax.numpy as jnp
import numpy as np
from jax import lax
from jax.experimental import pallas as pl
from jax.experimental.pallas import tpu as pltpu

HIDDEN = 32
EPS = 1e-5

# Left halo of the conv line buffer: 128 keeps the interior store lane-aligned
# (only the last W+1 halo entries are ever read).  Right halo is W+1.
_LPAD = 128


def _line_buf_width(P, W):
    return _LPAD + P + (W + 1)


def make_unit_kernel(N, C, H, W):
    """Builds the fused Unit kernel for static shapes (N, C, H, W)."""
    P = H * W

    def kernel(x_ref, w1_ref, w2_ref, par_ref, o_ref, xp_sc, y1_sc, y2_sc):
        # x_ref : (N, C, P) f32   activations, NCHW flattened over H*W (lane-dense)
        # w*_ref: (9, C, C) f32   tap j = kh*3 + kw, each (Cout, Cin)
        # par_ref: (C, 6)  f32    columns = [b1, g1, beta1, b2, g2, beta2]
        # o_ref : (N, C, P) f32
        # xp_sc : (C, _LPAD+P+W+1) zero-halo line buffer
        # y1_sc, y2_sc: (N, C, P) conv outputs kept in VMEM between phases
        f32 = jnp.float32

        par = par_ref[...]
        b1, g1, be1 = par[:, 0:1], par[:, 1:2], par[:, 2:3]
        b2, g2, be2 = par[:, 3:4], par[:, 4:5], par[:, 5:6]

        # The dw = +/-1 taps wrap across rows in the flattened H*W axis; only
        # those border columns need masking (dh borders are handled by the
        # zero halo of the line buffer).  Computed once, reused by both convs.
        col = lax.broadcasted_iota(jnp.int32, (C, P), 1) % W
        keep_m1 = col >= 1          # valid source positions for dw == -1
        keep_p1 = col <= W - 2      # valid source positions for dw == +1

        # Zero the halo exactly once; the interior is fully rewritten per image.
        xp_sc[...] = jnp.zeros_like(xp_sc)

        def conv3x3(w_ref, bias):
            """3x3 SAME conv of the (C, P) image currently resident in xp_sc."""
            acc = None
            for dh in (-1, 0, 1):
                for dw in (-1, 0, 1):
                    j = (dh + 1) * 3 + (dw + 1)
                    start = _LPAD + dh * W + dw
                    tap = xp_sc[:, start:start + P]              # (Cin, P)
                    if dw == -1:
                        tap = jnp.where(keep_m1, tap, 0.0)
                    elif dw == 1:
                        tap = jnp.where(keep_p1, tap, 0.0)
                    part = jnp.dot(w_ref[j, :, :], tap,
                                   preferred_element_type=f32)   # (Cout, P) MXU
                    acc = part if acc is None else acc + part
            return acc + bias                                    # (C,1) bcast

        inv_cnt = 1.0 / float(N * P)

        # ---- conv1 (+bias) and BN1 per-batch statistics ---------------------
        s1 = jnp.zeros((C, 1), f32)
        q1 = jnp.zeros((C, 1), f32)
        for n in range(N):
            xp_sc[:, _LPAD:_LPAD + P] = x_ref[n, :, :].astype(f32)
            y1 = conv3x3(w1_ref, b1)
            y1_sc[n, :, :] = y1
            s1 = s1 + jnp.sum(y1, axis=1, keepdims=True)
            q1 = q1 + jnp.sum(y1 * y1, axis=1, keepdims=True)
        mean1 = s1 * inv_cnt
        var1 = q1 * inv_cnt - mean1 * mean1          # biased var (training BN)
        scale1 = g1 * lax.rsqrt(var1 + EPS)
        shift1 = be1 - mean1 * scale1

        # ---- BN1 affine + ReLU + conv2 (+bias) + BN2 statistics -------------
        s2 = jnp.zeros((C, 1), f32)
        q2 = jnp.zeros((C, 1), f32)
        for n in range(N):
            a = jnp.maximum(y1_sc[n, :, :] * scale1 + shift1, 0.0)
            xp_sc[:, _LPAD:_LPAD + P] = a
            y2 = conv3x3(w2_ref, b2)
            y2_sc[n, :, :] = y2
            s2 = s2 + jnp.sum(y2, axis=1, keepdims=True)
            q2 = q2 + jnp.sum(y2 * y2, axis=1, keepdims=True)
        mean2 = s2 * inv_cnt
        var2 = q2 * inv_cnt - mean2 * mean2
        scale2 = g2 * lax.rsqrt(var2 + EPS)
        shift2 = be2 - mean2 * scale2

        # ---- BN2 affine + residual add + ReLU --------------------------------
        for n in range(N):
            out = y2_sc[n, :, :] * scale2 + shift2 + x_ref[n, :, :].astype(f32)
            o_ref[n, :, :] = jnp.maximum(out, 0.0).astype(o_ref.dtype)

    return kernel


@jax.jit
def unit_forward(x_nchw, p):
    N, C, H, W = x_nchw.shape
    P = H * W
    x = x_nchw.reshape(N, C, P)                            # free reshape (stays NCHW)

    # OIHW (Cout, Cin, 3, 3) -> (9, Cout, Cin); tap index j = kh*3 + kw.
    w1 = jnp.transpose(p['w1'], (2, 3, 0, 1)).reshape(9, C, C)
    w2 = jnp.transpose(p['w2'], (2, 3, 0, 1)).reshape(9, C, C)
    par = jnp.stack([p['b1'], p['g1'], p['beta1'],
                     p['b2'], p['g2'], p['beta2']], axis=1)          # (C, 6)

    out = pl.pallas_call(
        make_unit_kernel(N, C, H, W),
        out_shape=jax.ShapeDtypeStruct((N, C, P), jnp.float32),
        grid=(1,),
        in_specs=[
            pl.BlockSpec((N, C, P), lambda i: (0, 0, 0)),
            pl.BlockSpec((9, C, C), lambda i: (0, 0, 0)),
            pl.BlockSpec((9, C, C), lambda i: (0, 0, 0)),
            pl.BlockSpec((C, 6), lambda i: (0, 0)),
        ],
        out_specs=pl.BlockSpec((N, C, P), lambda i: (0, 0, 0)),
        scratch_shapes=[
            pltpu.VMEM((C, _line_buf_width(P, W)), jnp.float32),  # zero-halo line buf
            pltpu.VMEM((N, C, P), jnp.float32),                   # conv1 outputs
            pltpu.VMEM((N, C, P), jnp.float32),                   # conv2 outputs
        ],
        compiler_params=pltpu.CompilerParams(
            dimension_semantics=("arbitrary",)),
    )(x, w1, w2, par)
    return out.reshape(N, C, H, W)


def unit_reference(x, p):
    """Pure-JAX reference (NCHW, training-mode BatchNorm), for verification."""
    def conv(z, w, b):
        y = lax.conv_general_dilated(
            z, w, window_strides=(1, 1), padding='SAME',
            dimension_numbers=('NCHW', 'OIHW', 'NCHW'),
            precision=lax.Precision.HIGHEST)
        return y + b[None, :, None, None]

    def bn(z, g, beta):
        m = jnp.mean(z, axis=(0, 2, 3), keepdims=True)
        v = jnp.var(z, axis=(0, 2, 3), keepdims=True)      # biased variance
        s = g[None, :, None, None] * lax.rsqrt(v + EPS)
        return (z - m) * s + beta[None, :, None, None]

    y = jax.nn.relu(bn(conv(x, p['w1'], p['b1']), p['g1'], p['beta1']))
    y = bn(conv(y, p['w2'], p['b2']), p['g2'], p['beta2'])
    return jax.nn.relu(y + x)


if __name__ == "__main__":
    key = jax.random.PRNGKey(0)
    ks = jax.random.split(key, 7)
    N, C, H, W = 2, HIDDEN, 16, 16
    x = jax.random.normal(ks[0], (N, C, H, W), jnp.float32)

    fan_in = float(C * 3 * 3)
    params = {
        'w1': jax.random.normal(ks[1], (C, C, 3, 3), jnp.float32) / jnp.sqrt(fan_in),
        'b1': 0.1 * jax.random.normal(ks[2], (C,), jnp.float32),
        'w2': jax.random.normal(ks[3], (C, C, 3, 3), jnp.float32) / jnp.sqrt(fan_in),
        'b2': 0.1 * jax.random.normal(ks[4], (C,), jnp.float32),
        'g1': 1.0 + 0.1 * jax.random.normal(ks[5], (C,), jnp.float32),
        'beta1': jnp.zeros((C,), jnp.float32),
        'g2': 1.0 + 0.1 * jax.random.normal(ks[6], (C,), jnp.float32),
        'beta2': jnp.zeros((C,), jnp.float32),
    }

    # TODO(synk): BatchNorm running_mean/running_var buffer updates (training
    # bookkeeping) are not modeled; they do not affect this forward output.
    out = jax.block_until_ready(unit_forward(x, params))
    ref = jax.block_until_ready(unit_reference(x, params))
    assert out.shape == x.shape
    # Tolerance leaves margin for MXU f32-pass rounding vs. the XLA conv path;
    # any structural error would show up as O(0.1+) discrepancies.
    np.testing.assert_allclose(np.asarray(out), np.asarray(ref),
                               rtol=2e-3, atol=2e-3)
    print("KERNEL_OK")
</pallas_src>

<mosaic_0001>
module attributes {stable_mosaic.version = 11 : i64} {
  func.func @kernel(%arg0: i32, %arg1: memref<2x32x256xf32, #tpu.memory_space<vmem>>, %arg2: memref<9x32x32xf32, #tpu.memory_space<vmem>>, %arg3: memref<9x32x32xf32, #tpu.memory_space<vmem>>, %arg4: memref<32x6xf32, #tpu.memory_space<vmem>>, %arg5: memref<2x32x256xf32, #tpu.memory_space<vmem>>, %arg6: memref<32x401xf32, #tpu.memory_space<vmem>>, %arg7: memref<2x32x256xf32, #tpu.memory_space<vmem>>, %arg8: memref<2x32x256xf32, #tpu.memory_space<vmem>>) attributes {dimension_semantics = [#tpu.dimension_semantics<arbitrary>], iteration_bounds = array<i64: 1>, scalar_prefetch = 0 : i64, scratch_operands = 3 : i64, tpu.core_type = #tpu.core_type<tc>, window_params = [{pipeline_mode = #tpu.pipeline_mode<synchronous>, transform_indices = @transform_0, window_bounds = array<i64: 2, 32, 256>}, {pipeline_mode = #tpu.pipeline_mode<synchronous>, transform_indices = @transform_1, window_bounds = array<i64: 9, 32, 32>}, {pipeline_mode = #tpu.pipeline_mode<synchronous>, transform_indices = @transform_2, window_bounds = array<i64: 9, 32, 32>}, {pipeline_mode = #tpu.pipeline_mode<synchronous>, transform_indices = @transform_3, window_bounds = array<i64: 32, 6>}, {pipeline_mode = #tpu.pipeline_mode<synchronous>, transform_indices = @transform_4, window_bounds = array<i64: 2, 32, 256>}]} {
    %c0 = arith.constant 0 : index
    %c0_0 = arith.constant 0 : index
    %0 = vector.load %arg4[%c0, %c0_0] : memref<32x6xf32, #tpu.memory_space<vmem>>, vector<32x6xf32>
    %1 = vector.extract_strided_slice %0 {offsets = [0, 0], sizes = [32, 1], strides = [1, 1]} : vector<32x6xf32> to vector<32x1xf32>
    %2 = vector.extract_strided_slice %0 {offsets = [0, 1], sizes = [32, 1], strides = [1, 1]} : vector<32x6xf32> to vector<32x1xf32>
    %3 = vector.extract_strided_slice %0 {offsets = [0, 2], sizes = [32, 1], strides = [1, 1]} : vector<32x6xf32> to vector<32x1xf32>
    %4 = vector.extract_strided_slice %0 {offsets = [0, 3], sizes = [32, 1], strides = [1, 1]} : vector<32x6xf32> to vector<32x1xf32>
    %5 = vector.extract_strided_slice %0 {offsets = [0, 4], sizes = [32, 1], strides = [1, 1]} : vector<32x6xf32> to vector<32x1xf32>
    %6 = vector.extract_strided_slice %0 {offsets = [0, 5], sizes = [32, 1], strides = [1, 1]} : vector<32x6xf32> to vector<32x1xf32>
    %7 = tpu.iota {dimensions = array<i32: 1>} : vector<32x256xi32>
    %c16_i32 = arith.constant 16 : i32
    %c0_i32 = arith.constant 0 : i32
    %8 = arith.cmpi eq, %c16_i32, %c0_i32 : i32
    %c1_i32 = arith.constant 1 : i32
    %9 = arith.select %8, %c1_i32, %c16_i32 : i32
    %10 = vector.broadcast %9 : i32 to vector<32x256xi32>
    %11 = arith.remsi %7, %10 : vector<32x256xi32>
    %c0_i32_1 = arith.constant 0 : i32
    %12 = vector.broadcast %c0_i32_1 : i32 to vector<32x256xi32>
    %13 = arith.cmpi ne, %11, %12 : vector<32x256xi32>
    %c0_i32_2 = arith.constant 0 : i32
    %14 = vector.broadcast %c0_i32_2 : i32 to vector<32x256xi32>
    %15 = arith.cmpi slt, %11, %14 : vector<32x256xi32>
    %c0_i32_3 = arith.constant 0 : i32
    %16 = arith.cmpi slt, %9, %c0_i32_3 : i32
    %17 = vector.broadcast %16 : i1 to vector<32x256xi1>
    %18 = vector.broadcast %17 : vector<32x256xi1> to vector<32x256xi1>
    %19 = arith.xori %15, %18 : vector<32x256xi1>
    %20 = arith.andi %19, %13 : vector<32x256xi1>
    %21 = vector.broadcast %9 : i32 to vector<32x256xi32>
    %22 = arith.addi %11, %21 : vector<32x256xi32>
    %23 = arith.select %20, %22, %11 : vector<32x256xi1>, vector<32x256xi32>
    %c1_i32_4 = arith.constant 1 : i32
    %24 = vector.broadcast %c1_i32_4 : i32 to vector<32x256xi32>
    %25 = arith.cmpi sge, %23, %24 : vector<32x256xi32>
    %c14_i32 = arith.constant 14 : i32
    %26 = vector.broadcast %c14_i32 : i32 to vector<32x256xi32>
    %27 = arith.cmpi sle, %23, %26 : vector<32x256xi32>
    %cst = arith.constant 0.000000e+00 : f32
    %28 = vector.broadcast %cst : f32 to vector<32x401xf32>
    %c0_5 = arith.constant 0 : index
    %c0_6 = arith.constant 0 : index
    %29 = vector.load %arg6[%c0_5, %c0_6] : memref<32x401xf32, #tpu.memory_space<vmem>>, vector<32x401xf32>
    tpu.vector_store %arg6[%c0_5, %c0_6], %28 {strides = array<i32>} : memref<32x401xf32, #tpu.memory_space<vmem>>, vector<32x401xf32>,
    %cst_7 = arith.constant 0.000000e+00 : f32
    %30 = vector.broadcast %cst_7 : f32 to vector<32x1xf32>
    %cst_8 = arith.constant 0.000000e+00 : f32
    %31 = vector.broadcast %cst_8 : f32 to vector<32x1xf32>
    %c0_9 = arith.constant 0 : index
    %c0_10 = arith.constant 0 : index
    %c0_11 = arith.constant 0 : index
    %32 = vector.load %arg1[%c0_9, %c0_10, %c0_11] : memref<2x32x256xf32, #tpu.memory_space<vmem>>, vector<1x32x256xf32>
    %33 = vector.shape_cast %32 : vector<1x32x256xf32> to vector<32x256xf32>
    %c0_12 = arith.constant 0 : index
    %c128 = arith.constant 128 : index
    %34 = vector.load %arg6[%c0_12, %c128] : memref<32x401xf32, #tpu.memory_space<vmem>>, vector<32x256xf32>
    tpu.vector_store %arg6[%c0_12, %c128], %33 {strides = array<i32>} : memref<32x401xf32, #tpu.memory_space<vmem>>, vector<32x256xf32>,
    %c0_13 = arith.constant 0 : index
    %c111 = arith.constant 111 : index
    %35 = vector.load %arg6[%c0_13, %c111] : memref<32x401xf32, #tpu.memory_space<vmem>>, vector<32x256xf32>
    %cst_14 = arith.constant 0.000000e+00 : f32
    %36 = vector.broadcast %cst_14 : f32 to vector<32x256xf32>
    %37 = arith.select %25, %35, %36 : vector<32x256xi1>, vector<32x256xf32>
    %c0_15 = arith.constant 0 : index
    %c0_16 = arith.constant 0 : index
    %c0_17 = arith.constant 0 : index
    %38 = vector.load %arg2[%c0_15, %c0_16, %c0_17] : memref<9x32x32xf32, #tpu.memory_space<vmem>>, vector<1x32x32xf32>
    %39 = vector.shape_cast %38 : vector<1x32x32xf32> to vector<32x32xf32>
    %cst_18 = arith.constant dense<0.000000e+00> : vector<32x256xf32>
    %40 = tpu.matmul %39, %37, %cst_18 {dimension_numbers = #tpu.dot_dimension_numbers<[1], [0], [0], [1], [0, 0, 1, 1], [], []>} : vector<32x32xf32>, vector<32x256xf32>, vector<32x256xf32> -> vector<32x256xf32>
    %c0_19 = arith.constant 0 : index
    %c112 = arith.constant 112 : index
    %41 = vector.load %arg6[%c0_19, %c112] : memref<32x401xf32, #tpu.memory_space<vmem>>, vector<32x256xf32>
    %c1 = arith.constant 1 : index
    %c0_20 = arith.constant 0 : index
    %c0_21 = arith.constant 0 : index
    %42 = vector.load %arg2[%c1, %c0_20, %c0_21] : memref<9x32x32xf32, #tpu.memory_space<vmem>>, vector<1x32x32xf32>
    %43 = vector.shape_cast %42 : vector<1x32x32xf32> to vector<32x32xf32>
    %cst_22 = arith.constant dense<0.000000e+00> : vector<32x256xf32>
    %44 = tpu.matmul %43, %41, %cst_22 {dimension_numbers = #tpu.dot_dimension_numbers<[1], [0], [0], [1], [0, 0, 1, 1], [], []>} : vector<32x32xf32>, vector<32x256xf32>, vector<32x256xf32> -> vector<32x256xf32>
    %45 = arith.addf %40, %44 : vector<32x256xf32>
    %c0_23 = arith.constant 0 : index
    %c113 = arith.constant 113 : index
    %46 = vector.load %arg6[%c0_23, %c113] : memref<32x401xf32, #tpu.memory_space<vmem>>, vector<32x256xf32>
    %cst_24 = arith.constant 0.000000e+00 : f32
    %47 = vector.broadcast %cst_24 : f32 to vector<32x256xf32>
    %48 = arith.select %27, %46, %47 : vector<32x256xi1>, vector<32x256xf32>
    %c2 = arith.constant 2 : index
    %c0_25 = arith.constant 0 : index
    %c0_26 = arith.constant 0 : index
    %49 = vector.load %arg2[%c2, %c0_25, %c0_26] : memref<9x32x32xf32, #tpu.memory_space<vmem>>, vector<1x32x32xf32>
    %50 = vector.shape_cast %49 : vector<1x32x32xf32> to vector<32x32xf32>
    %cst_27 = arith.constant dense<0.000000e+00> : vector<32x256xf32>
    %51 = tpu.matmul %50, %48, %cst_27 {dimension_numbers = #tpu.dot_dimension_numbers<[1], [0], [0], [1], [0, 0, 1, 1], [], []>} : vector<32x32xf32>, vector<32x256xf32>, vector<32x256xf32> -> vector<32x256xf32>
    %52 = arith.addf %45, %51 : vector<32x256xf32>
    %c0_28 = arith.constant 0 : index
    %c127 = arith.constant 127 : index
    %53 = vector.load %arg6[%c0_28, %c127] : memref<32x401xf32, #tpu.memory_space<vmem>>, vector<32x256xf32>
    %cst_29 = arith.constant 0.000000e+00 : f32
    %54 = vector.broadcast %cst_29 : f32 to vector<32x256xf32>
    %55 = arith.select %25, %53, %54 : vector<32x256xi1>, vector<32x256xf32>
    %c3 = arith.constant 3 : index
    %c0_30 = arith.constant 0 : index
    %c0_31 = arith.constant 0 : index
    %56 = vector.load %arg2[%c3, %c0_30, %c0_31] : memref<9x32x32xf32, #tpu.memory_space<vmem>>, vector<1x32x32xf32>
    %57 = vector.shape_cast %56 : vector<1x32x32xf32> to vector<32x32xf32>
    %cst_32 = arith.constant dense<0.000000e+00> : vector<32x256xf32>
    %58 = tpu.matmul %57, %55, %cst_32 {dimension_numbers = #tpu.dot_dimension_numbers<[1], [0], [0], [1], [0, 0, 1, 1], [], []>} : vector<32x32xf32>, vector<32x256xf32>, vector<32x256xf32> -> vector<32x256xf32>
    %59 = arith.addf %52, %58 : vector<32x256xf32>
    %c0_33 = arith.constant 0 : index
    %c128_34 = arith.constant 128 : index
    %60 = vector.load %arg6[%c0_33, %c128_34] : memref<32x401xf32, #tpu.memory_space<vmem>>, vector<32x256xf32>
    %c4 = arith.constant 4 : index
    %c0_35 = arith.constant 0 : index
    %c0_36 = arith.constant 0 : index
    %61 = vector.load %arg2[%c4, %c0_35, %c0_36] : memref<9x32x32xf32, #tpu.memory_space<vmem>>, vector<1x32x32xf32>
    %62 = vector.shape_cast %61 : vector<1x32x32xf32> to vector<32x32xf32>
    %cst_37 = arith.constant dense<0.000000e+00> : vector<32x256xf32>
    %63 = tpu.matmul %62, %60, %cst_37 {dimension_numbers = #tpu.dot_dimension_numbers<[1], [0], [0], [1], [0, 0, 1, 1], [], []>} : vector<32x32xf32>, vector<32x256xf32>, vector<32x256xf32> -> vector<32x256xf32>
    %64 = arith.addf %59, %63 : vector<32x256xf32>
    %c0_38 = arith.constant 0 : index
    %c129 = arith.constant 129 : index
    %65 = vector.load %arg6[%c0_38, %c129] : memref<32x401xf32, #tpu.memory_space<vmem>>, vector<32x256xf32>
    %cst_39 = arith.constant 0.000000e+00 : f32
    %66 = vector.broadcast %cst_39 : f32 to vector<32x256xf32>
    %67 = arith.select %27, %65, %66 : vector<32x256xi1>, vector<32x256xf32>
    %c5 = arith.constant 5 : index
    %c0_40 = arith.constant 0 : index
    %c0_41 = arith.constant 0 : index
    %68 = vector.load %arg2[%c5, %c0_40, %c0_41] : memref<9x32x32xf32, #tpu.memory_space<vmem>>, vector<1x32x32xf32>
    %69 = vector.shape_cast %68 : vector<1x32x32xf32> to vector<32x32xf32>
    %cst_42 = arith.constant dense<0.000000e+00> : vector<32x256xf32>
    %70 = tpu.matmul %69, %67, %cst_42 {dimension_numbers = #tpu.dot_dimension_numbers<[1], [0], [0], [1], [0, 0, 1, 1], [], []>} : vector<32x32xf32>, vector<32x256xf32>, vector<32x256xf32> -> vector<32x256xf32>
    %71 = arith.addf %64, %70 : vector<32x256xf32>
    %c0_43 = arith.constant 0 : index
    %c143 = arith.constant 143 : index
    %72 = vector.load %arg6[%c0_43, %c143] : memref<32x401xf32, #tpu.memory_space<vmem>>, vector<32x256xf32>
    %cst_44 = arith.constant 0.000000e+00 : f32
    %73 = vector.broadcast %cst_44 : f32 to vector<32x256xf32>
    %74 = arith.select %25, %72, %73 : vector<32x256xi1>, vector<32x256xf32>
    %c6 = arith.constant 6 : index
    %c0_45 = arith.constant 0 : index
    %c0_46 = arith.constant 0 : index
    %75 = vector.load %arg2[%c6, %c0_45, %c0_46] : memref<9x32x32xf32, #tpu.memory_space<vmem>>, vector<1x32x32xf32>
    %76 = vector.shape_cast %75 : vector<1x32x32xf32> to vector<32x32xf32>
    %cst_47 = arith.constant dense<0.000000e+00> : vector<32x256xf32>
    %77 = tpu.matmul %76, %74, %cst_47 {dimension_numbers = #tpu.dot_dimension_numbers<[1], [0], [0], [1], [0, 0, 1, 1], [], []>} : vector<32x32xf32>, vector<32x256xf32>, vector<32x256xf32> -> vector<32x256xf32>
    %78 = arith.addf %71, %77 : vector<32x256xf32>
    %c0_48 = arith.constant 0 : index
    %c144 = arith.constant 144 : index
    %79 = vector.load %arg6[%c0_48, %c144] : memref<32x401xf32, #tpu.memory_space<vmem>>, vector<32x256xf32>
    %c7 = arith.constant 7 : index
    %c0_49 = arith.constant 0 : index
    %c0_50 = arith.constant 0 : index
    %80 = vector.load %arg2[%c7, %c0_49, %c0_50] : memref<9x32x32xf32, #tpu.memory_space<vmem>>, vector<1x32x32xf32>
    %81 = vector.shape_cast %80 : vector<1x32x32xf32> to vector<32x32xf32>
    %cst_51 = arith.constant dense<0.000000e+00> : vector<32x256xf32>
    %82 = tpu.matmul %81, %79, %cst_51 {dimension_numbers = #tpu.dot_dimension_numbers<[1], [0], [0], [1], [0, 0, 1, 1], [], []>} : vector<32x32xf32>, vector<32x256xf32>, vector<32x256xf32> -> vector<32x256xf32>
    %83 = arith.addf %78, %82 : vector<32x256xf32>
    %c0_52 = arith.constant 0 : index
    %c145 = arith.constant 145 : index
    %84 = vector.load %arg6[%c0_52, %c145] : memref<32x401xf32, #tpu.memory_space<vmem>>, vector<32x256xf32>
    %cst_53 = arith.constant 0.000000e+00 : f32
    %85 = vector.broadcast %cst_53 : f32 to vector<32x256xf32>
    %86 = arith.select %27, %84, %85 : vector<32x256xi1>, vector<32x256xf32>
    %c8 = arith.constant 8 : index
    %c0_54 = arith.constant 0 : index
    %c0_55 = arith.constant 0 : index
    %87 = vector.load %arg2[%c8, %c0_54, %c0_55] : memref<9x32x32xf32, #tpu.memory_space<vmem>>, vector<1x32x32xf32>
    %88 = vector.shape_cast %87 : vector<1x32x32xf32> to vector<32x32xf32>
    %cst_56 = arith.constant dense<0.000000e+00> : vector<32x256xf32>
    %89 = tpu.matmul %88, %86, %cst_56 {dimension_numbers = #tpu.dot_dimension_numbers<[1], [0], [0], [1], [0, 0, 1, 1], [], []>} : vector<32x32xf32>, vector<32x256xf32>, vector<32x256xf32> -> vector<32x256xf32>
    %90 = arith.addf %83, %89 : vector<32x256xf32>
    %91 = vector.broadcast %1 : vector<32x1xf32> to vector<32x256xf32>
    %92 = arith.addf %90, %91 : vector<32x256xf32>
    %c0_57 = arith.constant 0 : index
    %c0_58 = arith.constant 0 : index
    %c0_59 = arith.constant 0 : index
    %93 = vector.load %arg7[%c0_57, %c0_58, %c0_59] : memref<2x32x256xf32, #tpu.memory_space<vmem>>, vector<1x32x256xf32>
    %94 = vector.shape_cast %93 : vector<1x32x256xf32> to vector<32x256xf32>
    %95 = vector.shape_cast %92 : vector<32x256xf32> to vector<1x32x256xf32>
    tpu.vector_store %arg7[%c0_57, %c0_58, %c0_59], %95 {strides = array<i32>} : memref<2x32x256xf32, #tpu.memory_space<vmem>>, vector<1x32x256xf32>,
    %cst_60 = arith.constant dense<0.000000e+00> : vector<32xf32>
    %96 = vector.multi_reduction <add>, %92, %cst_60 [1] : vector<32x256xf32> to vector<32xf32>
    %97 = vector.shape_cast %96 : vector<32xf32> to vector<32x1xf32>
    %98 = arith.addf %30, %97 : vector<32x1xf32>
    %99 = arith.mulf %92, %92 : vector<32x256xf32>
    %cst_61 = arith.constant dense<0.000000e+00> : vector<32xf32>
    %100 = vector.multi_reduction <add>, %99, %cst_61 [1] : vector<32x256xf32> to vector<32xf32>
    %101 = vector.shape_cast %100 : vector<32xf32> to vector<32x1xf32>
    %102 = arith.addf %31, %101 : vector<32x1xf32>
    %c1_62 = arith.constant 1 : index
    %c0_63 = arith.constant 0 : index
    %c0_64 = arith.constant 0 : index
    %103 = vector.load %arg1[%c1_62, %c0_63, %c0_64] : memref<2x32x256xf32, #tpu.memory_space<vmem>>, vector<1x32x256xf32>
    %104 = vector.shape_cast %103 : vector<1x32x256xf32> to vector<32x256xf32>
    %c0_65 = arith.constant 0 : index
    %c128_66 = arith.constant 128 : index
    %105 = vector.load %arg6[%c0_65, %c128_66] : memref<32x401xf32, #tpu.memory_space<vmem>>, vector<32x256xf32>
    tpu.vector_store %arg6[%c0_65, %c128_66], %104 {strides = array<i32>} : memref<32x401xf32, #tpu.memory_space<vmem>>, vector<32x256xf32>,
    %c0_67 = arith.constant 0 : index
    %c111_68 = arith.constant 111 : index
    %106 = vector.load %arg6[%c0_67, %c111_68] : memref<32x401xf32, #tpu.memory_space<vmem>>, vector<32x256xf32>
    %cst_69 = arith.constant 0.000000e+00 : f32
    %107 = vector.broadcast %cst_69 : f32 to vector<32x256xf32>
    %108 = arith.select %25, %106, %107 : vector<32x256xi1>, vector<32x256xf32>
    %c0_70 = arith.constant 0 : index
    %c0_71 = arith.constant 0 : index
    %c0_72 = arith.constant 0 : index
    %109 = vector.load %arg2[%c0_70, %c0_71, %c0_72] : memref<9x32x32xf32, #tpu.memory_space<vmem>>, vector<1x32x32xf32>
    %110 = vector.shape_cast %109 : vector<1x32x32xf32> to vector<32x32xf32>
    %cst_73 = arith.constant dense<0.000000e+00> : vector<32x256xf32>
    %111 = tpu.matmul %110, %108, %cst_73 {dimension_numbers = #tpu.dot_dimension_numbers<[1], [0], [0], [1], [0, 0, 1, 1], [], []>} : vector<32x32xf32>, vector<32x256xf32>, vector<32x256xf32> -> vector<32x256xf32>
    %c0_74 = arith.constant 0 : index
    %c112_75 = arith.constant 112 : index
    %112 = vector.load %arg6[%c0_74, %c112_75] : memref<32x401xf32, #tpu.memory_space<vmem>>, vector<32x256xf32>
    %c1_76 = arith.constant 1 : index
    %c0_77 = arith.constant 0 : index
    %c0_78 = arith.constant 0 : index
    %113 = vector.load %arg2[%c1_76, %c0_77, %c0_78] : memref<9x32x32xf32, #tpu.memory_space<vmem>>, vector<1x32x32xf32>
    %114 = vector.shape_cast %113 : vector<1x32x32xf32> to vector<32x32xf32>
    %cst_79 = arith.constant dense<0.000000e+00> : vector<32x256xf32>
    %115 = tpu.matmul %114, %112, %cst_79 {dimension_numbers = #tpu.dot_dimension_numbers<[1], [0], [0], [1], [0, 0, 1, 1], [], []>} : vector<32x32xf32>, vector<32x256xf32>, vector<32x256xf32> -> vector<32x256xf32>
    %116 = arith.addf %111, %115 : vector<32x256xf32>
    %c0_80 = arith.constant 0 : index
    %c113_81 = arith.constant 113 : index
    %117 = vector.load %arg6[%c0_80, %c113_81] : memref<32x401xf32, #tpu.memory_space<vmem>>, vector<32x256xf32>
    %cst_82 = arith.constant 0.000000e+00 : f32
    %118 = vector.broadcast %cst_82 : f32 to vector<32x256xf32>
    %119 = arith.select %27, %117, %118 : vector<32x256xi1>, vector<32x256xf32>
    %c2_83 = arith.constant 2 : index
    %c0_84 = arith.constant 0 : index
    %c0_85 = arith.constant 0 : index
    %120 = vector.load %arg2[%c2_83, %c0_84, %c0_85] : memref<9x32x32xf32, #tpu.memory_space<vmem>>, vector<1x32x32xf32>
    %121 = vector.shape_cast %120 : vector<1x32x32xf32> to vector<32x32xf32>
    %cst_86 = arith.constant dense<0.000000e+00> : vector<32x256xf32>
    %122 = tpu.matmul %121, %119, %cst_86 {dimension_numbers = #tpu.dot_dimension_numbers<[1], [0], [0], [1], [0, 0, 1, 1], [], []>} : vector<32x32xf32>, vector<32x256xf32>, vector<32x256xf32> -> vector<32x256xf32>
    %123 = arith.addf %116, %122 : vector<32x256xf32>
    %c0_87 = arith.constant 0 : index
    %c127_88 = arith.constant 127 : index
    %124 = vector.load %arg6[%c0_87, %c127_88] : memref<32x401xf32, #tpu.memory_space<vmem>>, vector<32x256xf32>
    %cst_89 = arith.constant 0.000000e+00 : f32
    %125 = vector.broadcast %cst_89 : f32 to vector<32x256xf32>
    %126 = arith.select %25, %124, %125 : vector<32x256xi1>, vector<32x256xf32>
    %c3_90 = arith.constant 3 : index
    %c0_91 = arith.constant 0 : index
    %c0_92 = arith.constant 0 : index
    %127 = vector.load %arg2[%c3_90, %c0_91, %c0_92] : memref<9x32x32xf32, #tpu.memory_space<vmem>>, vector<1x32x32xf32>
    %128 = vector.shape_cast %127 : vector<1x32x32xf32> to vector<32x32xf32>
    %cst_93 = arith.constant dense<0.000000e+00> : vector<32x256xf32>
    %129 = tpu.matmul %128, %126, %cst_93 {dimension_numbers = #tpu.dot_dimension_numbers<[1], [0], [0], [1], [0, 0, 1, 1], [], []>} : vector<32x32xf32>, vector<32x256xf32>, vector<32x256xf32> -> vector<32x256xf32>
    %130 = arith.addf %123, %129 : vector<32x256xf32>
    %c0_94 = arith.constant 0 : index
    %c128_95 = arith.constant 128 : index
    %131 = vector.load %arg6[%c0_94, %c128_95] : memref<32x401xf32, #tpu.memory_space<vmem>>, vector<32x256xf32>
    %c4_96 = arith.constant 4 : index
    %c0_97 = arith.constant 0 : index
    %c0_98 = arith.constant 0 : index
    %132 = vector.load %arg2[%c4_96, %c0_97, %c0_98] : memref<9x32x32xf32, #tpu.memory_space<vmem>>, vector<1x32x32xf32>
    %133 = vector.shape_cast %132 : vector<1x32x32xf32> to vector<32x32xf32>
    %cst_99 = arith.constant dense<0.000000e+00> : vector<32x256xf32>
    %134 = tpu.matmul %133, %131, %cst_99 {dimension_numbers = #tpu.dot_dimension_numbers<[1], [0], [0], [1], [0, 0, 1, 1], [], []>} : vector<32x32xf32>, vector<32x256xf32>, vector<32x256xf32> -> vector<32x256xf32>
    %135 = arith.addf %130, %134 : vector<32x256xf32>
    %c0_100 = arith.constant 0 : index
    %c129_101 = arith.constant 129 : index
    %136 = vector.load %arg6[%c0_100, %c129_101] : memref<32x401xf32, #tpu.memory_space<vmem>>, vector<32x256xf32>
    %cst_102 = arith.constant 0.000000e+00 : f32
    %137 = vector.broadcast %cst_102 : f32 to vector<32x256xf32>
    %138 = arith.select %27, %136, %137 : vector<32x256xi1>, vector<32x256xf32>
    %c5_103 = arith.constant 5 : index
    %c0_104 = arith.constant 0 : index
    %c0_105 = arith.constant 0 : index
    %139 = vector.load %arg2[%c5_103, %c0_104, %c0_105] : memref<9x32x32xf32, #tpu.memory_space<vmem>>, vector<1x32x32xf32>
    %140 = vector.shape_cast %139 : vector<1x32x32xf32> to vector<32x32xf32>
    %cst_106 = arith.constant dense<0.000000e+00> : vector<32x256xf32>
    %141 = tpu.matmul %140, %138, %cst_106 {dimension_numbers = #tpu.dot_dimension_numbers<[1], [0], [0], [1], [0, 0, 1, 1], [], []>} : vector<32x32xf32>, vector<32x256xf32>, vector<32x256xf32> -> vector<32x256xf32>
    %142 = arith.addf %135, %141 : vector<32x256xf32>
    %c0_107 = arith.constant 0 : index
    %c143_108 = arith.constant 143 : index
    %143 = vector.load %arg6[%c0_107, %c143_108] : memref<32x401xf32, #tpu.memory_space<vmem>>, vector<32x256xf32>
    %cst_109 = arith.constant 0.000000e+00 : f32
    %144 = vector.broadcast %cst_109 : f32 to vector<32x256xf32>
    %145 = arith.select %25, %143, %144 : vector<32x256xi1>, vector<32x256xf32>
    %c6_110 = arith.constant 6 : index
    %c0_111 = arith.constant 0 : index
    %c0_112 = arith.constant 0 : index
    %146 = vector.load %arg2[%c6_110, %c0_111, %c0_112] : memref<9x32x32xf32, #tpu.memory_space<vmem>>, vector<1x32x32xf32>
    %147 = vector.shape_cast %146 : vector<1x32x32xf32> to vector<32x32xf32>
    %cst_113 = arith.constant dense<0.000000e+00> : vector<32x256xf32>
    %148 = tpu.matmul %147, %145, %cst_113 {dimension_numbers = #tpu.dot_dimension_numbers<[1], [0], [0], [1], [0, 0, 1, 1], [], []>} : vector<32x32xf32>, vector<32x256xf32>, vector<32x256xf32> -> vector<32x256xf32>
    %149 = arith.addf %142, %148 : vector<32x256xf32>
    %c0_114 = arith.constant 0 : index
    %c144_115 = arith.constant 144 : index
    %150 = vector.load %arg6[%c0_114, %c144_115] : memref<32x401xf32, #tpu.memory_space<vmem>>, vector<32x256xf32>
    %c7_116 = arith.constant 7 : index
    %c0_117 = arith.constant 0 : index
    %c0_118 = arith.constant 0 : index
    %151 = vector.load %arg2[%c7_116, %c0_117, %c0_118] : memref<9x32x32xf32, #tpu.memory_space<vmem>>, vector<1x32x32xf32>
    %152 = vector.shape_cast %151 : vector<1x32x32xf32> to vector<32x32xf32>
    %cst_119 = arith.constant dense<0.000000e+00> : vector<32x256xf32>
    %153 = tpu.matmul %152, %150, %cst_119 {dimension_numbers = #tpu.dot_dimension_numbers<[1], [0], [0], [1], [0, 0, 1, 1], [], []>} : vector<32x32xf32>, vector<32x256xf32>, vector<32x256xf32> -> vector<32x256xf32>
    %154 = arith.addf %149, %153 : vector<32x256xf32>
    %c0_120 = arith.constant 0 : index
    %c145_121 = arith.constant 145 : index
    %155 = vector.load %arg6[%c0_120, %c145_121] : memref<32x401xf32, #tpu.memory_space<vmem>>, vector<32x256xf32>
    %cst_122 = arith.constant 0.000000e+00 : f32
    %156 = vector.broadcast %cst_122 : f32 to vector<32x256xf32>
    %157 = arith.select %27, %155, %156 : vector<32x256xi1>, vector<32x256xf32>
    %c8_123 = arith.constant 8 : index
    %c0_124 = arith.constant 0 : index
    %c0_125 = arith.constant 0 : index
    %158 = vector.load %arg2[%c8_123, %c0_124, %c0_125] : memref<9x32x32xf32, #tpu.memory_space<vmem>>, vector<1x32x32xf32>
    %159 = vector.shape_cast %158 : vector<1x32x32xf32> to vector<32x32xf32>
    %cst_126 = arith.constant dense<0.000000e+00> : vector<32x256xf32>
    %160 = tpu.matmul %159, %157, %cst_126 {dimension_numbers = #tpu.dot_dimension_numbers<[1], [0], [0], [1], [0, 0, 1, 1], [], []>} : vector<32x32xf32>, vector<32x256xf32>, vector<32x256xf32> -> vector<32x256xf32>
    %161 = arith.addf %154, %160 : vector<32x256xf32>
    %162 = vector.broadcast %1 : vector<32x1xf32> to vector<32x256xf32>
    %163 = arith.addf %161, %162 : vector<32x256xf32>
    %c1_127 = arith.constant 1 : index
    %c0_128 = arith.constant 0 : index
    %c0_129 = arith.constant 0 : index
    %164 = vector.load %arg7[%c1_127, %c0_128, %c0_129] : memref<2x32x256xf32, #tpu.memory_space<vmem>>, vector<1x32x256xf32>
    %165 = vector.shape_cast %164 : vector<1x32x256xf32> to vector<32x256xf32>
    %166 = vector.shape_cast %163 : vector<32x256xf32> to vector<1x32x256xf32>
    tpu.vector_store %arg7[%c1_127, %c0_128, %c0_129], %166 {strides = array<i32>} : memref<2x32x256xf32, #tpu.memory_space<vmem>>, vector<1x32x256xf32>,
    %cst_130 = arith.constant dense<0.000000e+00> : vector<32xf32>
    %167 = vector.multi_reduction <add>, %163, %cst_130 [1] : vector<32x256xf32> to vector<32xf32>
    %168 = vector.shape_cast %167 : vector<32xf32> to vector<32x1xf32>
    %169 = arith.addf %98, %168 : vector<32x1xf32>
    %170 = arith.mulf %163, %163 : vector<32x256xf32>
    %cst_131 = arith.constant dense<0.000000e+00> : vector<32xf32>
    %171 = vector.multi_reduction <add>, %170, %cst_131 [1] : vector<32x256xf32> to vector<32xf32>
    %172 = vector.shape_cast %171 : vector<32xf32> to vector<32x1xf32>
    %173 = arith.addf %102, %172 : vector<32x1xf32>
    %cst_132 = arith.constant 0.001953125 : f32
    %174 = vector.broadcast %cst_132 : f32 to vector<32x1xf32>
    %175 = arith.mulf %169, %174 : vector<32x1xf32>
    %cst_133 = arith.constant 0.001953125 : f32
    %176 = vector.broadcast %cst_133 : f32 to vector<32x1xf32>
    %177 = arith.mulf %173, %176 : vector<32x1xf32>
    %178 = arith.mulf %175, %175 : vector<32x1xf32>
    %179 = arith.subf %177, %178 : vector<32x1xf32>
    %cst_134 = arith.constant 9.99999974E-6 : f32
    %180 = vector.broadcast %cst_134 : f32 to vector<32x1xf32>
    %181 = arith.addf %179, %180 : vector<32x1xf32>
    %182 = math.rsqrt %181 : vector<32x1xf32>
    %183 = arith.mulf %2, %182 : vector<32x1xf32>
    %184 = arith.mulf %175, %183 : vector<32x1xf32>
    %185 = arith.subf %3, %184 : vector<32x1xf32>
    %cst_135 = arith.constant 0.000000e+00 : f32
    %186 = vector.broadcast %cst_135 : f32 to vector<32x1xf32>
    %cst_136 = arith.constant 0.000000e+00 : f32
    %187 = vector.broadcast %cst_136 : f32 to vector<32x1xf32>
    %c0_137 = arith.constant 0 : index
    %c0_138 = arith.constant 0 : index
    %c0_139 = arith.constant 0 : index
    %188 = vector.load %arg7[%c0_137, %c0_138, %c0_139] : memref<2x32x256xf32, #tpu.memory_space<vmem>>, vector<1x32x256xf32>
    %189 = vector.shape_cast %188 : vector<1x32x256xf32> to vector<32x256xf32>
    %190 = vector.broadcast %183 : vector<32x1xf32> to vector<32x256xf32>
    %191 = arith.mulf %189, %190 : vector<32x256xf32>
    %192 = vector.broadcast %185 : vector<32x1xf32> to vector<32x256xf32>
    %193 = arith.addf %191, %192 : vector<32x256xf32>
    %cst_140 = arith.constant 0.000000e+00 : f32
    %194 = vector.broadcast %cst_140 : f32 to vector<32x256xf32>
    %195 = arith.maximumf %193, %194 : vector<32x256xf32>
    %c0_141 = arith.constant 0 : index
    %c128_142 = arith.constant 128 : index
    %196 = vector.load %arg6[%c0_141, %c128_142] : memref<32x401xf32, #tpu.memory_space<vmem>>, vector<32x256xf32>
    tpu.vector_store %arg6[%c0_141, %c128_142], %195 {strides = array<i32>} : memref<32x401xf32, #tpu.memory_space<vmem>>, vector<32x256xf32>,
    %c0_143 = arith.constant 0 : index
    %c111_144 = arith.constant 111 : index
    %197 = vector.load %arg6[%c0_143, %c111_144] : memref<32x401xf32, #tpu.memory_space<vmem>>, vector<32x256xf32>
    %cst_145 = arith.constant 0.000000e+00 : f32
    %198 = vector.broadcast %cst_145 : f32 to vector<32x256xf32>
    %199 = arith.select %25, %197, %198 : vector<32x256xi1>, vector<32x256xf32>
    %c0_146 = arith.constant 0 : index
    %c0_147 = arith.constant 0 : index
    %c0_148 = arith.constant 0 : index
    %200 = vector.load %arg3[%c0_146, %c0_147, %c0_148] : memref<9x32x32xf32, #tpu.memory_space<vmem>>, vector<1x32x32xf32>
    %201 = vector.shape_cast %200 : vector<1x32x32xf32> to vector<32x32xf32>
    %cst_149 = arith.constant dense<0.000000e+00> : vector<32x256xf32>
    %202 = tpu.matmul %201, %199, %cst_149 {dimension_numbers = #tpu.dot_dimension_numbers<[1], [0], [0], [1], [0, 0, 1, 1], [], []>} : vector<32x32xf32>, vector<32x256xf32>, vector<32x256xf32> -> vector<32x256xf32>
    %c0_150 = arith.constant 0 : index
    %c112_151 = arith.constant 112 : index
    %203 = vector.load %arg6[%c0_150, %c112_151] : memref<32x401xf32, #tpu.memory_space<vmem>>, vector<32x256xf32>
    %c1_152 = arith.constant 1 : index
    %c0_153 = arith.constant 0 : index
    %c0_154 = arith.constant 0 : index
    %204 = vector.load %arg3[%c1_152, %c0_153, %c0_154] : memref<9x32x32xf32, #tpu.memory_space<vmem>>, vector<1x32x32xf32>
    %205 = vector.shape_cast %204 : vector<1x32x32xf32> to vector<32x32xf32>
    %cst_155 = arith.constant dense<0.000000e+00> : vector<32x256xf32>
    %206 = tpu.matmul %205, %203, %cst_155 {dimension_numbers = #tpu.dot_dimension_numbers<[1], [0], [0], [1], [0, 0, 1, 1], [], []>} : vector<32x32xf32>, vector<32x256xf32>, vector<32x256xf32> -> vector<32x256xf32>
    %207 = arith.addf %202, %206 : vector<32x256xf32>
    %c0_156 = arith.constant 0 : index
    %c113_157 = arith.constant 113 : index
    %208 = vector.load %arg6[%c0_156, %c113_157] : memref<32x401xf32, #tpu.memory_space<vmem>>, vector<32x256xf32>
    %cst_158 = arith.constant 0.000000e+00 : f32
    %209 = vector.broadcast %cst_158 : f32 to vector<32x256xf32>
    %210 = arith.select %27, %208, %209 : vector<32x256xi1>, vector<32x256xf32>
    %c2_159 = arith.constant 2 : index
    %c0_160 = arith.constant 0 : index
    %c0_161 = arith.constant 0 : index
    %211 = vector.load %arg3[%c2_159, %c0_160, %c0_161] : memref<9x32x32xf32, #tpu.memory_space<vmem>>, vector<1x32x32xf32>
    %212 = vector.shape_cast %211 : vector<1x32x32xf32> to vector<32x32xf32>
    %cst_162 = arith.constant dense<0.000000e+00> : vector<32x256xf32>
    %213 = tpu.matmul %212, %210, %cst_162 {dimension_numbers = #tpu.dot_dimension_numbers<[1], [0], [0], [1], [0, 0, 1, 1], [], []>} : vector<32x32xf32>, vector<32x256xf32>, vector<32x256xf32> -> vector<32x256xf32>
    %214 = arith.addf %207, %213 : vector<32x256xf32>
    %c0_163 = arith.constant 0 : index
    %c127_164 = arith.constant 127 : index
    %215 = vector.load %arg6[%c0_163, %c127_164] : memref<32x401xf32, #tpu.memory_space<vmem>>, vector<32x256xf32>
    %cst_165 = arith.constant 0.000000e+00 : f32
    %216 = vector.broadcast %cst_165 : f32 to vector<32x256xf32>
    %217 = arith.select %25, %215, %216 : vector<32x256xi1>, vector<32x256xf32>
    %c3_166 = arith.constant 3 : index
    %c0_167 = arith.constant 0 : index
    %c0_168 = arith.constant 0 : index
    %218 = vector.load %arg3[%c3_166, %c0_167, %c0_168] : memref<9x32x32xf32, #tpu.memory_space<vmem>>, vector<1x32x32xf32>
    %219 = vector.shape_cast %218 : vector<1x32x32xf32> to vector<32x32xf32>
    %cst_169 = arith.constant dense<0.000000e+00> : vector<32x256xf32>
    %220 = tpu.matmul %219, %217, %cst_169 {dimension_numbers = #tpu.dot_dimension_numbers<[1], [0], [0], [1], [0, 0, 1, 1], [], []>} : vector<32x32xf32>, vector<32x256xf32>, vector<32x256xf32> -> vector<32x256xf32>
    %221 = arith.addf %214, %220 : vector<32x256xf32>
    %c0_170 = arith.constant 0 : index
    %c128_171 = arith.constant 128 : index
    %222 = vector.load %arg6[%c0_170, %c128_171] : memref<32x401xf32, #tpu.memory_space<vmem>>, vector<32x256xf32>
    %c4_172 = arith.constant 4 : index
    %c0_173 = arith.constant 0 : index
    %c0_174 = arith.constant 0 : index
    %223 = vector.load %arg3[%c4_172, %c0_173, %c0_174] : memref<9x32x32xf32, #tpu.memory_space<vmem>>, vector<1x32x32xf32>
    %224 = vector.shape_cast %223 : vector<1x32x32xf32> to vector<32x32xf32>
    %cst_175 = arith.constant dense<0.000000e+00> : vector<32x256xf32>
    %225 = tpu.matmul %224, %222, %cst_175 {dimension_numbers = #tpu.dot_dimension_numbers<[1], [0], [0], [1], [0, 0, 1, 1], [], []>} : vector<32x32xf32>, vector<32x256xf32>, vector<32x256xf32> -> vector<32x256xf32>
    %226 = arith.addf %221, %225 : vector<32x256xf32>
    %c0_176 = arith.constant 0 : index
    %c129_177 = arith.constant 129 : index
    %227 = vector.load %arg6[%c0_176, %c129_177] : memref<32x401xf32, #tpu.memory_space<vmem>>, vector<32x256xf32>
    %cst_178 = arith.constant 0.000000e+00 : f32
    %228 = vector.broadcast %cst_178 : f32 to vector<32x256xf32>
    %229 = arith.select %27, %227, %228 : vector<32x256xi1>, vector<32x256xf32>
    %c5_179 = arith.constant 5 : index
    %c0_180 = arith.constant 0 : index
    %c0_181 = arith.constant 0 : index
    %230 = vector.load %arg3[%c5_179, %c0_180, %c0_181] : memref<9x32x32xf32, #tpu.memory_space<vmem>>, vector<1x32x32xf32>
    %231 = vector.shape_cast %230 : vector<1x32x32xf32> to vector<32x32xf32>
    %cst_182 = arith.constant dense<0.000000e+00> : vector<32x256xf32>
    %232 = tpu.matmul %231, %229, %cst_182 {dimension_numbers = #tpu.dot_dimension_numbers<[1], [0], [0], [1], [0, 0, 1, 1], [], []>} : vector<32x32xf32>, vector<32x256xf32>, vector<32x256xf32> -> vector<32x256xf32>
    %233 = arith.addf %226, %232 : vector<32x256xf32>
    %c0_183 = arith.constant 0 : index
    %c143_184 = arith.constant 143 : index
    %234 = vector.load %arg6[%c0_183, %c143_184] : memref<32x401xf32, #tpu.memory_space<vmem>>, vector<32x256xf32>
    %cst_185 = arith.constant 0.000000e+00 : f32
    %235 = vector.broadcast %cst_185 : f32 to vector<32x256xf32>
    %236 = arith.select %25, %234, %235 : vector<32x256xi1>, vector<32x256xf32>
    %c6_186 = arith.constant 6 : index
    %c0_187 = arith.constant 0 : index
    %c0_188 = arith.constant 0 : index
    %237 = vector.load %arg3[%c6_186, %c0_187, %c0_188] : memref<9x32x32xf32, #tpu.memory_space<vmem>>, vector<1x32x32xf32>
    %238 = vector.shape_cast %237 : vector<1x32x32xf32> to vector<32x32xf32>
    %cst_189 = arith.constant dense<0.000000e+00> : vector<32x256xf32>
    %239 = tpu.matmul %238, %236, %cst_189 {dimension_numbers = #tpu.dot_dimension_numbers<[1], [0], [0], [1], [0, 0, 1, 1], [], []>} : vector<32x32xf32>, vector<32x256xf32>, vector<32x256xf32> -> vector<32x256xf32>
    %240 = arith.addf %233, %239 : vector<32x256xf32>
    %c0_190 = arith.constant 0 : index
    %c144_191 = arith.constant 144 : index
    %241 = vector.load %arg6[%c0_190, %c144_191] : memref<32x401xf32, #tpu.memory_space<vmem>>, vector<32x256xf32>
    %c7_192 = arith.constant 7 : index
    %c0_193 = arith.constant 0 : index
    %c0_194 = arith.constant 0 : index
    %242 = vector.load %arg3[%c7_192, %c0_193, %c0_194] : memref<9x32x32xf32, #tpu.memory_space<vmem>>, vector<1x32x32xf32>
    %243 = vector.shape_cast %242 : vector<1x32x32xf32> to vector<32x32xf32>
    %cst_195 = arith.constant dense<0.000000e+00> : vector<32x256xf32>
    %244 = tpu.matmul %243, %241, %cst_195 {dimension_numbers = #tpu.dot_dimension_numbers<[1], [0], [0], [1], [0, 0, 1, 1], [], []>} : vector<32x32xf32>, vector<32x256xf32>, vector<32x256xf32> -> vector<32x256xf32>
    %245 = arith.addf %240, %244 : vector<32x256xf32>
    %c0_196 = arith.constant 0 : index
    %c145_197 = arith.constant 145 : index
    %246 = vector.load %arg6[%c0_196, %c145_197] : memref<32x401xf32, #tpu.memory_space<vmem>>, vector<32x256xf32>
    %cst_198 = arith.constant 0.000000e+00 : f32
    %247 = vector.broadcast %cst_198 : f32 to vector<32x256xf32>
    %248 = arith.select %27, %246, %247 : vector<32x256xi1>, vector<32x256xf32>
    %c8_199 = arith.constant 8 : index
    %c0_200 = arith.constant 0 : index
    %c0_201 = arith.constant 0 : index
    %249 = vector.load %arg3[%c8_199, %c0_200, %c0_201] : memref<9x32x32xf32, #tpu.memory_space<vmem>>, vector<1x32x32xf32>
    %250 = vector.shape_cast %249 : vector<1x32x32xf32> to vector<32x32xf32>
    %cst_202 = arith.constant dense<0.000000e+00> : vector<32x256xf32>
    %251 = tpu.matmul %250, %248, %cst_202 {dimension_numbers = #tpu.dot_dimension_numbers<[1], [0], [0], [1], [0, 0, 1, 1], [], []>} : vector<32x32xf32>, vector<32x256xf32>, vector<32x256xf32> -> vector<32x256xf32>
    %252 = arith.addf %245, %251 : vector<32x256xf32>
    %253 = vector.broadcast %4 : vector<32x1xf32> to vector<32x256xf32>
    %254 = arith.addf %252, %253 : vector<32x256xf32>
    %c0_203 = arith.constant 0 : index
    %c0_204 = arith.constant 0 : index
    %c0_205 = arith.constant 0 : index
    %255 = vector.load %arg8[%c0_203, %c0_204, %c0_205] : memref<2x32x256xf32, #tpu.memory_space<vmem>>, vector<1x32x256xf32>
    %256 = vector.shape_cast %255 : vector<1x32x256xf32> to vector<32x256xf32>
    %257 = vector.shape_cast %254 : vector<32x256xf32> to vector<1x32x256xf32>
    tpu.vector_store %arg8[%c0_203, %c0_204, %c0_205], %257 {strides = array<i32>} : memref<2x32x256xf32, #tpu.memory_space<vmem>>, vector<1x32x256xf32>,
    %cst_206 = arith.constant dense<0.000000e+00> : vector<32xf32>
    %258 = vector.multi_reduction <add>, %254, %cst_206 [1] : vector<32x256xf32> to vector<32xf32>
    %259 = vector.shape_cast %258 : vector<32xf32> to vector<32x1xf32>
    %260 = arith.addf %186, %259 : vector<32x1xf32>
    %261 = arith.mulf %254, %254 : vector<32x256xf32>
    %cst_207 = arith.constant dense<0.000000e+00> : vector<32xf32>
    %262 = vector.multi_reduction <add>, %261, %cst_207 [1] : vector<32x256xf32> to vector<32xf32>
    %263 = vector.shape_cast %262 : vector<32xf32> to vector<32x1xf32>
    %264 = arith.addf %187, %263 : vector<32x1xf32>
    %c1_208 = arith.constant 1 : index
    %c0_209 = arith.constant 0 : index
    %c0_210 = arith.constant 0 : index
    %265 = vector.load %arg7[%c1_208, %c0_209, %c0_210] : memref<2x32x256xf32, #tpu.memory_space<vmem>>, vector<1x32x256xf32>
    %266 = vector.shape_cast %265 : vector<1x32x256xf32> to vector<32x256xf32>
    %267 = vector.broadcast %183 : vector<32x1xf32> to vector<32x256xf32>
    %268 = arith.mulf %266, %267 : vector<32x256xf32>
    %269 = vector.broadcast %185 : vector<32x1xf32> to vector<32x256xf32>
    %270 = arith.addf %268, %269 : vector<32x256xf32>
    %cst_211 = arith.constant 0.000000e+00 : f32
    %271 = vector.broadcast %cst_211 : f32 to vector<32x256xf32>
    %272 = arith.maximumf %270, %271 : vector<32x256xf32>
    %c0_212 = arith.constant 0 : index
    %c128_213 = arith.constant 128 : index
    %273 = vector.load %arg6[%c0_212, %c128_213] : memref<32x401xf32, #tpu.memory_space<vmem>>, vector<32x256xf32>
    tpu.vector_store %arg6[%c0_212, %c128_213], %272 {strides = array<i32>} : memref<32x401xf32, #tpu.memory_space<vmem>>, vector<32x256xf32>,
    %c0_214 = arith.constant 0 : index
    %c111_215 = arith.constant 111 : index
    %274 = vector.load %arg6[%c0_214, %c111_215] : memref<32x401xf32, #tpu.memory_space<vmem>>, vector<32x256xf32>
    %cst_216 = arith.constant 0.000000e+00 : f32
    %275 = vector.broadcast %cst_216 : f32 to vector<32x256xf32>
    %276 = arith.select %25, %274, %275 : vector<32x256xi1>, vector<32x256xf32>
    %c0_217 = arith.constant 0 : index
    %c0_218 = arith.constant 0 : index
    %c0_219 = arith.constant 0 : index
    %277 = vector.load %arg3[%c0_217, %c0_218, %c0_219] : memref<9x32x32xf32, #tpu.memory_space<vmem>>, vector<1x32x32xf32>
    %278 = vector.shape_cast %277 : vector<1x32x32xf32> to vector<32x32xf32>
    %cst_220 = arith.constant dense<0.000000e+00> : vector<32x256xf32>
    %279 = tpu.matmul %278, %276, %cst_220 {dimension_numbers = #tpu.dot_dimension_numbers<[1], [0], [0], [1], [0, 0, 1, 1], [], []>} : vector<32x32xf32>, vector<32x256xf32>, vector<32x256xf32> -> vector<32x256xf32>
    %c0_221 = arith.constant 0 : index
    %c112_222 = arith.constant 112 : index
    %280 = vector.load %arg6[%c0_221, %c112_222] : memref<32x401xf32, #tpu.memory_space<vmem>>, vector<32x256xf32>
    %c1_223 = arith.constant 1 : index
    %c0_224 = arith.constant 0 : index
    %c0_225 = arith.constant 0 : index
    %281 = vector.load %arg3[%c1_223, %c0_224, %c0_225] : memref<9x32x32xf32, #tpu.memory_space<vmem>>, vector<1x32x32xf32>
    %282 = vector.shape_cast %281 : vector<1x32x32xf32> to vector<32x32xf32>
    %cst_226 = arith.constant dense<0.000000e+00> : vector<32x256xf32>
    %283 = tpu.matmul %282, %280, %cst_226 {dimension_numbers = #tpu.dot_dimension_numbers<[1], [0], [0], [1], [0, 0, 1, 1], [], []>} : vector<32x32xf32>, vector<32x256xf32>, vector<32x256xf32> -> vector<32x256xf32>
    %284 = arith.addf %279, %283 : vector<32x256xf32>
    %c0_227 = arith.constant 0 : index
    %c113_228 = arith.constant 113 : index
    %285 = vector.load %arg6[%c0_227, %c113_228] : memref<32x401xf32, #tpu.memory_space<vmem>>, vector<32x256xf32>
    %cst_229 = arith.constant 0.000000e+00 : f32
    %286 = vector.broadcast %cst_229 : f32 to vector<32x256xf32>
    %287 = arith.select %27, %285, %286 : vector<32x256xi1>, vector<32x256xf32>
    %c2_230 = arith.constant 2 : index
    %c0_231 = arith.constant 0 : index
    %c0_232 = arith.constant 0 : index
    %288 = vector.load %arg3[%c2_230, %c0_231, %c0_232] : memref<9x32x32xf32, #tpu.memory_space<vmem>>, vector<1x32x32xf32>
    %289 = vector.shape_cast %288 : vector<1x32x32xf32> to vector<32x32xf32>
    %cst_233 = arith.constant dense<0.000000e+00> : vector<32x256xf32>
    %290 = tpu.matmul %289, %287, %cst_233 {dimension_numbers = #tpu.dot_dimension_numbers<[1], [0], [0], [1], [0, 0, 1, 1], [], []>} : vector<32x32xf32>, vector<32x256xf32>, vector<32x256xf32> -> vector<32x256xf32>
    %291 = arith.addf %284, %290 : vector<32x256xf32>
    %c0_234 = arith.constant 0 : index
    %c127_235 = arith.constant 127 : index
    %292 = vector.load %arg6[%c0_234, %c127_235] : memref<32x401xf32, #tpu.memory_space<vmem>>, vector<32x256xf32>
    %cst_236 = arith.constant 0.000000e+00 : f32
    %293 = vector.broadcast %cst_236 : f32 to vector<32x256xf32>
    %294 = arith.select %25, %292, %293 : vector<32x256xi1>, vector<32x256xf32>
    %c3_237 = arith.constant 3 : index
    %c0_238 = arith.constant 0 : index
    %c0_239 = arith.constant 0 : index
    %295 = vector.load %arg3[%c3_237, %c0_238, %c0_239] : memref<9x32x32xf32, #tpu.memory_space<vmem>>, vector<1x32x32xf32>
    %296 = vector.shape_cast %295 : vector<1x32x32xf32> to vector<32x32xf32>
    %cst_240 = arith.constant dense<0.000000e+00> : vector<32x256xf32>
    %297 = tpu.matmul %296, %294, %cst_240 {dimension_numbers = #tpu.dot_dimension_numbers<[1], [0], [0], [1], [0, 0, 1, 1], [], []>} : vector<32x32xf32>, vector<32x256xf32>, vector<32x256xf32> -> vector<32x256xf32>
    %298 = arith.addf %291, %297 : vector<32x256xf32>
    %c0_241 = arith.constant 0 : index
    %c128_242 = arith.constant 128 : index
    %299 = vector.load %arg6[%c0_241, %c128_242] : memref<32x401xf32, #tpu.memory_space<vmem>>, vector<32x256xf32>
    %c4_243 = arith.constant 4 : index
    %c0_244 = arith.constant 0 : index
    %c0_245 = arith.constant 0 : index
    %300 = vector.load %arg3[%c4_243, %c0_244, %c0_245] : memref<9x32x32xf32, #tpu.memory_space<vmem>>, vector<1x32x32xf32>
    %301 = vector.shape_cast %300 : vector<1x32x32xf32> to vector<32x32xf32>
    %cst_246 = arith.constant dense<0.000000e+00> : vector<32x256xf32>
    %302 = tpu.matmul %301, %299, %cst_246 {dimension_numbers = #tpu.dot_dimension_numbers<[1], [0], [0], [1], [0, 0, 1, 1], [], []>} : vector<32x32xf32>, vector<32x256xf32>, vector<32x256xf32> -> vector<32x256xf32>
    %303 = arith.addf %298, %302 : vector<32x256xf32>
    %c0_247 = arith.constant 0 : index
    %c129_248 = arith.constant 129 : index
    %304 = vector.load %arg6[%c0_247, %c129_248] : memref<32x401xf32, #tpu.memory_space<vmem>>, vector<32x256xf32>
    %cst_249 = arith.constant 0.000000e+00 : f32
    %305 = vector.broadcast %cst_249 : f32 to vector<32x256xf32>
    %306 = arith.select %27, %304, %305 : vector<32x256xi1>, vector<32x256xf32>
    %c5_250 = arith.constant 5 : index
    %c0_251 = arith.constant 0 : index
    %c0_252 = arith.constant 0 : index
    %307 = vector.load %arg3[%c5_250, %c0_251, %c0_252] : memref<9x32x32xf32, #tpu.memory_space<vmem>>, vector<1x32x32xf32>
    %308 = vector.shape_cast %307 : vector<1x32x32xf32> to vector<32x32xf32>
    %cst_253 = arith.constant dense<0.000000e+00> : vector<32x256xf32>
    %309 = tpu.matmul %308, %306, %cst_253 {dimension_numbers = #tpu.dot_dimension_numbers<[1], [0], [0], [1], [0, 0, 1, 1], [], []>} : vector<32x32xf32>, vector<32x256xf32>, vector<32x256xf32> -> vector<32x256xf32>
    %310 = arith.addf %303, %309 : vector<32x256xf32>
    %c0_254 = arith.constant 0 : index
    %c143_255 = arith.constant 143 : index
    %311 = vector.load %arg6[%c0_254, %c143_255] : memref<32x401xf32, #tpu.memory_space<vmem>>, vector<32x256xf32>
    %cst_256 = arith.constant 0.000000e+00 : f32
    %312 = vector.broadcast %cst_256 : f32 to vector<32x256xf32>
    %313 = arith.select %25, %311, %312 : vector<32x256xi1>, vector<32x256xf32>
    %c6_257 = arith.constant 6 : index
    %c0_258 = arith.constant 0 : index
    %c0_259 = arith.constant 0 : index
    %314 = vector.load %arg3[%c6_257, %c0_258, %c0_259] : memref<9x32x32xf32, #tpu.memory_space<vmem>>, vector<1x32x32xf32>
    %315 = vector.shape_cast %314 : vector<1x32x32xf32> to vector<32x32xf32>
    %cst_260 = arith.constant dense<0.000000e+00> : vector<32x256xf32>
    %316 = tpu.matmul %315, %313, %cst_260 {dimension_numbers = #tpu.dot_dimension_numbers<[1], [0], [0], [1], [0, 0, 1, 1], [], []>} : vector<32x32xf32>, vector<32x256xf32>, vector<32x256xf32> -> vector<32x256xf32>
    %317 = arith.addf %310, %316 : vector<32x256xf32>
    %c0_261 = arith.constant 0 : index
    %c144_262 = arith.constant 144 : index
    %318 = vector.load %arg6[%c0_261, %c144_262] : memref<32x401xf32, #tpu.memory_space<vmem>>, vector<32x256xf32>
    %c7_263 = arith.constant 7 : index
    %c0_264 = arith.constant 0 : index
    %c0_265 = arith.constant 0 : index
    %319 = vector.load %arg3[%c7_263, %c0_264, %c0_265] : memref<9x32x32xf32, #tpu.memory_space<vmem>>, vector<1x32x32xf32>
    %320 = vector.shape_cast %319 : vector<1x32x32xf32> to vector<32x32xf32>
    %cst_266 = arith.constant dense<0.000000e+00> : vector<32x256xf32>
    %321 = tpu.matmul %320, %318, %cst_266 {dimension_numbers = #tpu.dot_dimension_numbers<[1], [0], [0], [1], [0, 0, 1, 1], [], []>} : vector<32x32xf32>, vector<32x256xf32>, vector<32x256xf32> -> vector<32x256xf32>
    %322 = arith.addf %317, %321 : vector<32x256xf32>
    %c0_267 = arith.constant 0 : index
    %c145_268 = arith.constant 145 : index
    %323 = vector.load %arg6[%c0_267, %c145_268] : memref<32x401xf32, #tpu.memory_space<vmem>>, vector<32x256xf32>
    %cst_269 = arith.constant 0.000000e+00 : f32
    %324 = vector.broadcast %cst_269 : f32 to vector<32x256xf32>
    %325 = arith.select %27, %323, %324 : vector<32x256xi1>, vector<32x256xf32>
    %c8_270 = arith.constant 8 : index
    %c0_271 = arith.constant 0 : index
    %c0_272 = arith.constant 0 : index
    %326 = vector.load %arg3[%c8_270, %c0_271, %c0_272] : memref<9x32x32xf32, #tpu.memory_space<vmem>>, vector<1x32x32xf32>
    %327 = vector.shape_cast %326 : vector<1x32x32xf32> to vector<32x32xf32>
    %cst_273 = arith.constant dense<0.000000e+00> : vector<32x256xf32>
    %328 = tpu.matmul %327, %325, %cst_273 {dimension_numbers = #tpu.dot_dimension_numbers<[1], [0], [0], [1], [0, 0, 1, 1], [], []>} : vector<32x32xf32>, vector<32x256xf32>, vector<32x256xf32> -> vector<32x256xf32>
    %329 = arith.addf %322, %328 : vector<32x256xf32>
    %330 = vector.broadcast %4 : vector<32x1xf32> to vector<32x256xf32>
    %331 = arith.addf %329, %330 : vector<32x256xf32>
    %c1_274 = arith.constant 1 : index
    %c0_275 = arith.constant 0 : index
    %c0_276 = arith.constant 0 : index
    %332 = vector.load %arg8[%c1_274, %c0_275, %c0_276] : memref<2x32x256xf32, #tpu.memory_space<vmem>>, vector<1x32x256xf32>
    %333 = vector.shape_cast %332 : vector<1x32x256xf32> to vector<32x256xf32>
    %334 = vector.shape_cast %331 : vector<32x256xf32> to vector<1x32x256xf32>
    tpu.vector_store %arg8[%c1_274, %c0_275, %c0_276], %334 {strides = array<i32>} : memref<2x32x256xf32, #tpu.memory_space<vmem>>, vector<1x32x256xf32>,
    %cst_277 = arith.constant dense<0.000000e+00> : vector<32xf32>
    %335 = vector.multi_reduction <add>, %331, %cst_277 [1] : vector<32x256xf32> to vector<32xf32>
    %336 = vector.shape_cast %335 : vector<32xf32> to vector<32x1xf32>
    %337 = arith.addf %260, %336 : vector<32x1xf32>
    %338 = arith.mulf %331, %331 : vector<32x256xf32>
    %cst_278 = arith.constant dense<0.000000e+00> : vector<32xf32>
    %339 = vector.multi_reduction <add>, %338, %cst_278 [1] : vector<32x256xf32> to vector<32xf32>
    %340 = vector.shape_cast %339 : vector<32xf32> to vector<32x1xf32>
    %341 = arith.addf %264, %340 : vector<32x1xf32>
    %cst_279 = arith.constant 0.001953125 : f32
    %342 = vector.broadcast %cst_279 : f32 to vector<32x1xf32>
    %343 = arith.mulf %337, %342 : vector<32x1xf32>
    %cst_280 = arith.constant 0.001953125 : f32
    %344 = vector.broadcast %cst_280 : f32 to vector<32x1xf32>
    %345 = arith.mulf %341, %344 : vector<32x1xf32>
    %346 = arith.mulf %343, %343 : vector<32x1xf32>
    %347 = arith.subf %345, %346 : vector<32x1xf32>
    %cst_281 = arith.constant 9.99999974E-6 : f32
    %348 = vector.broadcast %cst_281 : f32 to vector<32x1xf32>
    %349 = arith.addf %347, %348 : vector<32x1xf32>
    %350 = math.rsqrt %349 : vector<32x1xf32>
    %351 = arith.mulf %5, %350 : vector<32x1xf32>
    %352 = arith.mulf %343, %351 : vector<32x1xf32>
    %353 = arith.subf %6, %352 : vector<32x1xf32>
    %c0_282 = arith.constant 0 : index
    %c0_283 = arith.constant 0 : index
    %c0_284 = arith.constant 0 : index
    %354 = vector.load %arg8[%c0_282, %c0_283, %c0_284] : memref<2x32x256xf32, #tpu.memory_space<vmem>>, vector<1x32x256xf32>
    %355 = vector.shape_cast %354 : vector<1x32x256xf32> to vector<32x256xf32>
    %356 = vector.broadcast %351 : vector<32x1xf32> to vector<32x256xf32>
    %357 = arith.mulf %355, %356 : vector<32x256xf32>
    %358 = vector.broadcast %353 : vector<32x1xf32> to vector<32x256xf32>
    %359 = arith.addf %357, %358 : vector<32x256xf32>
    %c0_285 = arith.constant 0 : index
    %c0_286 = arith.constant 0 : index
    %c0_287 = arith.constant 0 : index
    %360 = vector.load %arg1[%c0_285, %c0_286, %c0_287] : memref<2x32x256xf32, #tpu.memory_space<vmem>>, vector<1x32x256xf32>
    %361 = vector.shape_cast %360 : vector<1x32x256xf32> to vector<32x256xf32>
    %362 = arith.addf %359, %361 : vector<32x256xf32>
    %cst_288 = arith.constant 0.000000e+00 : f32
    %363 = vector.broadcast %cst_288 : f32 to vector<32x256xf32>
    %364 = arith.maximumf %362, %363 : vector<32x256xf32>
    %c0_289 = arith.constant 0 : index
    %c0_290 = arith.constant 0 : index
    %c0_291 = arith.constant 0 : index
    %365 = vector.load %arg5[%c0_289, %c0_290, %c0_291] : memref<2x32x256xf32, #tpu.memory_space<vmem>>, vector<1x32x256xf32>
    %366 = vector.shape_cast %365 : vector<1x32x256xf32> to vector<32x256xf32>
    %367 = vector.shape_cast %364 : vector<32x256xf32> to vector<1x32x256xf32>
    tpu.vector_store %arg5[%c0_289, %c0_290, %c0_291], %367 {strides = array<i32>} : memref<2x32x256xf32, #tpu.memory_space<vmem>>, vector<1x32x256xf32>,
    %c1_292 = arith.constant 1 : index
    %c0_293 = arith.constant 0 : index
    %c0_294 = arith.constant 0 : index
    %368 = vector.load %arg8[%c1_292, %c0_293, %c0_294] : memref<2x32x256xf32, #tpu.memory_space<vmem>>, vector<1x32x256xf32>
    %369 = vector.shape_cast %368 : vector<1x32x256xf32> to vector<32x256xf32>
    %370 = vector.broadcast %351 : vector<32x1xf32> to vector<32x256xf32>
    %371 = arith.mulf %369, %370 : vector<32x256xf32>
    %372 = vector.broadcast %353 : vector<32x1xf32> to vector<32x256xf32>
    %373 = arith.addf %371, %372 : vector<32x256xf32>
    %c1_295 = arith.constant 1 : index
    %c0_296 = arith.constant 0 : index
    %c0_297 = arith.constant 0 : index
    %374 = vector.load %arg1[%c1_295, %c0_296, %c0_297] : memref<2x32x256xf32, #tpu.memory_space<vmem>>, vector<1x32x256xf32>
    %375 = vector.shape_cast %374 : vector<1x32x256xf32> to vector<32x256xf32>
    %376 = arith.addf %373, %375 : vector<32x256xf32>
    %cst_298 = arith.constant 0.000000e+00 : f32
    %377 = vector.broadcast %cst_298 : f32 to vector<32x256xf32>
    %378 = arith.maximumf %376, %377 : vector<32x256xf32>
    %c1_299 = arith.constant 1 : index
    %c0_300 = arith.constant 0 : index
    %c0_301 = arith.constant 0 : index
    %379 = vector.load %arg5[%c1_299, %c0_300, %c0_301] : memref<2x32x256xf32, #tpu.memory_space<vmem>>, vector<1x32x256xf32>
    %380 = vector.shape_cast %379 : vector<1x32x256xf32> to vector<32x256xf32>
    %381 = vector.shape_cast %378 : vector<32x256xf32> to vector<1x32x256xf32>
    tpu.vector_store %arg5[%c1_299, %c0_300, %c0_301], %381 {strides = array<i32>} : memref<2x32x256xf32, #tpu.memory_space<vmem>>, vector<1x32x256xf32>,
    return
  }
  func.func @transform_0(%arg0: i32) -> (i32, i32, i32) {
    %c0_i32 = arith.constant 0 : i32
    %c0_i32_0 = arith.constant 0 : i32
    %c0_i32_1 = arith.constant 0 : i32
    %c0_i32_2 = arith.constant 0 : i32
    return %c0_i32, %c0_i32_0, %c0_i32_1 : i32, i32, i32
  }
  func.func @transform_1(%arg0: i32) -> (i32, i32, i32) {
    %c0_i32 = arith.constant 0 : i32
    %c0_i32_0 = arith.constant 0 : i32
    %c0_i32_1 = arith.constant 0 : i32
    %c0_i32_2 = arith.constant 0 : i32
    return %c0_i32, %c0_i32_0, %c0_i32_1 : i32, i32, i32
  }
  func.func @transform_2(%arg0: i32) -> (i32, i32, i32) {
    %c0_i32 = arith.constant 0 : i32
    %c0_i32_0 = arith.constant 0 : i32
    %c0_i32_1 = arith.constant 0 : i32
    %c0_i32_2 = arith.constant 0 : i32
    return %c0_i32, %c0_i32_0, %c0_i32_1 : i32, i32, i32
  }
  func.func @transform_3(%arg0: i32) -> (i32, i32) {
    %c0_i32 = arith.constant 0 : i32
    %c0_i32_0 = arith.constant 0 : i32
    %c0_i32_1 = arith.constant 0 : i32
    return %c0_i32, %c0_i32_0 : i32, i32
  }
  func.func @transform_4(%arg0: i32) -> (i32, i32, i32) {
    %c0_i32 = arith.constant 0 : i32
    %c0_i32_0 = arith.constant 0 : i32
    %c0_i32_1 = arith.constant 0 : i32
    %c0_i32_2 = arith.constant 0 : i32
    return %c0_i32, %c0_i32_0, %c0_i32_1 : i32, i32, i32
  }
}

</mosaic_0001>

<bundles_post_ra>
// kernel: unit_forward.1
= control target key start
LH: loop header
LB: loop body
LE: loop exit
PB: predicated region body
PF: predicated region fallthrough
CT: control target
= control target key end

     0   :  { %vm55_vm0 = vcmask 138240   ;;  %v8584_v0 = vmov 0.0   ;;  %s8585_s23 = smov 16   ;;  %s8586_s22 = smov 17   ;;  %v21_v45 = vlaneseq  ;;  %vm190_vm1 = vcmask 130048   ;;  %s10950_s0 = inlined_call_operand.vmem [shape: f32[2,32,256], index: 0, kind: input, shape index: {}]   ;;  %s10951_s1 = inlined_call_operand.vmem [shape: f32[9,32,32], index: 1, kind: input, shape index: {}]   ;;  %s10952_s3 = inlined_call_operand.vmem [shape: f32[32,6], index: 3, kind: input, shape index: {}]   ;;  %s10953_s2 = inlined_call_operand.vmem [shape: f32[9,32,32], index: 2, kind: input, shape index: {}]   ;;  %s10954_s4 = inlined_call_operand.vmem [shape: f32[2,32,256], index: 4, kind: output, shape index: {}]  }
   0x1   :  { %52 = vst [vmem:[#allocation2] sm:$0xff] %v8584_v0  ;;  %v8628_v1 = vld [vmem:[%s10950_s0] sm:$0xff]  ;;  %v8633_v2 = vld [vmem:[%s10950_s0 + $0x8] sm:$0xff]  ;;  %56 = vst.msk [vmem:[#allocation2 + $0x18] sm:$0xff] %vm55_vm0, %v8584_v0  ;;  %284 = vmatprep.mubr.f32.mxu0 %v8584_v0  ;;  %1807 = vmatprep.mubr.f32.mxu1 %v8584_v0  ;;  %s8587_s24 = smov 15   ;;  %s8588_s25 = smov 1  }
   0x2   :  { %60 = vst.msk [vmem:[#allocation2 + $0x38] sm:$0xff] %vm55_vm0, %v8584_v0  ;;  %64 = vst.msk [vmem:[#allocation2 + $0x58] sm:$0xff] %vm55_vm0, %v8584_v0  ;;  %v8648_v3 = vld [vmem:[%s10950_s0 + $0x30] sm:$0xff]  ;;  %v8653_v4 = vld [vmem:[%s10950_s0 + $0x38] sm:$0xff]  ;;  %7581 = vrot.lane.b32.xlu0 %v8584_v0, %s8585_s23  ;;  %7586 = vrot.lane.b32.xlu1 %v8584_v0, %s8585_s23  ;;  %v7590_v6 = vpack.i.bf16 %v8633_v2, %v8628_v1  ;;  %s8589_s26 = smov 127   ;;  %s8590_s27 = smov 113  }
   0x3   :  { %68 = vst.msk [vmem:[#allocation2 + $0x78] sm:$0xff] %vm55_vm0, %v8584_v0  ;;  %v8662_v5 = vld [vmem:[%s10950_s0 + $0x40] sm:$0xff]  ;;  %v7605_v7 = vpack.i.bf16 %v8653_v4, %v8648_v3  ;;  %v8671_v8 = vld [vmem:[%s10950_s0 + $0x48] sm:$0xff]  ;;  %v8676_v9 = vld [vmem:[%s10950_s0 + $0x10] sm:$0xff]  ;;  %v8871_v60 = vand.u32 127, %v21_v45  ;;  %vm207_vm3 = vcmask 261120  }
   0x4   :  { %v8681_v10 = vld [vmem:[%s10950_s0 + $0x18] sm:$0xff]  ;;  %v8688_v11 = vld [vmem:[%s10950_s0 + $0x50] sm:$0xff]  ;;  %v7610_v13 = vpack.i.bf16 %v8671_v8, %v8662_v5  ;;  %v8702_v15 = vld [vmem:[%s10950_s0 + $0x20] sm:$0xff]  ;;  %v8817_v31 = vpack.i.bf16 %v8676_v9, %v8628_v1  ;;  %s8591_s30 = smov 112   ;;  %vm434_vm7 = vcmask 121856   ;;  %s8592_s13 = smov 111  }
   0x5   :  { %v7595_v12 = vpack.i.bf16 %v8681_v10, %v8676_v9  ;;  %v8697_v14 = vld [vmem:[%s10950_s0 + $0x58] sm:$0xff]  ;;  %v8707_v16 = vld [vmem:[%s10950_s0 + $0x28] sm:$0xff]  ;;  %v8712_v17 = vld [vmem:[%s10950_s0 + $0x70] sm:$0xff]  ;;  %v8821_v32 = vpack.i.bf16 %v8688_v11, %v8662_v5  ;;  %v8849_v39 = vpack.i.bf16 %v8648_v3, %v8702_v15  ;;  %vm597_vm12 = vcmask 7168  }
   0x6   :  { %7591 = vrot.lane.b32.xlu0 %v7590_v6, %s8585_s23  ;;  %7606 = vrot.lane.b32.xlu1 %v7605_v7, %s8585_s23  ;;  %v7600_v18 = vpack.i.bf16 %v8707_v16, %v8702_v15  ;;  %v7615_v19 = vpack.i.bf16 %v8697_v14, %v8688_v11  ;;  %v8723_v20 = vld [vmem:[%s10950_s0 + $0x78] sm:$0xff]  ;;  %v8728_v21 = vld [vmem:[%s10950_s0 + $0x60] sm:$0xff]  ;;  %vm898_vm13 = vcmask 1039360   ;;  %vm1061_vm14 = vcmask 924672  }
   0x7   :  { %v8733_v22 = vld [vmem:[%s10950_s0 + $0x68] sm:$0xff]  ;;  %v7630_v24 = vpack.i.bf16 %v8723_v20, %v8712_v17  ;;  %v8853_v40 = vpack.i.bf16 %v8712_v17, %v8728_v21  ;;  %vm1229_vm15 = vcmask 916480  }
   0x8   :  { %v7620_v23 = vpack.i.bf16 %v8733_v22, %v8728_v21  ;;  %v852_v25 = vld [vmem:[#allocation2 + $0x18] sm:$0xff] }
   0x9   :  { %v855_v26 = vld [vmem:[#allocation2 + $0x38] sm:$0xff]  ;;  %v8796_v27 = vpack.i.bf16 %v852_v25, %v8633_v2  ;;  %v8806_v29 = vpack.i.bf16 %v852_v25, %v8671_v8 }
   0xa   :  { %7596 = vrot.lane.b32.xlu0 %v7595_v12, %s8585_s23  ;;  %7611 = vrot.lane.b32.xlu1 %v7610_v13, %s8585_s23  ;;  %v8799_v28 = vpack.i.bf16 %v855_v26, %v8681_v10  ;;  %v8809_v30 = vpack.i.bf16 %v855_v26, %v8697_v14  ;;  %v858_v33 = vld [vmem:[#allocation2 + $0x58] sm:$0xff] }
   0xb   :  { %v861_v34 = vld [vmem:[#allocation2 + $0x78] sm:$0xff]  ;;  %v8828_v35 = vpack.i.bf16 %v858_v33, %v8707_v16  ;;  %v8838_v37 = vpack.i.bf16 %v858_v33, %v8733_v22 }
   0xc   :  { %v8831_v36 = vpack.i.bf16 %v861_v34, %v8653_v4  ;;  %v8841_v38 = vpack.i.bf16 %v861_v34, %v8723_v20 }
   0xe   :  { %7601 = vrot.lane.b32.xlu0 %v7600_v18, %s8585_s23  ;;  %7616 = vrot.lane.b32.xlu1 %v7615_v19, %s8585_s23 }
  0x12   :  { %7621 = vrot.lane.b32.xlu0 %v7620_v23, %s8585_s23  ;;  %7631 = vrot.lane.b32.xlu1 %v7630_v24, %s8585_s23 }
  0x16   :  { %7626 = vrot.lane.b32.xlu0 %v8584_v0, %s8585_s23  ;;  %7636 = vrot.lane.b32.xlu1 %v8584_v0, %s8585_s23 }
  0x1a   :  { %7641 = vrot.lane.b32.xlu0 %v7590_v6, %s8586_s22  ;;  %7646 = vrot.lane.b32.xlu1 %v7595_v12, %s8586_s22 }
  0x1e   :  { %7651 = vrot.lane.b32.xlu0 %v7610_v13, %s8586_s22  ;;  %7656 = vrot.lane.b32.xlu1 %v7615_v19, %s8586_s22 }
  0x22   :  { %7661 = vrot.lane.b32.xlu0 %v8584_v0, %s8586_s22  ;;  %7666 = vrot.lane.b32.xlu1 %v8584_v0, %s8586_s22 }
  0x26   :  { %7671 = vrot.lane.b32.xlu0 %v7600_v18, %s8586_s22  ;;  %7676 = vrot.lane.b32.xlu1 %v7605_v7, %s8586_s22 }
  0x2a   :  { %7681 = vrot.lane.b32.xlu0 %v7620_v23, %s8586_s22  ;;  %7686 = vrot.lane.b32.xlu1 %v7630_v24, %s8586_s22 }
  0x2e   :  { %7691 = vrot.lane.b32.xlu0 %v8584_v0, %s8586_s22  ;;  %7696 = vrot.lane.b32.xlu1 %v8584_v0, %s8586_s22 }
  0x32   :  { %7701 = vrot.lane.b32.xlu0 %v7590_v6, %s8587_s24  ;;  %7706 = vrot.lane.b32.xlu1 %v7595_v12, %s8587_s24 }
  0x36   :  { %7711 = vrot.lane.b32.xlu0 %v7610_v13, %s8587_s24  ;;  %7716 = vrot.lane.b32.xlu1 %v7615_v19, %s8587_s24 }
  0x3a   :  { %7721 = vrot.lane.b32.xlu0 %v8584_v0, %s8587_s24  ;;  %7726 = vrot.lane.b32.xlu1 %v8584_v0, %s8587_s24 }
  0x3e   :  { %7731 = vrot.lane.b32.xlu0 %v7600_v18, %s8587_s24  ;;  %7736 = vrot.lane.b32.xlu1 %v7605_v7, %s8587_s24 }
  0x42   :  { %7741 = vrot.lane.b32.xlu0 %v7620_v23, %s8587_s24  ;;  %7746 = vrot.lane.b32.xlu1 %v7630_v24, %s8587_s24 }
  0x46   :  { %7751 = vrot.lane.b32.xlu0 %v8584_v0, %s8587_s24  ;;  %7756 = vrot.lane.b32.xlu1 %v8584_v0, %s8587_s24 }
  0x4a   :  { %7761 = vrot.lane.b32.xlu0 %v7590_v6, %s8588_s25  ;;  %7766 = vrot.lane.b32.xlu1 %v7595_v12, %s8588_s25 }
  0x4e   :  { %7771 = vrot.lane.b32.xlu0 %v7610_v13, %s8588_s25  ;;  %7776 = vrot.lane.b32.xlu1 %v7615_v19, %s8588_s25 }
  0x52   :  { %7781 = vrot.lane.b32.xlu0 %v8584_v0, %s8588_s25  ;;  %7786 = vrot.lane.b32.xlu1 %v8584_v0, %s8588_s25 }
  0x56   :  { %7791 = vrot.lane.b32.xlu0 %v7600_v18, %s8588_s25  ;;  %7796 = vrot.lane.b32.xlu1 %v7605_v7, %s8588_s25 }
  0x5a   :  { %7801 = vrot.lane.b32.xlu0 %v7620_v23, %s8588_s25  ;;  %7806 = vrot.lane.b32.xlu1 %v7630_v24, %s8588_s25 }
  0x5e   :  { %7811 = vrot.lane.b32.xlu0 %v8584_v0, %s8588_s25  ;;  %7816 = vrot.lane.b32.xlu1 %v8584_v0, %s8588_s25 }
  0x62   :  { %7821 = vrot.lane.b32.xlu0 %v8796_v27, %s8589_s26  ;;  %7826 = vrot.lane.b32.xlu1 %v8799_v28, %s8589_s26 }
  0x66   :  { %7831 = vrot.lane.b32.xlu0 %v8806_v29, %s8589_s26  ;;  %7836 = vrot.lane.b32.xlu1 %v8809_v30, %s8589_s26 }
  0x6a   :  { %7841 = vrot.lane.b32.xlu0 %v8817_v31, %s8589_s26  ;;  %7846 = vrot.lane.b32.xlu1 %v8821_v32, %s8589_s26 }
  0x6e   :  { %7851 = vrot.lane.b32.xlu0 %v8828_v35, %s8589_s26  ;;  %7856 = vrot.lane.b32.xlu1 %v8831_v36, %s8589_s26 }
  0x72   :  { %7861 = vrot.lane.b32.xlu0 %v8838_v37, %s8589_s26  ;;  %7866 = vrot.lane.b32.xlu1 %v8841_v38, %s8589_s26 }
  0x74   :  { %v7582_v41 = vpop.permute.xlu0 %7581  ;;  %v7587_v42 = vpop.permute.xlu1 %7586 }
  0x75   :  { %v7584_v48 = vunpack.i.h.bf16 %v7582_v41  ;;  %v7583_v53 = vunpack.i.l.bf16 %v7582_v41  ;;  %v7589_v57 = vunpack.i.h.bf16 %v7587_v42  ;;  %v7588_v58 = vunpack.i.l.bf16 %v7587_v42 }
  0x76   :  { %7871 = vrot.lane.b32.xlu0 %v8849_v39, %s8589_s26  ;;  %7876 = vrot.lane.b32.xlu1 %v8853_v40, %s8589_s26 }
  0x78   :  { %v7592_v43 = vpop.permute.xlu0 %7591  ;;  %v8859_v44 = vpop.permute.xlu1 %7606 }
  0x79   :  { %v7594_v46 = vunpack.i.h.bf16 %v7592_v43  ;;  %v7593_v47 = vunpack.i.l.bf16 %v7592_v43  ;;  %v7609_v49 = vunpack.i.h.bf16 %v8859_v44  ;;  %v7608_v50 = vunpack.i.l.bf16 %v8859_v44  ;;  %v6437_v44 = vld [vmem:[%s10951_s1 + $0x20] sm:$0xff] }
  0x7a   :  { %7881 = vrot.lane.b32.xlu0 %v8796_v27, %s8590_s27  ;;  %7886 = vrot.lane.b32.xlu1 %v8799_v28, %s8590_s27 }
  0x7b   :  { %v192_v61 = vsel %vm190_vm1, %v7593_v47, %v7594_v46  ;;  %v191_v63 = vsel %vm190_vm1, %v7583_v53, %v7593_v47  ;;  %v198_v12 = vsel %vm190_vm1, %v7608_v50, %v7609_v49  ;;  %v8890_v46 = vadd.s32 128, %v8871_v60 }
  0x7c   :  { %v7597_v51 = vpop.permute.xlu0 %7596  ;;  %v7612_v52 = vpop.permute.xlu1 %7611 }
  0x7d   :  { %v7599_v54 = vunpack.i.h.bf16 %v7597_v51  ;;  %v7598_v55 = vunpack.i.l.bf16 %v7597_v51  ;;  %v7614_v56 = vunpack.i.h.bf16 %v7612_v52  ;;  %v7613_v59 = vunpack.i.l.bf16 %v7612_v52 }
  0x7e   :  { %7891 = vrot.lane.b32.xlu0 %v8806_v29, %s8590_s27  ;;  %7896 = vrot.lane.b32.xlu1 %v8809_v30, %s8590_s27 }
  0x7f   :  { %v194_v62 = vsel %vm190_vm1, %v7598_v55, %v7599_v54  ;;  %v193_v1 = vsel %vm190_vm1, %v7584_v48, %v7598_v55  ;;  %v1716_v13 = vsel %vm190_vm1, %v7613_v59, %v7614_v56  ;;  %v1715_v24 = vsel %vm190_vm1, %v7588_v58, %v7613_v59 }
  0x80   :  { %v7602_v3 = vpop.permute.xlu0 %7601  ;;  %v7617_v4 = vpop.permute.xlu1 %7616  ;;  %v6925_v6 = vpack.c.bf16 %v194_v62, %v192_v61  ;;  %v6927_v7 = vpack.c.bf16 %v193_v1, %v191_v63 }
  0x81   :  { %v7604_v17 = vunpack.i.h.bf16 %v7602_v3  ;;  %v7603_v18 = vunpack.i.l.bf16 %v7602_v3  ;;  %v7619_v19 = vunpack.i.h.bf16 %v7617_v4  ;;  %v7618_v23 = vunpack.i.l.bf16 %v7617_v4 }
  0x82   :  { %6926 = vmatprep.subr.bf16.mxu0 %v6925_v6  ;;  %7901 = vrot.lane.b32.xlu0 %v8817_v31, %s8590_s27 }
  0x83   :  { %6928 = vmatpush1.bf16.msra.mxu0 %v6927_v7  ;;  %7906 = vrot.lane.b32.xlu1 %v8821_v32, %s8590_s27  ;;  %v196_v25 = vsel %vm190_vm1, %v7603_v18, %v7604_v17  ;;  %v1718_v26 = vsel %vm190_vm1, %v7618_v23, %v7619_v19  ;;  %v1717_v33 = vsel %vm190_vm1, %v7589_v57, %v7618_v23  ;;  %v35_v57 = vand.u32 15, %v8890_v46  ;;  %v6778_v46 = vld [vmem:[%s10953_s2 + $0x108] sm:$0xff] }
  0x84   :  { %v7622_v34 = vpop.permute.xlu0 %7621  ;;  %v7632_v41 = vpop.permute.xlu1 %7631  ;;  %v6929_v42 = vpack.c.bf16 %v198_v12, %v196_v25  ;;  %v7021_v43 = vpack.c.bf16 %v1718_v26, %v1716_v13  ;;  %v7023_v45 = vpack.c.bf16 %v1717_v33, %v1715_v24 }
  0x85   :  { %v7624_v47 = vunpack.i.h.bf16 %v7622_v34  ;;  %v7623_v48 = vunpack.i.l.bf16 %v7622_v34  ;;  %v7634_v49 = vunpack.i.h.bf16 %v7632_v41  ;;  %v7633_v51 = vunpack.i.l.bf16 %v7632_v41 }
  0x86   :  { %6930 = vmatprep.subr.bf16.mxu0 %v6929_v42  ;;  %7911 = vrot.lane.b32.xlu0 %v8828_v35, %s8590_s27  ;;  %vm49_vm2 = vcmp.ge.s32.totalorder %v35_v57, 1  ;;  %v28_v41 = vand.u32 15, %v8871_v60  ;;  %vm51_vm8 = vcmp.le.s32.totalorder %v35_v57, 14 }
  0x87   :  { %7916 = vrot.lane.b32.xlu1 %v8831_v36, %s8590_s27  ;;  %7022 = vmatprep.subr.bf16.mxu1 %v7021_v43  ;;  %v1720_v52 = vsel %vm190_vm1, %v7623_v48, %v7624_v47  ;;  %v1722_v53 = vsel %vm190_vm1, %v7633_v51, %v7634_v49  ;;  %vm8920_vm4 = vmpackc.low %vm49_vm2, %vm49_vm2  ;;  %vm1379_vm2 = vcmask 908288  }
  0x88   :  { %v7627_v54 = vpop.permute.xlu0 %7626  ;;  %7024 = vmatpush1.bf16.msra.mxu1 %v7023_v45  ;;  %v7637_v55 = vpop.permute.xlu1 %7636  ;;  %v7025_v56 = vpack.c.bf16 %v1722_v53, %v1720_v52  ;;  %vm8940_vm5 = vcmp.ge.s32.totalorder %v28_v41, 1  ;;  %vm9024_vm9 = vmpackc.low %vm51_vm8, %vm51_vm8  ;;  %vm9043_vm10 = vcmp.le.s32.totalorder %v28_v41, 14 }
  0x89   :  { %v7629_v58 = vunpack.i.h.bf16 %v7627_v54  ;;  %v7628_v59 = vunpack.i.l.bf16 %v7627_v54  ;;  %v7639_v61 = vunpack.i.h.bf16 %v7637_v55  ;;  %v7638_v62 = vunpack.i.l.bf16 %v7637_v55  ;;  %vm8963_vm6 = vmpackc.low %vm8940_vm5, %vm8940_vm5 }
  0x8a   :  { %7921 = vrot.lane.b32.xlu0 %v8838_v37, %s8590_s27  ;;  %7026 = vmatprep.subr.bf16.mxu1 %v7025_v56  ;;  %vm9066_vm11 = vmpackc.low %vm9043_vm10, %vm9043_vm10 }
  0x8b   :  { %7926 = vrot.lane.b32.xlu1 %v8841_v38, %s8590_s27  ;;  %v195_v63 = vsel %vm190_vm1, %v7628_v59, %v7603_v18  ;;  %v197_v1 = vsel %vm190_vm1, %v7629_v58, %v7608_v50  ;;  %v1719_v3 = vsel %vm190_vm1, %v7638_v62, %v7623_v48  ;;  %v1721_v4 = vsel %vm190_vm1, %v7639_v61, %v7633_v51  ;;  %v6438_v48 = vld [vmem:[%s10951_s1 + $0x28] sm:$0xff]  ;;  %v6439_v62 = vld [vmem:[%s10951_s1 + $0x30] sm:$0xff] }
  0x8c   :  { %v7642_v6 = vpop.permute.xlu0 %7641  ;;  %v7647_v7 = vpop.permute.xlu1 %7646  ;;  %v6931_v12 = vpack.c.bf16 %v197_v1, %v195_v63  ;;  %v7027_v13 = vpack.c.bf16 %v1721_v4, %v1719_v3 }
  0x8d   :  { %v7644_v17 = vunpack.i.h.bf16 %v7642_v6  ;;  %v7643_v19 = vunpack.i.l.bf16 %v7642_v6  ;;  %v7649_v23 = vunpack.i.h.bf16 %v7647_v7  ;;  %v7648_v24 = vunpack.i.l.bf16 %v7647_v7 }
  0x8e   :  { %6932 = vmatpush1.bf16.msra.mxu0 %v6931_v12  ;;  %7931 = vrot.lane.b32.xlu0 %v8849_v39, %s8590_s27 }
  0x8f   :  { %v134_v50 = vsel %vm55_vm0, %v7643_v19, %v7644_v17  ;;  %v136_v18 = vsel %vm55_vm0, %v7648_v24, %v7649_v23  ;;  %7936 = vrot.lane.b32.xlu1 %v8853_v40, %s8590_s27  ;;  %7028 = vmatpush1.bf16.msra.mxu1 %v7027_v13 }
  0x90   :  { %v7652_v26 = vpop.permute.xlu0 %7651  ;;  %v7657_v33 = vpop.permute.xlu1 %7656  ;;  %v6933_v34 = vpack.c.bf16 %v136_v18, %v134_v50  ;;  %v6440_v50 = vld [vmem:[%s10951_s1 + $0x38] sm:$0xff] }
  0x91   :  { %v7654_v42 = vunpack.i.h.bf16 %v7652_v26  ;;  %v7653_v43 = vunpack.i.l.bf16 %v7652_v26  ;;  %v7659_v45 = vunpack.i.h.bf16 %v7657_v33  ;;  %v7658_v47 = vunpack.i.l.bf16 %v7657_v33  ;;  %6441 = vmatmul.mubr.msk.f32.vlgmr.msra.gmra.mrb[0].mxu0 %vm207_vm3, %v6437_v44 }
  0x92   :  { %7941 = vrot.lane.b32.xlu0 %v8796_v27, %s8591_s30  ;;  %6935 = vmatprep.subr.msk.bf16.mxu0 %vm8920_vm4, %v6933_v34 }
  0x93   :  { %v1660_v49 = vsel %vm55_vm0, %v7653_v43, %v7654_v42  ;;  %v1662_v51 = vsel %vm55_vm0, %v7658_v47, %v7659_v45  ;;  %7946 = vrot.lane.b32.xlu1 %v8799_v28, %s8591_s30  ;;  %6565 = vmatmul.mubr.msk.f32.vlgmr.msra.gmra.mrb[0].mxu1 %vm207_vm3, %v6437_v44 }
  0x94   :  { %v7662_v52 = vpop.permute.xlu0 %7661  ;;  %v7667_v53 = vpop.permute.xlu1 %7666  ;;  %v7029_v54 = vpack.c.bf16 %v1662_v51, %v1660_v49  ;;  %290 = vmatprep.mubr.f32.mxu0 %v8584_v0  ;;  %1813 = vmatprep.mubr.f32.mxu1 %v8584_v0 }
  0x95   :  { %v7664_v56 = vunpack.i.h.bf16 %v7662_v52  ;;  %v7663_v58 = vunpack.i.l.bf16 %v7662_v52  ;;  %v7669_v59 = vunpack.i.h.bf16 %v7667_v53  ;;  %v7668_v61 = vunpack.i.l.bf16 %v7667_v53  ;;  %6442 = vmatmul.mubr.msk.f32.gmra.mrb[2].mxu0 %vm207_vm3, %v6438_v48 }
  0x96   :  { %7951 = vrot.lane.b32.xlu0 %v8806_v29, %s8591_s30  ;;  %7031 = vmatprep.subr.msk.bf16.mxu1 %vm8920_vm4, %v7029_v54 }
  0x97   :  { %v133_v63 = vsel %vm55_vm0, %v7663_v58, %v7643_v19  ;;  %v135_v1 = vsel %vm55_vm0, %v7664_v56, %v7648_v24  ;;  %v1659_v3 = vsel %vm55_vm0, %v7668_v61, %v7653_v43  ;;  %v1661_v4 = vsel %vm55_vm0, %v7669_v59, %v7658_v47  ;;  %7956 = vrot.lane.b32.xlu1 %v8809_v30, %s8591_s30 }
  0x98   :  { %v6936_v7 = vpack.c.bf16 %v135_v1, %v133_v63  ;;  %v7032_v12 = vpack.c.bf16 %v1661_v4, %v1659_v3  ;;  %v7672_v13 = vpop.permute.xlu0 %7671  ;;  %v7677_v17 = vpop.permute.xlu1 %7676  ;;  %6566 = vmatmul.mubr.msk.f32.gmra.mrb[2].mxu1 %vm207_vm3, %v6438_v48  ;;  %296 = vmatprep.mubr.f32.mxu0 %v8584_v0 }
  0x99   :  { %v7674_v19 = vunpack.i.h.bf16 %v7672_v13  ;;  %v7673_v23 = vunpack.i.l.bf16 %v7672_v13  ;;  %v7679_v24 = vunpack.i.h.bf16 %v7677_v17  ;;  %v7678_v44 = vunpack.i.l.bf16 %v7677_v17  ;;  %6443 = vmatmul.mubr.msk.f32.gmra.mrb[4].mxu0 %vm207_vm3, %v6439_v62  ;;  %1819 = vmatprep.mubr.f32.mxu1 %v8584_v0 }
  0x9a   :  { %7961 = vrot.lane.b32.xlu0 %v8817_v31, %s8591_s30  ;;  %6938 = vmatpush1.bf16.msk.msra.mxu0 %vm8963_vm6, %v6936_v7 }
  0x9b   :  { %v138_v18 = vsel %vm55_vm0, %v7673_v23, %v7674_v19  ;;  %v140_v26 = vsel %vm55_vm0, %v7678_v44, %v7679_v24  ;;  %7966 = vrot.lane.b32.xlu1 %v8821_v32, %s8591_s30  ;;  %7034 = vmatpush1.bf16.msk.msra.mxu1 %vm8963_vm6, %v7032_v12  ;;  %v157_v24 = vld [vmem:[%s10951_s1] sm:$0xff] }
  0x9c   :  { %v7682_v33 = vpop.permute.xlu0 %7681  ;;  %v7687_v34 = vpop.permute.xlu1 %7686  ;;  %v6939_v42 = vpack.c.bf16 %v140_v26, %v138_v18  ;;  %6567 = vmatmul.mubr.msk.f32.gmra.mrb[4].mxu1 %vm207_vm3, %v6439_v62  ;;  %302 = vmatprep.mubr.f32.mxu0 %v8584_v0 }
  0x9d   :  { %v7684_v43 = vunpack.i.h.bf16 %v7682_v33  ;;  %v7683_v45 = vunpack.i.l.bf16 %v7682_v33  ;;  %v7689_v47 = vunpack.i.h.bf16 %v7687_v34  ;;  %v7688_v48 = vunpack.i.l.bf16 %v7687_v34  ;;  %6444 = vmatmul.mubr.msk.f32.gmra.mrb[6].mxu0 %vm207_vm3, %v6440_v50  ;;  %1825 = vmatprep.mubr.f32.mxu1 %v8584_v0 }
  0x9e   :  { %7971 = vrot.lane.b32.xlu0 %v8828_v35, %s8591_s30  ;;  %6941 = vmatprep.subr.msk.bf16.mxu0 %vm8920_vm4, %v6939_v42 }
  0x9f   :  { %v1664_v49 = vsel %vm55_vm0, %v7683_v45, %v7684_v43  ;;  %v1666_v51 = vsel %vm55_vm0, %v7688_v48, %v7689_v47  ;;  %7976 = vrot.lane.b32.xlu1 %v8831_v36, %s8591_s30  ;;  %385 = vmatprep.mubr.f32.mxu0 %v8584_v0 }
  0xa0   :  { %v7692_v52 = vpop.permute.xlu0 %7691  ;;  %v7697_v53 = vpop.permute.xlu1 %7696  ;;  %v7035_v54 = vpack.c.bf16 %v1666_v51, %v1664_v49  ;;  %6568 = vmatmul.mubr.msk.f32.gmra.mrb[6].mxu1 %vm207_vm3, %v6440_v50 }
  0xa1   :  { %v7694_v55 = vunpack.i.h.bf16 %v7692_v52  ;;  %v7693_v56 = vunpack.i.l.bf16 %v7692_v52  ;;  %v7699_v58 = vunpack.i.h.bf16 %v7697_v53  ;;  %v7698_v59 = vunpack.i.l.bf16 %v7697_v53  ;;  %1908 = vmatprep.mubr.f32.mxu1 %v8584_v0 }
  0xa2   :  { %7981 = vrot.lane.b32.xlu0 %v8838_v37, %s8591_s30  ;;  %7037 = vmatprep.subr.msk.bf16.mxu1 %vm8920_vm4, %v7035_v54 }
  0xa3   :  { %v137_v61 = vsel %vm55_vm0, %v7693_v56, %v7673_v23  ;;  %v139_v62 = vsel %vm55_vm0, %v7694_v55, %v7678_v44  ;;  %v1663_v63 = vsel %vm55_vm0, %v7698_v59, %v7683_v45  ;;  %v1665_v1 = vsel %vm55_vm0, %v7699_v58, %v7688_v48  ;;  %7986 = vrot.lane.b32.xlu1 %v8841_v38, %s8591_s30  ;;  %v158_v45 = vld [vmem:[%s10951_s1 + $0x8] sm:$0xff] }
  0xa4   :  { %v6942_v3 = vpack.c.bf16 %v139_v62, %v137_v61  ;;  %v7038_v4 = vpack.c.bf16 %v1665_v1, %v1663_v63  ;;  %v7702_v7 = vpop.permute.xlu0 %7701  ;;  %v7707_v12 = vpop.permute.xlu1 %7706 }
  0xa5   :  { %v7704_v13 = vunpack.i.h.bf16 %v7702_v7  ;;  %v7703_v17 = vunpack.i.l.bf16 %v7702_v7  ;;  %v7709_v19 = vunpack.i.h.bf16 %v7707_v12  ;;  %v7708_v23 = vunpack.i.l.bf16 %v7707_v12 }
  0xa6   :  { %7991 = vrot.lane.b32.xlu0 %v8849_v39, %s8591_s30  ;;  %6944 = vmatpush1.bf16.msk.msra.mxu0 %vm8963_vm6, %v6942_v3 }
  0xa7   :  { %v436_v44 = vsel %vm434_vm7, %v7703_v17, %v7704_v13  ;;  %v438_v50 = vsel %vm434_vm7, %v7708_v23, %v7709_v19  ;;  %7996 = vrot.lane.b32.xlu1 %v8853_v40, %s8591_s30  ;;  %7040 = vmatpush1.bf16.msk.msra.mxu1 %vm8963_vm6, %v7038_v4 }
  0xa8   :  { %v7712_v57 = vpop.permute.xlu0 %7711  ;;  %v7717_v18 = vpop.permute.xlu1 %7716  ;;  %v6945_v26 = vpack.c.bf16 %v438_v50, %v436_v44 }
  0xa9   :  { %v7714_v33 = vunpack.i.h.bf16 %v7712_v57  ;;  %v7713_v34 = vunpack.i.l.bf16 %v7712_v57  ;;  %v7719_v42 = vunpack.i.h.bf16 %v7717_v18  ;;  %v7718_v43 = vunpack.i.l.bf16 %v7717_v18  ;;  %6453 = vmatmul.mubr.msk.f32.vlgmr.msra.gmra.mrb[0].mxu0 %vm207_vm3, %v157_v24 }
  0xaa   :  { %8001 = vrot.lane.b32.xlu0 %v8796_v27, %s8592_s13  ;;  %6947 = vmatprep.subr.msk.bf16.mxu0 %vm9024_vm9, %v6945_v26 }
  0xab   :  { %v1958_v47 = vsel %vm434_vm7, %v7713_v34, %v7714_v33  ;;  %v1960_v48 = vsel %vm434_vm7, %v7718_v43, %v7719_v42  ;;  %8006 = vrot.lane.b32.xlu1 %v8799_v28, %s8592_s13  ;;  %6577 = vmatmul.mubr.msk.f32.vlgmr.msra.gmra.mrb[0].mxu1 %vm207_vm3, %v157_v24  ;;  %v159_v28 = vld [vmem:[%s10951_s1 + $0x10] sm:$0xff] }
  0xac   :  { %v7722_v49 = vpop.permute.xlu0 %7721  ;;  %v7727_v51 = vpop.permute.xlu1 %7726  ;;  %v7041_v52 = vpack.c.bf16 %v1960_v48, %v1958_v47  ;;  %391 = vmatprep.mubr.f32.mxu0 %v8584_v0  ;;  %1914 = vmatprep.mubr.f32.mxu1 %v8584_v0 }
  0xad   :  { %v7724_v53 = vunpack.i.h.bf16 %v7722_v49  ;;  %v7723_v54 = vunpack.i.l.bf16 %v7722_v49  ;;  %v7729_v55 = vunpack.i.h.bf16 %v7727_v51  ;;  %v7728_v56 = vunpack.i.l.bf16 %v7727_v51  ;;  %6454 = vmatmul.mubr.msk.f32.gmra.mrb[2].mxu0 %vm207_vm3, %v158_v45 }
  0xae   :  { %8011 = vrot.lane.b32.xlu0 %v8806_v29, %s8592_s13  ;;  %7043 = vmatprep.subr.msk.bf16.mxu1 %vm9024_vm9, %v7041_v52  ;;  %v6779_v29 = vld [vmem:[%s10953_s2 + $0x110] sm:$0xff] }
  0xaf   :  { %v435_v60 = vsel %vm434_vm7, %v7723_v54, %v7703_v17  ;;  %v437_v41 = vsel %vm434_vm7, %v7724_v53, %v7708_v23  ;;  %v1957_v58 = vsel %vm434_vm7, %v7728_v56, %v7713_v34  ;;  %v1959_v59 = vsel %vm434_vm7, %v7729_v55, %v7718_v43  ;;  %8016 = vrot.lane.b32.xlu1 %v8809_v30, %s8592_s13  ;;  %v160_v30 = vld [vmem:[%s10951_s1 + $0x18] sm:$0xff] }
  0xb0   :  { %v6948_v61 = vpack.c.bf16 %v437_v41, %v435_v60  ;;  %v7044_v62 = vpack.c.bf16 %v1959_v59, %v1957_v58  ;;  %v7732_v63 = vpop.permute.xlu0 %7731  ;;  %v7737_v1 = vpop.permute.xlu1 %7736  ;;  %6578 = vmatmul.mubr.msk.f32.gmra.mrb[2].mxu1 %vm207_vm3, %v158_v45  ;;  %397 = vmatprep.mubr.f32.mxu0 %v8584_v0 }
  0xb1   :  { %v7734_v3 = vunpack.i.h.bf16 %v7732_v63  ;;  %v7733_v4 = vunpack.i.l.bf16 %v7732_v63  ;;  %v7739_v7 = vunpack.i.h.bf16 %v7737_v1  ;;  %v7738_v12 = vunpack.i.l.bf16 %v7737_v1  ;;  %6455 = vmatmul.mubr.msk.f32.gmra.mrb[4].mxu0 %vm207_vm3, %v159_v28  ;;  %1920 = vmatprep.mubr.f32.mxu1 %v8584_v0 }
  0xb2   :  { %8021 = vrot.lane.b32.xlu0 %v8817_v31, %s8592_s13  ;;  %6950 = vmatpush1.bf16.msk.msra.mxu0 %vm9066_vm11, %v6948_v61 }
  0xb3   :  { %v440_v13 = vsel %vm434_vm7, %v7733_v4, %v7734_v3  ;;  %v442_v17 = vsel %vm434_vm7, %v7738_v12, %v7739_v7  ;;  %8026 = vrot.lane.b32.xlu1 %v8821_v32, %s8592_s13  ;;  %7046 = vmatpush1.bf16.msk.msra.mxu1 %vm9066_vm11, %v7044_v62 }
  0xb4   :  { %v7742_v19 = vpop.permute.xlu0 %7741  ;;  %v7747_v23 = vpop.permute.xlu1 %7746  ;;  %v6951_v31 = vpack.c.bf16 %v442_v17, %v440_v13  ;;  %6579 = vmatmul.mubr.msk.f32.gmra.mrb[4].mxu1 %vm207_vm3, %v159_v28  ;;  %403 = vmatprep.mubr.f32.mxu0 %v8584_v0  ;;  %v6457_v28 = vld [vmem:[%s10951_s1 + $0x40] sm:$0xff] }
  0xb5   :  { %v7744_v24 = vunpack.i.h.bf16 %v7742_v19  ;;  %v7743_v44 = vunpack.i.l.bf16 %v7742_v19  ;;  %v7749_v50 = vunpack.i.h.bf16 %v7747_v23  ;;  %v7748_v57 = vunpack.i.l.bf16 %v7747_v23  ;;  %6456 = vmatmul.mubr.msk.f32.gmra.mrb[6].mxu0 %vm207_vm3, %v160_v30  ;;  %1926 = vmatprep.mubr.f32.mxu1 %v8584_v0  ;;  %v6459_v23 = vld [vmem:[%s10951_s1 + $0x50] sm:$0xff] }
  0xb6   :  { %8031 = vrot.lane.b32.xlu0 %v8828_v35, %s8592_s13  ;;  %6953 = vmatprep.subr.msk.bf16.mxu0 %vm9024_vm9, %v6951_v31 }
  0xb7   :  { %v1962_v32 = vsel %vm434_vm7, %v7743_v44, %v7744_v24  ;;  %v1964_v18 = vsel %vm434_vm7, %v7748_v57, %v7749_v50  ;;  %8036 = vrot.lane.b32.xlu1 %v8831_v36, %s8592_s13  ;;  %540 = vmatprep.mubr.f32.mxu0 %v8584_v0 }
  0xb8   :  { %v7752_v26 = vpop.permute.xlu0 %7751  ;;  %v7757_v33 = vpop.permute.xlu1 %7756  ;;  %v7047_v34 = vpack.c.bf16 %v1964_v18, %v1962_v32  ;;  %6580 = vmatmul.mubr.msk.f32.gmra.mrb[6].mxu1 %vm207_vm3, %v160_v30 }
  0xb9   :  { %v7754_v42 = vunpack.i.h.bf16 %v7752_v26  ;;  %v7753_v43 = vunpack.i.l.bf16 %v7752_v26  ;;  %v7759_v35 = vunpack.i.h.bf16 %v7757_v33  ;;  %v7758_v45 = vunpack.i.l.bf16 %v7757_v33  ;;  %2061 = vmatprep.mubr.f32.mxu1 %v8584_v0 }
  0xba   :  { %8041 = vrot.lane.b32.xlu0 %v8838_v37, %s8592_s13  ;;  %7049 = vmatprep.subr.msk.bf16.mxu1 %vm9024_vm9, %v7047_v34  ;;  %v8593_v34 = vmov 0  }
  0xbb   :  { %v439_v36 = vsel %vm434_vm7, %v7753_v43, %v7733_v4  ;;  %v441_v47 = vsel %vm434_vm7, %v7754_v42, %v7738_v12  ;;  %v1961_v48 = vsel %vm434_vm7, %v7758_v45, %v7743_v44  ;;  %v1963_v49 = vsel %vm434_vm7, %v7759_v35, %v7748_v57  ;;  %8046 = vrot.lane.b32.xlu1 %v8841_v38, %s8592_s13  ;;  %v17_v57 = vld [vmem:[%s10952_s3] sm:$0xff] }
  0xbc   :  { %v6954_v51 = vpack.c.bf16 %v441_v47, %v439_v36  ;;  %v7050_v52 = vpack.c.bf16 %v1963_v49, %v1961_v48  ;;  %v7762_v27 = vpop.permute.xlu0 %7761  ;;  %v7767_v53 = vpop.permute.xlu1 %7766  ;;  %8060 = vset.pattern.permute.xlu0 %v8593_v34  ;;  %v6460_v36 = vld [vmem:[%s10951_s1 + $0x58] sm:$0xff]  ;;  %8061 = vset.pattern.permute.xlu1 %v8593_v34 }
  0xbd   :  { %v7764_v37 = vunpack.i.h.bf16 %v7762_v27  ;;  %v7763_v54 = vunpack.i.l.bf16 %v7762_v27  ;;  %v7769_v55 = vunpack.i.h.bf16 %v7767_v53  ;;  %v7768_v56 = vunpack.i.l.bf16 %v7767_v53  ;;  %v20_v47 = vld [vmem:[%s10952_s3 + $0x18] sm:$0xff]  ;;  %v18_v53 = vld [vmem:[%s10952_s3 + $0x8] sm:$0xff] }
  0xbe   :  { %8051 = vrot.lane.b32.xlu0 %v8849_v39, %s8592_s13  ;;  %6956 = vmatpush1.bf16.msk.msra.mxu0 %vm9066_vm11, %v6954_v51 }
  0xbf   :  { %v599_v38 = vsel %vm597_vm12, %v7763_v54, %v7764_v37  ;;  %v601_v60 = vsel %vm597_vm12, %v7768_v56, %v7769_v55  ;;  %8056 = vrot.lane.b32.xlu1 %v8853_v40, %s8592_s13  ;;  %7052 = vmatpush1.bf16.msk.msra.mxu1 %vm9066_vm11, %v7050_v52  ;;  %v6458_v40 = vld [vmem:[%s10951_s1 + $0x48] sm:$0xff] }
  0xc0   :  { %v7772_v41 = vpop.permute.xlu0 %7771  ;;  %v7777_v58 = vpop.permute.xlu1 %7776  ;;  %v6957_v39 = vpack.c.bf16 %v601_v60, %v599_v38 }
  0xc1   :  { %v7774_v59 = vunpack.i.h.bf16 %v7772_v41  ;;  %v7773_v61 = vunpack.i.l.bf16 %v7772_v41  ;;  %v7779_v62 = vunpack.i.h.bf16 %v7777_v58  ;;  %v7778_v63 = vunpack.i.l.bf16 %v7777_v58  ;;  %6469 = vmatmul.mubr.msk.f32.vlgmr.msra.gmra.mrb[0].mxu0 %vm207_vm3, %v6457_v28 }
  0xc2   :  { %6959 = vmatprep.subr.msk.bf16.mxu0 %vm8920_vm4, %v6957_v39  ;;  %6593 = vmatmul.mubr.msk.f32.vlgmr.msra.gmra.mrb[0].mxu1 %vm207_vm3, %v6457_v28  ;;  %v19_v39 = vld [vmem:[%s10952_s3 + $0x10] sm:$0xff] }
  0xc3   :  { %v2119_v1 = vsel %vm597_vm12, %v7773_v61, %v7774_v59  ;;  %v2121_v3 = vsel %vm597_vm12, %v7778_v63, %v7779_v62  ;;  %546 = vmatprep.mubr.f32.mxu0 %v8584_v0  ;;  %2067 = vmatprep.mubr.f32.mxu1 %v8584_v0 }
  0xc4   :  { %v7782_v4 = vpop.permute.xlu0 %7781  ;;  %v7787_v7 = vpop.permute.xlu1 %7786  ;;  %v7053_v12 = vpack.c.bf16 %v2121_v3, %v2119_v1  ;;  %1520 = vperm.xlu0 %8060, %v17_v57   ;;  %1525 = vperm.xlu1 %8061, %v18_v53   ;;  %v7065_v1 = vpack.c.bf16 %v8697_v14, %v8671_v8 }
  0xc5   :  { %v7784_v30 = vunpack.i.h.bf16 %v7782_v4  ;;  %v7783_v13 = vunpack.i.l.bf16 %v7782_v4  ;;  %v7789_v17 = vunpack.i.h.bf16 %v7787_v7  ;;  %v7788_v19 = vunpack.i.l.bf16 %v7787_v7  ;;  %6470 = vmatmul.mubr.msk.f32.gmra.mrb[2].mxu0 %vm207_vm3, %v6458_v40 }
  0xc6   :  { %7055 = vmatprep.subr.msk.bf16.mxu1 %vm8920_vm4, %v7053_v12  ;;  %6594 = vmatmul.mubr.msk.f32.gmra.mrb[2].mxu1 %vm207_vm3, %v6458_v40  ;;  %v6969_v40 = vpack.c.bf16 %v8681_v10, %v8633_v2  ;;  %v8568_v2 = vld [vmem:[%s10950_s0] sm:$0xff]  ;;  %v7067_v10 = vpack.c.bf16 %v8688_v11, %v8662_v5  ;;  %v8569_v5 = vld [vmem:[%s10950_s0 + $0x38] sm:$0xff] }
  0xc7   :  { %v598_v31 = vsel %vm597_vm12, %v7783_v13, %v7763_v54  ;;  %v600_v24 = vsel %vm597_vm12, %v7784_v30, %v7768_v56  ;;  %v2118_v44 = vsel %vm597_vm12, %v7788_v19, %v7773_v61  ;;  %v2120_v50 = vsel %vm597_vm12, %v7789_v17, %v7778_v63  ;;  %552 = vmatprep.mubr.f32.mxu0 %v8584_v0 }
  0xc8   :  { %v6960_v32 = vpack.c.bf16 %v600_v24, %v598_v31  ;;  %v7056_v18 = vpack.c.bf16 %v2120_v50, %v2118_v44  ;;  %v7792_v26 = vpop.permute.xlu0 %7791  ;;  %v7797_v33 = vpop.permute.xlu1 %7796  ;;  %2073 = vmatprep.mubr.f32.mxu1 %v8584_v0  ;;  %1535 = vperm.xlu0 %8060, %v20_v47   ;;  %v6971_v8 = vpack.c.bf16 %v8676_v9, %v8568_v2  ;;  %v6473_v9 = vld [vmem:[%s10951_s1 + $0x60] sm:$0xff]  ;;  %v8570_v50 = vld [vmem:[%s10950_s0 + $0x30] sm:$0xff] }
  0xc9   :  { %v7794_v42 = vunpack.i.h.bf16 %v7792_v26  ;;  %v7793_v43 = vunpack.i.l.bf16 %v7792_v26  ;;  %v7799_v35 = vunpack.i.h.bf16 %v7797_v33  ;;  %v7798_v45 = vunpack.i.l.bf16 %v7797_v33  ;;  %6471 = vmatmul.mubr.msk.f32.gmra.mrb[4].mxu0 %vm207_vm3, %v6459_v23  ;;  %1530 = vperm.xlu1 %8061, %v19_v39  }
  0xca   :  { %6962 = vmatpush1.bf16.msk.msra.mxu0 %vm8963_vm6, %v6960_v32  ;;  %7058 = vmatpush1.bf16.msk.msra.mxu1 %vm8963_vm6, %v7056_v18  ;;  %v6973_v11 = vpack.c.bf16 %v8569_v5, %v8707_v16  ;;  %v6975_v57 = vpack.c.bf16 %v8570_v50, %v8702_v15  ;;  %v7069_v32 = vpack.c.bf16 %v8723_v20, %v8733_v22  ;;  %v6474_v20 = vld [vmem:[%s10951_s1 + $0x68] sm:$0xff]  ;;  %v8571_v22 = vld [vmem:[%s10950_s0 + $0x70] sm:$0xff] }
  0xcb   :  { %v603_v48 = vsel %vm597_vm12, %v7793_v43, %v7794_v42  ;;  %v605_v49 = vsel %vm597_vm12, %v7798_v45, %v7799_v35  ;;  %6595 = vmatmul.mubr.msk.f32.gmra.mrb[4].mxu1 %vm207_vm3, %v6459_v23  ;;  %558 = vmatprep.mubr.f32.mxu0 %v8584_v0  ;;  %v7071_v42 = vpack.c.bf16 %v8571_v22, %v8728_v21  ;;  %v6490_v5 = vld [vmem:[%s10951_s1 + $0x88] sm:$0xff] }
  0xcc   :  { %v7802_v51 = vpop.permute.xlu0 %7801  ;;  %v7807_v52 = vpop.permute.xlu1 %7806  ;;  %v6963_v27 = vpack.c.bf16 %v605_v49, %v603_v48  ;;  %2079 = vmatprep.mubr.f32.mxu1 %v8584_v0  ;;  %v6475_v49 = vld [vmem:[%s10951_s1 + $0x70] sm:$0xff] }
  0xcd   :  { %v7804_v37 = vunpack.i.h.bf16 %v7802_v51  ;;  %v7803_v54 = vunpack.i.l.bf16 %v7802_v51  ;;  %v7809_v55 = vunpack.i.h.bf16 %v7807_v52  ;;  %v7808_v56 = vunpack.i.l.bf16 %v7807_v52  ;;  %6472 = vmatmul.mubr.msk.f32.gmra.mrb[6].mxu0 %vm207_vm3, %v6460_v36 }
  0xce   :  { %6965 = vmatprep.subr.msk.bf16.mxu0 %vm8920_vm4, %v6963_v27  ;;  %703 = vmatprep.mubr.f32.mxu0 %v8584_v0 }
  0xcf   :  { %v2123_v28 = vsel %vm597_vm12, %v7803_v54, %v7804_v37  ;;  %v2125_v38 = vsel %vm597_vm12, %v7808_v56, %v7809_v55  ;;  %6596 = vmatmul.mubr.msk.f32.gmra.mrb[6].mxu1 %vm207_vm3, %v6460_v36 }
  0xd0   :  { %v7812_v60 = vpop.permute.xlu0 %7811  ;;  %v7817_v41 = vpop.permute.xlu1 %7816  ;;  %v7059_v58 = vpack.c.bf16 %v2125_v38, %v2123_v28  ;;  %2222 = vmatprep.mubr.f32.mxu1 %v8584_v0  ;;  %v6476_v28 = vld [vmem:[%s10951_s1 + $0x78] sm:$0xff] }
  0xd1   :  { %v7814_v59 = vunpack.i.h.bf16 %v7812_v60  ;;  %v7813_v61 = vunpack.i.l.bf16 %v7812_v60  ;;  %v7819_v62 = vunpack.i.h.bf16 %v7817_v41  ;;  %v7818_v63 = vunpack.i.l.bf16 %v7817_v41 }
  0xd2   :  { %7061 = vmatprep.subr.msk.bf16.mxu1 %vm8920_vm4, %v7059_v58 }
  0xd3   :  { %v602_v3 = vsel %vm597_vm12, %v7813_v61, %v7793_v43  ;;  %v604_v0 = vsel %vm597_vm12, %v7814_v59, %v7798_v45  ;;  %v2122_v4 = vsel %vm597_vm12, %v7818_v63, %v7803_v54  ;;  %v2124_v7 = vsel %vm597_vm12, %v7819_v62, %v7808_v56  ;;  %v9248_v45 = vld [vmem:[#allocation2] sm:$0xff] }
  0xd4   :  { %v6966_v12 = vpack.c.bf16 %v604_v0, %v602_v3  ;;  %v7062_v30 = vpack.c.bf16 %v2124_v7, %v2122_v4  ;;  %v9192_v13 = vpop.permute.xlu0 %7821  ;;  %v9194_v17 = vpop.permute.xlu1 %7826  ;;  %v6489_v0 = vld [vmem:[%s10951_s1 + $0x80] sm:$0xff] }
  0xd5   :  { %v7824_v14 = vunpack.i.h.bf16 %v9192_v13  ;;  %v7823_v19 = vunpack.i.l.bf16 %v9192_v13  ;;  %v7829_v23 = vunpack.i.h.bf16 %v9194_v17  ;;  %v7828_v31 = vunpack.i.l.bf16 %v9194_v17 }
  0xd6   :  { %6968 = vmatpush1.bf16.msk.msra.mxu0 %vm8963_vm6, %v6966_v12  ;;  %7064 = vmatpush1.bf16.msk.msra.mxu1 %vm8963_vm6, %v7062_v30 }
  0xd7   :  { %6970 = vmatprep.subr.bf16.mxu0 %v6969_v40  ;;  %7066 = vmatprep.subr.bf16.mxu1 %v7065_v1  ;;  %v900_v34 = vsel %vm898_vm13, %v7823_v19, %v7824_v14  ;;  %v902_v15 = vsel %vm898_vm13, %v7828_v31, %v7829_v23 }
  0xd8   :  { %v9217_v24 = vpop.permute.xlu0 %7831  ;;  %v9219_v44 = vpop.permute.xlu1 %7836  ;;  %v6977_v21 = vpack.c.bf16 %v902_v15, %v900_v34 }
  0xd9   :  { %v7834_v18 = vunpack.i.h.bf16 %v9217_v24  ;;  %v7833_v26 = vunpack.i.l.bf16 %v9217_v24  ;;  %v7839_v33 = vunpack.i.h.bf16 %v9219_v44  ;;  %v7838_v16 = vunpack.i.l.bf16 %v9219_v44  ;;  %6485 = vmatmul.mubr.msk.f32.vlgmr.msra.gmra.mrb[0].mxu0 %vm207_vm3, %v6473_v9  ;;  %6609 = vmatmul.mubr.msk.f32.vlgmr.msra.gmra.mrb[0].mxu1 %vm207_vm3, %v6473_v9 }
  0xda   :  { %6972 = vmatpush1.bf16.msra.mxu0 %v6971_v8  ;;  %7068 = vmatpush1.bf16.msra.mxu1 %v7067_v10 }
  0xdb   :  { %v2417_v43 = vsel %vm898_vm13, %v7833_v26, %v7834_v18  ;;  %v2419_v35 = vsel %vm898_vm13, %v7838_v16, %v7839_v33  ;;  %709 = vmatprep.mubr.f32.mxu0 %v9248_v45  ;;  %6974 = vmatprep.subr.bf16.mxu0 %v6973_v11 }
  0xdc   :  { %v7842_v36 = vpop.permute.xlu0 %7841  ;;  %v7847_v47 = vpop.permute.xlu1 %7846  ;;  %2228 = vmatprep.mubr.f32.mxu1 %v9248_v45  ;;  %7070 = vmatprep.subr.bf16.mxu1 %v7069_v32  ;;  %v7073_v48 = vpack.c.bf16 %v2419_v35, %v2417_v43 }
  0xdd   :  { %6486 = vmatmul.mubr.msk.f32.gmra.mrb[2].mxu0 %vm207_vm3, %v6474_v20  ;;  %6610 = vmatmul.mubr.msk.f32.gmra.mrb[2].mxu1 %vm207_vm3, %v6474_v20  ;;  %v7844_v51 = vunpack.i.h.bf16 %v7842_v36  ;;  %v7843_v52 = vunpack.i.l.bf16 %v7842_v36  ;;  %v7849_v38 = vunpack.i.h.bf16 %v7847_v47  ;;  %v7848_v60 = vunpack.i.l.bf16 %v7847_v47  ;;  %v6491_v20 = vld [vmem:[%s10951_s1 + $0x90] sm:$0xff] }
  0xde   :  { %6976 = vmatpush1.bf16.msra.mxu0 %v6975_v57  ;;  %7072 = vmatpush1.bf16.msra.mxu1 %v7071_v42 }
  0xdf   :  { %6979 = vmatprep.subr.msk.bf16.mxu0 %vm9024_vm9, %v6977_v21  ;;  %715 = vmatprep.mubr.f32.mxu0 %v9248_v45  ;;  %v899_v41 = vsel %vm898_vm13, %v7843_v52, %v7823_v19  ;;  %v901_v58 = vsel %vm898_vm13, %v7844_v51, %v7828_v31  ;;  %v2416_v4 = vsel %vm898_vm13, %v7848_v60, %v7833_v26  ;;  %v6492_v51 = vld [vmem:[%s10951_s1 + $0x98] sm:$0xff]  ;;  %v6497_v60 = vld [vmem:[%s10951_s1 + $0xa0] sm:$0xff] }
  0xe0   :  { %v7852_v27 = vpop.permute.xlu0 %7851  ;;  %7075 = vmatprep.subr.msk.bf16.mxu1 %vm9024_vm9, %v7073_v48  ;;  %v7857_v53 = vpop.permute.xlu1 %7856  ;;  %2234 = vmatprep.mubr.f32.mxu1 %v9248_v45  ;;  %v2418_v7 = vsel %vm898_vm13, %v7849_v38, %v7838_v16  ;;  %v6980_v13 = vpack.c.bf16 %v901_v58, %v899_v41 }
  0xe1   :  { %v7854_v37 = vunpack.i.h.bf16 %v7852_v27  ;;  %v7853_v54 = vunpack.i.l.bf16 %v7852_v27  ;;  %v7859_v55 = vunpack.i.h.bf16 %v7857_v53  ;;  %v7858_v56 = vunpack.i.l.bf16 %v7857_v53  ;;  %6487 = vmatmul.mubr.msk.f32.gmra.mrb[4].mxu0 %vm207_vm3, %v6475_v49  ;;  %6611 = vmatmul.mubr.msk.f32.gmra.mrb[4].mxu1 %vm207_vm3, %v6475_v49 }
  0xe2   :  { %721 = vmatprep.mubr.f32.mxu0 %v9248_v45  ;;  %2240 = vmatprep.mubr.f32.mxu1 %v9248_v45  ;;  %v7076_v9 = vpack.c.bf16 %v2418_v7, %v2416_v4  ;;  %v6498_v7 = vld [vmem:[%s10951_s1 + $0xa8] sm:$0xff] }
  0xe3   :  { %v904_v39 = vsel %vm898_vm13, %v7853_v54, %v7854_v37  ;;  %v906_v59 = vsel %vm898_vm13, %v7858_v56, %v7859_v55 }
  0xe4   :  { %v7862_v61 = vpop.permute.xlu0 %7861  ;;  %v7867_v62 = vpop.permute.xlu1 %7866  ;;  %v6983_v8 = vpack.c.bf16 %v906_v59, %v904_v39 }
  0xe5   :  { %v7864_v63 = vunpack.i.h.bf16 %v7862_v61  ;;  %v7863_v40 = vunpack.i.l.bf16 %v7862_v61  ;;  %v7869_v1 = vunpack.i.h.bf16 %v7867_v62  ;;  %v7868_v3 = vunpack.i.l.bf16 %v7867_v62  ;;  %6488 = vmatmul.mubr.msk.f32.gmra.mrb[6].mxu0 %vm207_vm3, %v6476_v28  ;;  %6612 = vmatmul.mubr.msk.f32.gmra.mrb[6].mxu1 %vm207_vm3, %v6476_v28 }
  0xe6   :  { %817 = vmatprep.mubr.f32.mxu0 %v9248_v45  ;;  %2335 = vmatprep.mubr.f32.mxu1 %v9248_v45 }
  0xe7   :  { %v2421_v12 = vsel %vm898_vm13, %v7863_v40, %v7864_v63  ;;  %v2423_v30 = vsel %vm898_vm13, %v7868_v3, %v7869_v1 }
  0xe8   :  { %v7872_v17 = vpop.permute.xlu0 %7871  ;;  %v7877_v2 = vpop.permute.xlu1 %7876  ;;  %v7079_v10 = vpack.c.bf16 %v2423_v30, %v2421_v12 }
  0xe9   :  { %v7874_v14 = vunpack.i.h.bf16 %v7872_v17  ;;  %v7873_v19 = vunpack.i.l.bf16 %v7872_v17  ;;  %v7879_v23 = vunpack.i.h.bf16 %v7877_v2  ;;  %v7878_v31 = vunpack.i.l.bf16 %v7877_v2  ;;  %6493 = vmatmul.mubr.msk.f32.vlgmr.msra.gmra.mrb[0].mxu0 %vm207_vm3, %v6489_v0  ;;  %6617 = vmatmul.mubr.msk.f32.vlgmr.msra.gmra.mrb[0].mxu1 %vm207_vm3, %v6489_v0 }
  0xea   :  { %6982 = vmatpush1.bf16.msk.msra.mxu0 %vm9066_vm11, %v6980_v13  ;;  %7078 = vmatpush1.bf16.msk.msra.mxu1 %vm9066_vm11, %v7076_v9 }
  0xeb   :  { %v903_v11 = vsel %vm898_vm13, %v7873_v19, %v7853_v54  ;;  %v905_v24 = vsel %vm898_vm13, %v7874_v14, %v7858_v56  ;;  %v2420_v44 = vsel %vm898_vm13, %v7878_v31, %v7863_v40  ;;  %v2422_v50 = vsel %vm898_vm13, %v7879_v23, %v7868_v3  ;;  %6985 = vmatprep.subr.msk.bf16.mxu0 %vm9024_vm9, %v6983_v8  ;;  %v6499_v23 = vld [vmem:[%s10951_s1 + $0xb0] sm:$0xff] }
  0xec   :  { %v6986_v57 = vpack.c.bf16 %v905_v24, %v903_v11  ;;  %v7082_v32 = vpack.c.bf16 %v2422_v50, %v2420_v44  ;;  %v7882_v18 = vpop.permute.xlu0 %7881  ;;  %v7887_v26 = vpop.permute.xlu1 %7886  ;;  %823 = vmatprep.mubr.f32.mxu0 %v9248_v45  ;;  %7081 = vmatprep.subr.msk.bf16.mxu1 %vm9024_vm9, %v7079_v10 }
  0xed   :  { %v7884_v33 = vunpack.i.h.bf16 %v7882_v18  ;;  %v7883_v16 = vunpack.i.l.bf16 %v7882_v18  ;;  %v7889_v34 = vunpack.i.h.bf16 %v7887_v26  ;;  %v7888_v15 = vunpack.i.l.bf16 %v7887_v26  ;;  %6494 = vmatmul.mubr.msk.f32.gmra.mrb[2].mxu0 %vm207_vm3, %v6490_v5  ;;  %2341 = vmatprep.mubr.f32.mxu1 %v9248_v45  ;;  %v6500_v18 = vld [vmem:[%s10951_s1 + $0xb8] sm:$0xff] }
  0xee   :  { %6988 = vmatpush1.bf16.msk.msra.mxu0 %vm9066_vm11, %v6986_v57  ;;  %6618 = vmatmul.mubr.msk.f32.gmra.mrb[2].mxu1 %vm207_vm3, %v6490_v5 }
  0xef   :  { %v1063_v22 = vsel %vm1061_vm14, %v7883_v16, %v7884_v33  ;;  %v1065_v42 = vsel %vm1061_vm14, %v7888_v15, %v7889_v34  ;;  %829 = vmatprep.mubr.f32.mxu0 %v9248_v45  ;;  %7084 = vmatpush1.bf16.msk.msra.mxu1 %vm9066_vm11, %v7082_v32 }
  0xf0   :  { %v7892_v43 = vpop.permute.xlu0 %7891  ;;  %v7897_v35 = vpop.permute.xlu1 %7896  ;;  %2347 = vmatprep.mubr.f32.mxu1 %v9248_v45  ;;  %v6989_v36 = vpack.c.bf16 %v1065_v42, %v1063_v22 }
  0xf1   :  { %v7894_v47 = vunpack.i.h.bf16 %v7892_v43  ;;  %v7893_v48 = vunpack.i.l.bf16 %v7892_v43  ;;  %v7899_v21 = vunpack.i.h.bf16 %v7897_v35  ;;  %v7898_v49 = vunpack.i.l.bf16 %v7897_v35  ;;  %6495 = vmatmul.mubr.msk.f32.gmra.mrb[4].mxu0 %vm207_vm3, %v6491_v20 }
  0xf2   :  { %6991 = vmatprep.subr.msk.bf16.mxu0 %vm8920_vm4, %v6989_v36  ;;  %835 = vmatprep.mubr.f32.mxu0 %v9248_v45 }
  0xf3   :  { %v2578_v52 = vsel %vm1061_vm14, %v7893_v48, %v7894_v47  ;;  %v2580_v27 = vsel %vm1061_vm14, %v7898_v49, %v7899_v21  ;;  %6619 = vmatmul.mubr.msk.f32.gmra.mrb[4].mxu1 %vm207_vm3, %v6491_v20 }
  0xf4   :  { %v7902_v53 = vpop.permute.xlu0 %7901  ;;  %2353 = vmatprep.mubr.f32.mxu1 %v9248_v45  ;;  %v7085_v37 = vpack.c.bf16 %v2580_v27, %v2578_v52 }
  0xf5   :  { %v7904_v54 = vunpack.i.h.bf16 %v7902_v53  ;;  %v7903_v55 = vunpack.i.l.bf16 %v7902_v53  ;;  %v7907_v56 = vpop.permute.xlu1 %7906  ;;  %6496 = vmatmul.mubr.msk.f32.gmra.mrb[6].mxu0 %vm207_vm3, %v6492_v51 }
  0xf6   :  { %v7909_v28 = vunpack.i.h.bf16 %v7907_v56  ;;  %v7908_v38 = vunpack.i.l.bf16 %v7907_v56  ;;  %7087 = vmatprep.subr.msk.bf16.mxu1 %vm8920_vm4, %v7085_v37  ;;  %1004 = vmatprep.mubr.f32.mxu0 %v9248_v45  ;;  %v6514_v56 = vld [vmem:[%s10951_s1 + $0xc8] sm:$0xff] }
  0xf7   :  { %v1062_v41 = vsel %vm1061_vm14, %v7903_v55, %v7883_v16  ;;  %v1064_v58 = vsel %vm1061_vm14, %v7904_v54, %v7888_v15  ;;  %6620 = vmatmul.mubr.msk.f32.gmra.mrb[6].mxu1 %vm207_vm3, %v6492_v51 }
  0xf8   :  { %v6992_v39 = vpack.c.bf16 %v1064_v58, %v1062_v41  ;;  %v2577_v59 = vsel %vm1061_vm14, %v7908_v38, %v7893_v48  ;;  %v2579_v61 = vsel %vm1061_vm14, %v7909_v28, %v7898_v49  ;;  %v7912_v62 = vpop.permute.xlu0 %7911  ;;  %2520 = vmatprep.mubr.f32.mxu1 %v9248_v45  ;;  %v6513_v48 = vld [vmem:[%s10951_s1 + $0xc0] sm:$0xff] }
  0xf9   :  { %v7088_v63 = vpack.c.bf16 %v2579_v61, %v2577_v59  ;;  %v7914_v40 = vunpack.i.h.bf16 %v7912_v62  ;;  %v7913_v1 = vunpack.i.l.bf16 %v7912_v62  ;;  %v7917_v3 = vpop.permute.xlu1 %7916  ;;  %6509 = vmatmul.mubr.msk.f32.vlgmr.msra.gmra.mrb[0].mxu0 %vm207_vm3, %v6497_v60 }
  0xfa   :  { %v7919_v0 = vunpack.i.h.bf16 %v7917_v3  ;;  %v7918_v4 = vunpack.i.l.bf16 %v7917_v3  ;;  %6994 = vmatpush1.bf16.msk.msra.mxu0 %vm8963_vm6, %v6992_v39  ;;  %1010 = vmatprep.mubr.f32.mxu0 %v9248_v45 }
  0xfb   :  { %v1067_v12 = vsel %vm1061_vm14, %v7913_v1, %v7914_v40  ;;  %6633 = vmatmul.mubr.msk.f32.vlgmr.msra.gmra.mrb[0].mxu1 %vm207_vm3, %v6497_v60 }
  0xfc   :  { %v1069_v30 = vsel %vm1061_vm14, %v7918_v4, %v7919_v0  ;;  %7090 = vmatpush1.bf16.msk.msra.mxu1 %vm8963_vm6, %v7088_v63  ;;  %v7922_v13 = vpop.permute.xlu0 %7921  ;;  %2526 = vmatprep.mubr.f32.mxu1 %v9248_v45  ;;  %v6515_v63 = vld [vmem:[%s10951_s1 + $0xd0] sm:$0xff] }
  0xfd   :  { %v7924_v17 = vunpack.i.h.bf16 %v7922_v13  ;;  %v7923_v2 = vunpack.i.l.bf16 %v7922_v13  ;;  %v7927_v8 = vpop.permute.xlu1 %7926  ;;  %v6995_v10 = vpack.c.bf16 %v1069_v30, %v1067_v12  ;;  %6510 = vmatmul.mubr.msk.f32.gmra.mrb[2].mxu0 %vm207_vm3, %v6498_v7 }
  0xfe   :  { %v7929_v14 = vunpack.i.h.bf16 %v7927_v8  ;;  %v7928_v19 = vunpack.i.l.bf16 %v7927_v8  ;;  %1016 = vmatprep.mubr.f32.mxu0 %v9248_v45 }
  0xff   :  { %v2582_v31 = vsel %vm1061_vm14, %v7923_v2, %v7924_v17  ;;  %6997 = vmatprep.subr.msk.bf16.mxu0 %vm8920_vm4, %v6995_v10  ;;  %6634 = vmatmul.mubr.msk.f32.gmra.mrb[2].mxu1 %vm207_vm3, %v6498_v7  ;;  %v6516_v10 = vld [vmem:[%s10951_s1 + $0xd8] sm:$0xff] }
 0x100   :  { %v2584_v9 = vsel %vm1061_vm14, %v7928_v19, %v7929_v14  ;;  %v7932_v5 = vpop.permute.xlu0 %7931  ;;  %2532 = vmatprep.mubr.f32.mxu1 %v9248_v45 }
 0x101   :  { %v7934_v11 = vunpack.i.h.bf16 %v7932_v5  ;;  %v7933_v24 = vunpack.i.l.bf16 %v7932_v5  ;;  %v7937_v44 = vpop.permute.xlu1 %7936  ;;  %v7091_v50 = vpack.c.bf16 %v2584_v9, %v2582_v31  ;;  %6511 = vmatmul.mubr.msk.f32.gmra.mrb[4].mxu0 %vm207_vm3, %v6499_v23 }
 0x102   :  { %v7939_v57 = vunpack.i.h.bf16 %v7937_v44  ;;  %v7938_v32 = vunpack.i.l.bf16 %v7937_v44  ;;  %1022 = vmatprep.mubr.f32.mxu0 %v9248_v45 }
 0x103   :  { %v1066_v26 = vsel %vm1061_vm14, %v7933_v24, %v7913_v1  ;;  %v1068_v33 = vsel %vm1061_vm14, %v7934_v11, %v7918_v4  ;;  %7093 = vmatprep.subr.msk.bf16.mxu1 %vm8920_vm4, %v7091_v50  ;;  %6635 = vmatmul.mubr.msk.f32.gmra.mrb[4].mxu1 %vm207_vm3, %v6499_v23 }
 0x104   :  { %v6998_v16 = vpack.c.bf16 %v1068_v33, %v1066_v26  ;;  %v2581_v34 = vsel %vm1061_vm14, %v7938_v32, %v7923_v2  ;;  %v2583_v15 = vsel %vm1061_vm14, %v7939_v57, %v7928_v19  ;;  %v7942_v20 = vpop.permute.xlu0 %7941  ;;  %2538 = vmatprep.mubr.f32.mxu1 %v9248_v45 }
 0x105   :  { %v7094_v22 = vpack.c.bf16 %v2583_v15, %v2581_v34  ;;  %v7944_v42 = vunpack.i.h.bf16 %v7942_v20  ;;  %v7943_v43 = vunpack.i.l.bf16 %v7942_v20  ;;  %v7947_v35 = vpop.permute.xlu1 %7946  ;;  %6512 = vmatmul.mubr.msk.f32.gmra.mrb[6].mxu0 %vm207_vm3, %v6500_v18 }
 0x106   :  { %v7949_v36 = vunpack.i.h.bf16 %v7947_v35  ;;  %v7948_v47 = vunpack.i.l.bf16 %v7947_v35  ;;  %7000 = vmatpush1.bf16.msk.msra.mxu0 %vm8963_vm6, %v6998_v16  ;;  %1167 = vmatprep.mubr.f32.mxu0 %v9248_v45 }
 0x107   :  { %7096 = vmatpush1.bf16.msk.msra.mxu1 %vm8963_vm6, %v7094_v22  ;;  %v1231_v21 = vsel %vm1229_vm15, %v7943_v43, %v7944_v42 }
 0x108   :  { %v7952_v49 = vpop.permute.xlu0 %7951  ;;  %v1233_v51 = vsel %vm1229_vm15, %v7948_v47, %v7949_v36  ;;  %6636 = vmatmul.mubr.msk.f32.gmra.mrb[6].mxu1 %vm207_vm3, %v6500_v18 }
 0x109   :  { %v7954_v52 = vunpack.i.h.bf16 %v7952_v49  ;;  %v7953_v27 = vunpack.i.l.bf16 %v7952_v49  ;;  %v7957_v53 = vpop.permute.xlu1 %7956  ;;  %v7001_v37 = vpack.c.bf16 %v1233_v51, %v1231_v21  ;;  %6525 = vmatmul.mubr.msk.f32.vlgmr.msra.gmra.mrb[0].mxu0 %vm207_vm3, %v6513_v48  ;;  %2681 = vmatprep.mubr.f32.mxu1 %v9248_v45 }
 0x10a   :  { %v7959_v54 = vunpack.i.h.bf16 %v7957_v53  ;;  %v7958_v55 = vunpack.i.l.bf16 %v7957_v53  ;;  %1173 = vmatprep.mubr.f32.mxu0 %v9248_v45 }
 0x10b   :  { %7002 = vmatprep.subr.bf16.mxu0 %v7001_v37  ;;  %v2743_v28 = vsel %vm1229_vm15, %v7953_v27, %v7954_v52 }
 0x10c   :  { %v7962_v38 = vpop.permute.xlu0 %7961  ;;  %v2745_v60 = vsel %vm1229_vm15, %v7958_v55, %v7959_v54  ;;  %6649 = vmatmul.mubr.msk.f32.vlgmr.msra.gmra.mrb[0].mxu1 %vm207_vm3, %v6513_v48 }
 0x10d   :  { %v7964_v41 = vunpack.i.h.bf16 %v7962_v38  ;;  %v7963_v58 = vunpack.i.l.bf16 %v7962_v38  ;;  %v7967_v39 = vpop.permute.xlu1 %7966  ;;  %v7097_v59 = vpack.c.bf16 %v2745_v60, %v2743_v28  ;;  %6526 = vmatmul.mubr.msk.f32.gmra.mrb[2].mxu0 %vm207_vm3, %v6514_v56  ;;  %2687 = vmatprep.mubr.f32.mxu1 %v9248_v45 }
 0x10e   :  { %v7969_v61 = vunpack.i.h.bf16 %v7967_v39  ;;  %v7968_v62 = vunpack.i.l.bf16 %v7967_v39  ;;  %1179 = vmatprep.mubr.f32.mxu0 %v9248_v45 }
 0x10f   :  { %v1230_v40 = vsel %vm1229_vm15, %v7963_v58, %v7943_v43  ;;  %v1232_v1 = vsel %vm1229_vm15, %v7964_v41, %v7948_v47  ;;  %7098 = vmatprep.subr.bf16.mxu1 %v7097_v59  ;;  %v6530_v58 = vld [vmem:[%s10951_s1 + $0xe8] sm:$0xff] }
 0x110   :  { %v2742_v3 = vsel %vm1229_vm15, %v7968_v62, %v7953_v27  ;;  %v2744_v0 = vsel %vm1229_vm15, %v7969_v61, %v7958_v55  ;;  %v7972_v4 = vpop.permute.xlu0 %7971  ;;  %v7003_v7 = vpack.c.bf16 %v1232_v1, %v1230_v40  ;;  %6650 = vmatmul.mubr.msk.f32.gmra.mrb[2].mxu1 %vm207_vm3, %v6514_v56  ;;  %v6529_v27 = vld [vmem:[%s10951_s1 + $0xe0] sm:$0xff] }
 0x111   :  { %v7974_v12 = vunpack.i.h.bf16 %v7972_v4  ;;  %v7973_v30 = vunpack.i.l.bf16 %v7972_v4  ;;  %v7977_v13 = vpop.permute.xlu1 %7976  ;;  %v7099_v17 = vpack.c.bf16 %v2744_v0, %v2742_v3  ;;  %6527 = vmatmul.mubr.msk.f32.gmra.mrb[4].mxu0 %vm207_vm3, %v6515_v63  ;;  %2693 = vmatprep.mubr.f32.mxu1 %v9248_v45  ;;  %v6531_v4 = vld [vmem:[%s10951_s1 + $0xf0] sm:$0xff] }
 0x112   :  { %v7979_v2 = vunpack.i.h.bf16 %v7977_v13  ;;  %v7978_v8 = vunpack.i.l.bf16 %v7977_v13  ;;  %7004 = vmatpush1.bf16.msra.mxu0 %v7003_v7  ;;  %1185 = vmatprep.mubr.f32.mxu0 %v9248_v45 }
 0x113   :  { %7100 = vmatpush1.bf16.msra.mxu1 %v7099_v17  ;;  %v1235_v14 = vsel %vm1229_vm15, %v7973_v30, %v7974_v12 }
 0x114   :  { %v7982_v19 = vpop.permute.xlu0 %7981  ;;  %v1237_v23 = vsel %vm1229_vm15, %v7978_v8, %v7979_v2  ;;  %6651 = vmatmul.mubr.msk.f32.gmra.mrb[4].mxu1 %vm207_vm3, %v6515_v63 }
 0x115   :  { %v7984_v31 = vunpack.i.h.bf16 %v7982_v19  ;;  %v7983_v9 = vunpack.i.l.bf16 %v7982_v19  ;;  %v7987_v5 = vpop.permute.xlu1 %7986  ;;  %v7005_v11 = vpack.c.bf16 %v1237_v23, %v1235_v14  ;;  %6528 = vmatmul.mubr.msk.f32.gmra.mrb[6].mxu0 %vm207_vm3, %v6516_v10  ;;  %2699 = vmatprep.mubr.f32.mxu1 %v9248_v45 }
 0x116   :  { %v7989_v24 = vunpack.i.h.bf16 %v7987_v5  ;;  %v7988_v44 = vunpack.i.l.bf16 %v7987_v5  ;;  %1322 = vmatprep.mubr.f32.mxu0 %v9248_v45 }
 0x117   :  { %7006 = vmatprep.subr.bf16.mxu0 %v7005_v11  ;;  %v2747_v50 = vsel %vm1229_vm15, %v7983_v9, %v7984_v31 }
 0x118   :  { %v7992_v57 = vpop.permute.xlu0 %7991  ;;  %v2749_v32 = vsel %vm1229_vm15, %v7988_v44, %v7989_v24  ;;  %6652 = vmatmul.mubr.msk.f32.gmra.mrb[6].mxu1 %vm207_vm3, %v6516_v10 }
 0x119   :  { %v7994_v18 = vunpack.i.h.bf16 %v7992_v57  ;;  %v7993_v26 = vunpack.i.l.bf16 %v7992_v57  ;;  %v7997_v33 = vpop.permute.xlu1 %7996  ;;  %v7101_v16 = vpack.c.bf16 %v2749_v32, %v2747_v50  ;;  %2834 = vmatprep.mubr.f32.mxu1 %v9248_v45 }
 0x11a   :  { %v7999_v34 = vunpack.i.h.bf16 %v7997_v33  ;;  %v7998_v15 = vunpack.i.l.bf16 %v7997_v33 }
 0x11b   :  { %v1234_v20 = vsel %vm1229_vm15, %v7993_v26, %v7973_v30  ;;  %v1236_v22 = vsel %vm1229_vm15, %v7994_v18, %v7978_v8  ;;  %7102 = vmatprep.subr.bf16.mxu1 %v7101_v16 }
 0x11c   :  { %v2746_v42 = vsel %vm1229_vm15, %v7998_v15, %v7983_v9  ;;  %v2748_v43 = vsel %vm1229_vm15, %v7999_v34, %v7988_v44  ;;  %v8002_v35 = vpop.permute.xlu0 %8001  ;;  %v7007_v36 = vpack.c.bf16 %v1236_v22, %v1234_v20  ;;  %v6532_v9 = vld [vmem:[%s10951_s1 + $0xf8] sm:$0xff] }
 0x11d   :  { %v8004_v47 = vunpack.i.h.bf16 %v8002_v35  ;;  %v8003_v48 = vunpack.i.l.bf16 %v8002_v35  ;;  %v8007_v21 = vpop.permute.xlu1 %8006  ;;  %v7103_v49 = vpack.c.bf16 %v2748_v43, %v2746_v42 }
 0x11e   :  { %v8009_v51 = vunpack.i.h.bf16 %v8007_v21  ;;  %v8008_v52 = vunpack.i.l.bf16 %v8007_v21  ;;  %7008 = vmatpush1.bf16.msra.mxu0 %v7007_v36 }
 0x11f   :  { %v1381_v53 = vsel %vm1379_vm2, %v8003_v48, %v8004_v47  ;;  %7104 = vmatpush1.bf16.msra.mxu1 %v7103_v49 }
 0x120   :  { %v1383_v37 = vsel %vm1379_vm2, %v8008_v52, %v8009_v51  ;;  %v8012_v54 = vpop.permute.xlu0 %8011 }
 0x121   :  { %v8014_v55 = vunpack.i.h.bf16 %v8012_v54  ;;  %v8013_v56 = vunpack.i.l.bf16 %v8012_v54  ;;  %v8017_v28 = vpop.permute.xlu1 %8016  ;;  %v7009_v38 = vpack.c.bf16 %v1383_v37, %v1381_v53  ;;  %6533 = vmatmul.mubr.msk.f32.vlgmr.msra.gmra.mrb[0].mxu0 %vm207_vm3, %v6529_v27  ;;  %v6539_v53 = vld [vmem:[%s10951_s1 + $0x110] sm:$0xff]  ;;  %v6540_v37 = vld [vmem:[%s10951_s1 + $0x118] sm:$0xff] }
 0x122   :  { %v8019_v60 = vunpack.i.h.bf16 %v8017_v28  ;;  %v8018_v41 = vunpack.i.l.bf16 %v8017_v28  ;;  %6657 = vmatmul.mubr.msk.f32.vlgmr.msra.gmra.mrb[0].mxu1 %vm207_vm3, %v6529_v27  ;;  %1328 = vmatprep.mubr.f32.mxu0 %v9248_v45  ;;  %v6538_v27 = vld [vmem:[%s10951_s1 + $0x108] sm:$0xff] }
 0x123   :  { %v2892_v39 = vsel %vm1379_vm2, %v8013_v56, %v8014_v55  ;;  %7011 = vmatprep.subr.msk.bf16.mxu0 %vm9024_vm9, %v7009_v38  ;;  %2840 = vmatprep.mubr.f32.mxu1 %v9248_v45 }
 0x124   :  { %v2894_v59 = vsel %vm1379_vm2, %v8018_v41, %v8019_v60  ;;  %v8022_v61 = vpop.permute.xlu0 %8021 }
 0x125   :  { %v8024_v62 = vunpack.i.h.bf16 %v8022_v61  ;;  %v8023_v63 = vunpack.i.l.bf16 %v8022_v61  ;;  %v8027_v40 = vpop.permute.xlu1 %8026  ;;  %v7105_v1 = vpack.c.bf16 %v2894_v59, %v2892_v39  ;;  %6534 = vmatmul.mubr.msk.f32.gmra.mrb[2].mxu0 %vm207_vm3, %v6530_v58 }
 0x126   :  { %v8029_v3 = vunpack.i.h.bf16 %v8027_v40  ;;  %v8028_v0 = vunpack.i.l.bf16 %v8027_v40  ;;  %6658 = vmatmul.mubr.msk.f32.gmra.mrb[2].mxu1 %vm207_vm3, %v6530_v58  ;;  %1334 = vmatprep.mubr.f32.mxu0 %v9248_v45 }
 0x127   :  { %v1380_v7 = vsel %vm1379_vm2, %v8023_v63, %v8003_v48  ;;  %v1382_v12 = vsel %vm1379_vm2, %v8024_v62, %v8008_v52  ;;  %7107 = vmatprep.subr.msk.bf16.mxu1 %vm9024_vm9, %v7105_v1  ;;  %2846 = vmatprep.mubr.f32.mxu1 %v9248_v45  ;;  %v6537_v52 = vld [vmem:[%s10951_s1 + $0x100] sm:$0xff] }
 0x128   :  { %v7012_v30 = vpack.c.bf16 %v1382_v12, %v1380_v7  ;;  %v2891_v13 = vsel %vm1379_vm2, %v8028_v0, %v8013_v56  ;;  %v2893_v17 = vsel %vm1379_vm2, %v8029_v3, %v8018_v41  ;;  %v8032_v2 = vpop.permute.xlu0 %8031 }
 0x129   :  { %v7108_v8 = vpack.c.bf16 %v2893_v17, %v2891_v13  ;;  %v8034_v10 = vunpack.i.h.bf16 %v8032_v2  ;;  %v8033_v14 = vunpack.i.l.bf16 %v8032_v2  ;;  %v8037_v19 = vpop.permute.xlu1 %8036  ;;  %6535 = vmatmul.mubr.msk.f32.gmra.mrb[4].mxu0 %vm207_vm3, %v6531_v4 }
 0x12a   :  { %v8039_v23 = vunpack.i.h.bf16 %v8037_v19  ;;  %v8038_v31 = vunpack.i.l.bf16 %v8037_v19  ;;  %7014 = vmatpush1.bf16.msk.msra.mxu0 %vm9066_vm11, %v7012_v30  ;;  %6659 = vmatmul.mubr.msk.f32.gmra.mrb[4].mxu1 %vm207_vm3, %v6531_v4 }
 0x12b   :  { %v1385_v5 = vsel %vm1379_vm2, %v8033_v14, %v8034_v10  ;;  %7110 = vmatpush1.bf16.msk.msra.mxu1 %vm9066_vm11, %v7108_v8  ;;  %1340 = vmatprep.mubr.f32.mxu0 %v9248_v45 }
 0x12c   :  { %v1387_v11 = vsel %vm1379_vm2, %v8038_v31, %v8039_v23  ;;  %v8042_v24 = vpop.permute.xlu0 %8041  ;;  %2852 = vmatprep.mubr.f32.mxu1 %v9248_v45 }
 0x12d   :  { %v8044_v44 = vunpack.i.h.bf16 %v8042_v24  ;;  %v8043_v50 = vunpack.i.l.bf16 %v8042_v24  ;;  %v8047_v57 = vpop.permute.xlu1 %8046  ;;  %v7015_v32 = vpack.c.bf16 %v1387_v11, %v1385_v5  ;;  %6536 = vmatmul.mubr.msk.f32.gmra.mrb[6].mxu0 %vm207_vm3, %v6532_v9 }
 0x12e   :  { %v8049_v18 = vunpack.i.h.bf16 %v8047_v57  ;;  %v8048_v26 = vunpack.i.l.bf16 %v8047_v57  ;;  %6660 = vmatmul.mubr.msk.f32.gmra.mrb[6].mxu1 %vm207_vm3, %v6532_v9  ;;  %1485 = vmatprep.mubr.f32.mxu0 %v9248_v45 }
 0x12f   :  { %v2896_v33 = vsel %vm1379_vm2, %v8043_v50, %v8044_v44  ;;  %7017 = vmatprep.subr.msk.bf16.mxu0 %vm9024_vm9, %v7015_v32  ;;  %2995 = vmatprep.mubr.f32.mxu1 %v9248_v45 }
 0x130   :  { %v2898_v16 = vsel %vm1379_vm2, %v8048_v26, %v8049_v18  ;;  %v8052_v34 = vpop.permute.xlu0 %8051 }
 0x131   :  { %v8054_v15 = vunpack.i.h.bf16 %v8052_v34  ;;  %v8053_v20 = vunpack.i.l.bf16 %v8052_v34  ;;  %v8057_v22 = vpop.permute.xlu1 %8056  ;;  %v7111_v42 = vpack.c.bf16 %v2898_v16, %v2896_v33 }
 0x132   :  { %v8059_v43 = vunpack.i.h.bf16 %v8057_v22  ;;  %v8058_v35 = vunpack.i.l.bf16 %v8057_v22 }
 0x133   :  { %v1384_v36 = vsel %vm1379_vm2, %v8053_v20, %v8033_v14  ;;  %v1386_v47 = vsel %vm1379_vm2, %v8054_v15, %v8038_v31  ;;  %7113 = vmatprep.subr.msk.bf16.mxu1 %vm9024_vm9, %v7111_v42 }
 0x134   :  { %v7018_v48 = vpack.c.bf16 %v1386_v47, %v1384_v36  ;;  %v2895_v21 = vsel %vm1379_vm2, %v8058_v35, %v8043_v50  ;;  %v2897_v49 = vsel %vm1379_vm2, %v8059_v43, %v8048_v26 }
 0x135   :  { %v7114_v51 = vpack.c.bf16 %v2897_v49, %v2895_v21 }
 0x136   :  { %7020 = vmatpush1.bf16.msk.msra.mxu0 %vm9066_vm11, %v7018_v48 }
 0x137   :  { %7116 = vmatpush1.bf16.msk.msra.mxu1 %vm9066_vm11, %v7114_v51 }
 0x139   :  { %6549 = vmatmul.mubr.msk.f32.vlgmr.msra.gmra.mrb[0].mxu0 %vm207_vm3, %v6537_v52 }
 0x13a   :  { %6673 = vmatmul.mubr.msk.f32.vlgmr.msra.gmra.mrb[0].mxu1 %vm207_vm3, %v6537_v52  ;;  %1491 = vmatprep.mubr.f32.mxu0 %v9248_v45 }
 0x13b   :  { %3001 = vmatprep.mubr.f32.mxu1 %v9248_v45 }
 0x13d   :  { %6550 = vmatmul.mubr.msk.f32.gmra.mrb[2].mxu0 %vm207_vm3, %v6538_v27 }
 0x13e   :  { %6674 = vmatmul.mubr.msk.f32.gmra.mrb[2].mxu1 %vm207_vm3, %v6538_v27  ;;  %1497 = vmatprep.mubr.f32.mxu0 %v9248_v45 }
 0x13f   :  { %3007 = vmatprep.mubr.f32.mxu1 %v9248_v45 }
 0x141   :  { %6551 = vmatmul.mubr.msk.f32.gmra.mrb[4].mxu0 %vm207_vm3, %v6539_v53 }
 0x142   :  { %6675 = vmatmul.mubr.msk.f32.gmra.mrb[4].mxu1 %vm207_vm3, %v6539_v53  ;;  %1503 = vmatprep.mubr.f32.mxu0 %v9248_v45 }
 0x143   :  { %3013 = vmatprep.mubr.f32.mxu1 %v9248_v45  ;;  %v1521_v54 = vpop.permute.xlu0 %1520  ;;  %v1526_v58 = vpop.permute.xlu1 %1525 }
 0x145   :  { %6552 = vmatmul.mubr.msk.f32.gmra.mrb[6].mxu0 %vm207_vm3, %v6540_v37 }
 0x146   :  { %6676 = vmatmul.mubr.msk.f32.gmra.mrb[6].mxu1 %vm207_vm3, %v6540_v37  ;;  %3414 = vmatprep.mubr.f32.mxu0 %v9248_v45 }
 0x147   :  { %4950 = vmatprep.mubr.f32.mxu1 %v9248_v45  ;;  %v1536_v9 = vpop.permute.xlu0 %1535 }
 0x148   :  { %v1531_v14 = vpop.permute.xlu1 %1530 }
 0x20c   :  { %v1487_v55 = vpop.f32.mrb[0].mxu0 }
 0x20d   :  { %v9522_v56 = vadd.f32 %v1521_v54, %v1487_v55  ;;  %v1489_v28 = vpop.f32.mrb[1].mxu0  ;;  %v2997_v38 = vpop.f32.mrb[0].mxu1 }
 0x20e   :  { %v9524_v60 = vadd.f32 %v1521_v54, %v1489_v28  ;;  %v2999_v41 = vpop.f32.mrb[1].mxu1  ;;  %v9540_v30 = vadd.f32 %v2997_v38, %v1521_v54 }
 0x20f   :  { %v1570_v39 = vmul.f32 %v9522_v56, %v9522_v56  ;;  %v9542_v13 = vadd.f32 %v2999_v41, %v1521_v54 }
 0x210   :  { %v1571_v59 = vmul.f32 %v9524_v60, %v9524_v60  ;;  %v1493_v61 = vpop.f32.mrb[2].mxu0  ;;  %v1554_v45 = vadd.f32 %v9524_v60, %v9522_v56  ;;  %v3061_v16 = vmul.f32 %v9540_v30, %v9540_v30 }
 0x211   :  { %v9532_v62 = vadd.f32 %v1526_v58, %v1493_v61  ;;  %v1495_v63 = vpop.f32.mrb[3].mxu0  ;;  %v3003_v40 = vpop.f32.mrb[2].mxu1  ;;  %v3045_v50 = vadd.f32 %v9542_v13, %v9540_v30  ;;  %v3062_v34 = vmul.f32 %v9542_v13, %v9542_v13  ;;  %v8594_v61 = vmov 1  }
 0x212   :  { %v9534_v1 = vadd.f32 %v1526_v58, %v1495_v63  ;;  %v3005_v3 = vpop.f32.mrb[3].mxu1  ;;  %1555 = vadd.xlane.f32.xlu1 %v1554_v45  ;;  %v1578_v0 = vadd.f32 %v1571_v59, %v1570_v39  ;;  %v9544_v8 = vadd.f32 %v3003_v40, %v1526_v58  ;;  %8063 = vset.pattern.permute.xlu0 %v8594_v61 }
 0x213   :  { %v1572_v4 = vmul.f32 %v9532_v62, %v9532_v62  ;;  %v9546_v10 = vadd.f32 %v3005_v3, %v1526_v58  ;;  %v3069_v35 = vadd.f32 %v3062_v34, %v3061_v16  ;;  %8062 = vset.pattern.permute.xlu1 %v8594_v61 }
 0x214   :  { %v1573_v7 = vmul.f32 %v9534_v1, %v9534_v1  ;;  %1579 = vadd.xlane.f32.xlu0 %v1578_v0  ;;  %v1499_v12 = vpop.f32.mrb[4].mxu0  ;;  %v1557_v31 = vadd.f32 %v9534_v1, %v9532_v62  ;;  %v3063_v15 = vmul.f32 %v9544_v8, %v9544_v8 }
 0x215   :  { %v1501_v17 = vpop.f32.mrb[5].mxu0  ;;  %v3009_v2 = vpop.f32.mrb[4].mxu1  ;;  %v9550_v11 = vadd.f32 %v1531_v14, %v1499_v12  ;;  %v3048_v33 = vadd.f32 %v9546_v10, %v9544_v8  ;;  %v3064_v20 = vmul.f32 %v9546_v10, %v9546_v10 }
 0x216   :  { %v3011_v19 = vpop.f32.mrb[5].mxu1  ;;  %v1581_v23 = vadd.f32 %v1573_v7, %v1572_v4  ;;  %v9554_v57 = vadd.f32 %v1531_v14, %v1501_v17  ;;  %v9582_v49 = vadd.f32 %v3009_v2, %v1531_v14 }
 0x217   :  { %v1574_v43 = vmul.f32 %v9550_v11, %v9550_v11  ;;  %v3072_v21 = vadd.f32 %v3064_v20, %v3063_v15  ;;  %v9584_v51 = vadd.f32 %v3011_v19, %v1531_v14 }
 0x218   :  { %1582 = vadd.xlane.f32.xlu1 %v1581_v23  ;;  %1558 = vadd.xlane.f32.xlu0 %v1557_v31  ;;  %v1505_v5 = vpop.f32.mrb[6].mxu0  ;;  %v1560_v22 = vadd.f32 %v9554_v57, %v9550_v11  ;;  %v1575_v36 = vmul.f32 %v9554_v57, %v9554_v57  ;;  %v3065_v54 = vmul.f32 %v9582_v49, %v9582_v49 }
 0x219   :  { %v1507_v24 = vpop.f32.mrb[7].mxu0  ;;  %v3015_v44 = vpop.f32.mrb[6].mxu1  ;;  %v9556_v32 = vadd.f32 %v1536_v9, %v1505_v5  ;;  %v3066_v55 = vmul.f32 %v9584_v51, %v9584_v51  ;;  %v3051_v41 = vadd.f32 %v9584_v51, %v9582_v49 }
 0x21a   :  { %v9558_v18 = vadd.f32 %v1536_v9, %v1507_v24  ;;  %v3017_v26 = vpop.f32.mrb[7].mxu1  ;;  %v9586_v52 = vadd.f32 %v3015_v44, %v1536_v9  ;;  %v1584_v53 = vadd.f32 %v1575_v36, %v1574_v43 }
 0x21b   :  { %v1576_v47 = vmul.f32 %v9556_v32, %v9556_v32  ;;  %v9588_v27 = vadd.f32 %v3017_v26, %v1536_v9  ;;  %v3075_v39 = vadd.f32 %v3066_v55, %v3065_v54 }
 0x21c   :  { %3049 = vadd.xlane.f32.xlu1 %v3048_v33  ;;  %3046 = vadd.xlane.f32.xlu0 %v3045_v50  ;;  %v1563_v42 = vadd.f32 %v9558_v18, %v9556_v32  ;;  %v1577_v48 = vmul.f32 %v9558_v18, %v9558_v18  ;;  %v3067_v28 = vmul.f32 %v9586_v52, %v9586_v52 }
 0x21d   :  { %v3068_v38 = vmul.f32 %v9588_v27, %v9588_v27  ;;  %v3054_v58 = vadd.f32 %v9588_v27, %v9586_v52 }
 0x21e   :  { %v1587_v37 = vadd.f32 %v1577_v48, %v1576_v47 }
 0x21f   :  { %v3078_v59 = vadd.f32 %v3068_v38, %v3067_v28 }
 0x220   :  { %1561 = vadd.xlane.f32.xlu0 %v1560_v22  ;;  %1564 = vadd.xlane.f32.xlu1 %v1563_v42 }
 0x224   :  { %3070 = vadd.xlane.f32.xlu0 %v3069_v35  ;;  %3073 = vadd.xlane.f32.xlu1 %v3072_v21 }
 0x228   :  { %1585 = vadd.xlane.f32.xlu0 %v1584_v53  ;;  %1588 = vadd.xlane.f32.xlu1 %v1587_v37 }
 0x22c   :  { %3052 = vadd.xlane.f32.xlu0 %v3051_v41  ;;  %3055 = vadd.xlane.f32.xlu1 %v3054_v58 }
 0x230   :  { %3076 = vadd.xlane.f32.xlu0 %v3075_v39  ;;  %3079 = vadd.xlane.f32.xlu1 %v3078_v59 }
 0x29f   :  { %v1556_v45 = vpop.xlane.xlu1 %1555 }
 0x2a1   :  { %v1580_v63 = vpop.xlane.xlu0 %1579 }
 0x2a5   :  { %v1583_v40 = vpop.xlane.xlu1 %1582  ;;  %v1559_v3 = vpop.xlane.xlu0 %1558 }
 0x2a9   :  { %v3050_v0 = vpop.xlane.xlu1 %3049  ;;  %v3047_v4 = vpop.xlane.xlu0 %3046 }
 0x2aa   :  { %v3058_v7 = vadd.f32 %v3050_v0, %v1559_v3  ;;  %v3057_v12 = vadd.f32 %v3047_v4, %v1556_v45  ;;  %v9611_v0 = vld [vmem:[%s10952_s3 + $0x8] sm:$0xff] }
 0x2ac   :  { %v3086_v14 = vmul.f32 0.001953125, %v3058_v7  ;;  %v3085_v19 = vmul.f32 0.001953125, %v3057_v12 }
 0x2ad   :  { %v1562_v17 = vpop.xlane.xlu0 %1561  ;;  %v1565_v2 = vpop.xlane.xlu1 %1564 }
 0x2ae   :  { %v3094_v24 = vmul.f32 %v3086_v14, %v3086_v14  ;;  %v3093_v44 = vmul.f32 %v3085_v19, %v3085_v19 }
 0x2b1   :  { %v3071_v23 = vpop.xlane.xlu0 %3070  ;;  %v3074_v31 = vpop.xlane.xlu1 %3073 }
 0x2b2   :  { %v3081_v9 = vadd.f32 %v3071_v23, %v1580_v63  ;;  %v3082_v5 = vadd.f32 %v3074_v31, %v1583_v40  ;;  %v9605_v40 = vld [vmem:[%s10952_s3] sm:$0xff]  ;;  %v9619_v23 = vld [vmem:[%s10952_s3 + $0x10] sm:$0xff] }
 0x2b4   :  { %v3089_v50 = vmul.f32 0.001953125, %v3081_v9  ;;  %v3090_v26 = vmul.f32 0.001953125, %v3082_v5  ;;  %v8576_v9 = vld [vmem:[%s10952_s3 + $0x18] sm:$0xff] }
 0x2b5   :  { %v1586_v33 = vpop.xlane.xlu0 %1585  ;;  %v1589_v16 = vpop.xlane.xlu1 %1588 }
 0x2b6   :  { %v3097_v34 = vsub.f32 %v3089_v50, %v3093_v44  ;;  %v3098_v15 = vsub.f32 %v3090_v26, %v3094_v24  ;;  %v8595_v24 = vmov 2  }
 0x2b8   :  { %v3101_v20 = vadd.f32 1e-05, %v3097_v34  ;;  %v3102_v22 = vadd.f32 1e-05, %v3098_v15 }
 0x2b9   :  { %v3053_v42 = vpop.xlane.xlu0 %3052  ;;  %v3056_v43 = vpop.xlane.xlu1 %3055 }
 0x2ba   :  { %8552 = vrsqrt.f32 %v3101_v20  ;;  %v3059_v35 = vadd.f32 %v3053_v42, %v1562_v17  ;;  %v3060_v36 = vadd.f32 %v3056_v43, %v1565_v2 }
 0x2bb   :  { %8554 = vrsqrt.f32 %v3102_v22  ;;  %v9630_v22 = vld [vmem:[#allocation2] sm:$0xff] }
 0x2bc   :  { %v3087_v47 = vmul.f32 0.001953125, %v3059_v35  ;;  %v3088_v48 = vmul.f32 0.001953125, %v3060_v36  ;;  %v9634_v42 = vpack.i.bf16 %v9630_v22, %v9630_v22 }
 0x2bd   :  { %v3077_v21 = vpop.xlane.xlu0 %3076  ;;  %v3080_v53 = vpop.xlane.xlu1 %3079 }
 0x2be   :  { %v3083_v37 = vadd.f32 %v3077_v21, %v1586_v33  ;;  %v3084_v54 = vadd.f32 %v3080_v53, %v1589_v16  ;;  %v3095_v55 = vmul.f32 %v3087_v47, %v3087_v47  ;;  %v3096_v28 = vmul.f32 %v3088_v48, %v3088_v48 }
 0x2c0   :  { %v3091_v38 = vmul.f32 0.001953125, %v3083_v37  ;;  %v3092_v41 = vmul.f32 0.001953125, %v3084_v54 }
 0x2c2   :  { %v3099_v58 = vsub.f32 %v3091_v38, %v3095_v55  ;;  %v3100_v39 = vsub.f32 %v3092_v41, %v3096_v28 }
 0x2c4   :  { %v8553_v59 = vpop.eup %8552  ;;  %v3103_v61 = vadd.f32 1e-05, %v3099_v58  ;;  %v3104_v45 = vadd.f32 1e-05, %v3100_v39 }
 0x2c5   :  { %v8555_v63 = vpop.eup %8554  ;;  %v3109_v3 = vmul.f32 %v9605_v40, %v8553_v59 }
 0x2c6   :  { %8556 = vrsqrt.f32 %v3103_v61  ;;  %v3110_v4 = vmul.f32 %v9611_v0, %v8555_v63 }
 0x2c7   :  { %8558 = vrsqrt.f32 %v3104_v45  ;;  %v3113_v7 = vmul.f32 %v3109_v3, %v3085_v19 }
 0x2c8   :  { %v3114_v12 = vmul.f32 %v3110_v4, %v3086_v14 }
 0x2c9   :  { %3121 = vrot.lane.b32.xlu0 %v3113_v7, %s8588_s25 }
 0x2ca   :  { %3123 = vrot.lane.b32.xlu1 %v3114_v12, %s8588_s25 }
 0x2d0   :  { %v8557_v17 = vpop.eup %8556 }
 0x2d1   :  { %v8559_v2 = vpop.eup %8558  ;;  %v3111_v31 = vmul.f32 %v9619_v23, %v8557_v17 }
 0x2d2   :  { %v3112_v5 = vmul.f32 %v8576_v9, %v8559_v2 }
 0x2d3   :  { %v3115_v19 = vmul.f32 %v3111_v31, %v3087_v47 }
 0x2d4   :  { %v3116_v14 = vmul.f32 %v3112_v5, %v3088_v48 }
 0x2d5   :  { %3125 = vrot.lane.b32.xlu1 %v3115_v19, %s8588_s25 }
 0x2d6   :  { %3127 = vrot.lane.b32.xlu0 %v3116_v14, %s8588_s25 }
 0x2d9   :  { %3147 = vperm.xlu1 %8062, %v3109_v3  }
 0x2da   :  { %3152 = vperm.xlu0 %8063, %v3110_v4  }
 0x2dd   :  { %3162 = vperm.xlu1 %8062, %v3112_v5  }
 0x2de   :  { %3157 = vperm.xlu0 %8063, %v3111_v31  }
 0x2e1   :  { %8064 = vset.pattern.permute.xlu1 %v8595_v24 }
 0x2e2   :  { %8065 = vset.pattern.permute.xlu0 %v8595_v24 }
 0x33b   :  { %v3122_v44 = vpop.permute.xlu0 %3121 }
 0x33c   :  { %v3133_v50 = vsub.f32 %v9605_v40, %v3122_v44  ;;  %v3124_v26 = vpop.permute.xlu1 %3123 }
 0x33d   :  { %v3134_v33 = vsub.f32 %v9611_v0, %v3124_v26 }
 0x33e   :  { %3175 = vperm.xlu1 %8064, %v3133_v50  }
 0x342   :  { %3180 = vperm.xlu1 %8064, %v3134_v33  }
 0x347   :  { %v3126_v16 = vpop.permute.xlu1 %3125 }
 0x348   :  { %v3128_v34 = vpop.permute.xlu0 %3127  ;;  %v3135_v15 = vsub.f32 %v9619_v23, %v3126_v16 }
 0x349   :  { %v3136_v20 = vsub.f32 %v8576_v9, %v3128_v34 }
 0x34a   :  { %3185 = vperm.xlu0 %8065, %v3135_v15  }
 0x34b   :  { %3190 = vperm.xlu1 %8064, %v3136_v20  }
 0x34e   :  { %8072 = vrot.lane.b32.xlu0 %v9634_v42, %s8585_s23 }
 0x34f   :  { %8067 = vrot.lane.b32.xlu1 %v9634_v42, %s8585_s23 }
 0x352   :  { %8082 = vrot.lane.b32.xlu0 %v9634_v42, %s8585_s23 }
 0x353   :  { %8077 = vrot.lane.b32.xlu1 %v9634_v42, %s8585_s23 }
 0x356   :  { %8092 = vrot.lane.b32.xlu0 %v9634_v42, %s8586_s22 }
 0x357   :  { %8087 = vrot.lane.b32.xlu1 %v9634_v42, %s8586_s22 }
 0x358   :  { %v3148_v43 = vpop.permute.xlu1 %3147 }
 0x359   :  { %v3153_v36 = vpop.permute.xlu0 %3152  ;;  %v3165_v47 = vmul.f32 %v3148_v43, %v9522_v56  ;;  %v3166_v48 = vmul.f32 %v3148_v43, %v9524_v60  ;;  %v4722_v21 = vmul.f32 %v3148_v43, %v9540_v30  ;;  %v4723_v53 = vmul.f32 %v3148_v43, %v9542_v13 }
 0x35a   :  { %8102 = vrot.lane.b32.xlu0 %v9634_v42, %s8586_s22  ;;  %v3167_v41 = vmul.f32 %v3153_v36, %v9532_v62  ;;  %v3168_v58 = vmul.f32 %v3153_v36, %v9534_v1  ;;  %v4724_v39 = vmul.f32 %v3153_v36, %v9544_v8  ;;  %v4725_v59 = vmul.f32 %v3153_v36, %v9546_v10 }
 0x35b   :  { %8097 = vrot.lane.b32.xlu1 %v9634_v42, %s8586_s22 }
 0x35c   :  { %v3163_v35 = vpop.permute.xlu1 %3162 }
 0x35d   :  { %v3158_v62 = vpop.permute.xlu0 %3157  ;;  %v3171_v50 = vmul.f32 %v3163_v35, %v9556_v32  ;;  %v3172_v26 = vmul.f32 %v3163_v35, %v9558_v18  ;;  %v4728_v33 = vmul.f32 %v3163_v35, %v9586_v52  ;;  %v4729_v16 = vmul.f32 %v3163_v35, %v9588_v27 }
 0x35e   :  { %8112 = vrot.lane.b32.xlu0 %v9634_v42, %s8587_s24  ;;  %v3169_v17 = vmul.f32 %v3158_v62, %v9550_v11  ;;  %v3170_v2 = vmul.f32 %v3158_v62, %v9554_v57  ;;  %v4726_v57 = vmul.f32 %v3158_v62, %v9582_v49  ;;  %v4727_v14 = vmul.f32 %v3158_v62, %v9584_v51  ;;  %v3983_v62 = vld [vmem:[#allocation2 + $0x38] sm:$0xff] }
 0x35f   :  { %8107 = vrot.lane.b32.xlu1 %v9634_v42, %s8587_s24 }
 0x3bd   :  { %v3176_v37 = vpop.permute.xlu1 %3175 }
 0x3be   :  { %v3193_v54 = vadd.f32 %v3176_v37, %v3165_v47  ;;  %v3194_v55 = vadd.f32 %v3176_v37, %v3166_v48  ;;  %v4730_v28 = vadd.f32 %v4722_v21, %v3176_v37  ;;  %v4731_v38 = vadd.f32 %v4723_v53, %v3176_v37 }
 0x3c0   :  { %v9664_v56 = vmax.f32 %v3193_v54, 0.0  ;;  %v9666_v60 = vmax.f32 %v3194_v55, 0.0  ;;  %v9668_v30 = vmax.f32 %v4730_v28, 0.0  ;;  %v9670_v13 = vmax.f32 %v4731_v38, 0.0 }
 0x3c1   :  { %v3181_v61 = vpop.permute.xlu1 %3180 }
 0x3c2   :  { %10975 = vst [vmem:[#allocation5_spill] sm:$0xff] %v9668_v30  ;;  %10976 = vst [vmem:[#allocation6_spill] sm:$0xff] %v9670_v13  ;;  %v3195_v45 = vadd.f32 %v3181_v61, %v3167_v41  ;;  %v3196_v63 = vadd.f32 %v3181_v61, %v3168_v58  ;;  %v4732_v3 = vadd.f32 %v4724_v39, %v3181_v61 }
 0x3c3   :  { %v4733_v4 = vadd.f32 %v4725_v59, %v3181_v61  ;;  %v9674_v1 = vpack.i.bf16 %v9666_v60, %v9664_v56  ;;  %v8146_v55 = vpack.i.bf16 %v9670_v13, %v9668_v30 }
 0x3c4   :  { %v9676_v8 = vmax.f32 %v3195_v45, 0.0  ;;  %v9678_v10 = vmax.f32 %v3196_v63, 0.0  ;;  %v9680_v7 = vmax.f32 %v4732_v3, 0.0 }
 0x3c5   :  { %v9682_v12 = vmax.f32 %v4733_v4, 0.0  ;;  %8117 = vrot.lane.b32.xlu1 %v9674_v1, %s8585_s23 }
 0x3c6   :  { %10977 = vst [vmem:[#allocation7_spill] sm:$0xff] %v9680_v7  ;;  %v9690_v31 = vpack.i.bf16 %v9678_v10, %v9676_v8  ;;  %v9694_v9 = vpack.i.bf16 %v9676_v8, %v9664_v56  ;;  %v9698_v5 = vpack.i.bf16 %v9680_v7, %v9668_v30 }
 0x3c7   :  { %10978 = vst [vmem:[#allocation8_spill] sm:$0xff] %v9682_v12  ;;  %v8176_v39 = vpack.i.bf16 %v9682_v12, %v9680_v7 }
 0x3c8   :  { %8132 = vrot.lane.b32.xlu0 %v9690_v31, %s8585_s23 }
 0x3c9   :  { %v3186_v49 = vpop.permute.xlu0 %3185  ;;  %8122 = vrot.lane.b32.xlu1 %v9674_v1, %s8586_s22 }
 0x3ca   :  { %v3197_v51 = vadd.f32 %v3186_v49, %v3169_v17  ;;  %v3198_v34 = vadd.f32 %v3186_v49, %v3170_v2  ;;  %v4734_v15 = vadd.f32 %v4726_v57, %v3186_v49  ;;  %v4735_v20 = vadd.f32 %v4727_v14, %v3186_v49  ;;  %v3191_v43 = vpop.permute.xlu1 %3190 }
 0x3cb   :  { %v3199_v36 = vadd.f32 %v3191_v43, %v3171_v50  ;;  %v3200_v47 = vadd.f32 %v3191_v43, %v3172_v26  ;;  %v4736_v48 = vadd.f32 %v4728_v33, %v3191_v43  ;;  %v4737_v21 = vadd.f32 %v4729_v16, %v3191_v43  ;;  %v3989_v26 = vld [vmem:[#allocation2 + $0x78] sm:$0xff] }
 0x3cc   :  { %v9718_v32 = vmax.f32 %v3197_v51, 0.0  ;;  %v9720_v18 = vmax.f32 %v3198_v34, 0.0  ;;  %v9722_v52 = vmax.f32 %v4734_v15, 0.0  ;;  %v9724_v27 = vmax.f32 %v4735_v20, 0.0  ;;  %8137 = vrot.lane.b32.xlu0 %v9690_v31, %s8586_s22 }
 0x3cd   :  { %v9728_v35 = vmax.f32 %v3199_v36, 0.0  ;;  %v9730_v53 = vmax.f32 %v3200_v47, 0.0  ;;  %v9732_v37 = vmax.f32 %v4736_v48, 0.0  ;;  %v9734_v54 = vmax.f32 %v4737_v21, 0.0  ;;  %8127 = vrot.lane.b32.xlu1 %v9674_v1, %s8587_s24  ;;  %v9835_v33 = vpop.permute.xlu0 %8072 }
 0x3ce   :  { %10979 = vst [vmem:[#allocation9_spill] sm:$0xff] %v9722_v52  ;;  %10980 = vst [vmem:[#allocation10_spill] sm:$0xff] %v9724_v27  ;;  %v8151_v45 = vpack.i.bf16 %v9720_v18, %v9718_v32  ;;  %v8206_v3 = vpack.i.bf16 %v9724_v27, %v9722_v52  ;;  %v9808_v17 = vpack.i.bf16 %v3983_v62, %v9678_v10  ;;  %v8068_v14 = vpop.permute.xlu1 %8067 }
 0x3cf   :  { %10981 = vst [vmem:[#allocation11_spill] sm:$0xff] %v9732_v37  ;;  %10982 = vst [vmem:[#allocation12_spill] sm:$0xff] %v9734_v54  ;;  %v9744_v28 = vpack.i.bf16 %v9728_v35, %v9718_v32  ;;  %v9749_v38 = vpack.i.bf16 %v9732_v37, %v9722_v52  ;;  %v8181_v63 = vpack.i.bf16 %v9730_v53, %v9728_v35 }
 0x3d0   :  { %8142 = vrot.lane.b32.xlu0 %v9690_v31, %s8587_s24  ;;  %v8226_v4 = vpack.i.bf16 %v9734_v54, %v9732_v37  ;;  %v9840_v16 = vpack.i.bf16 %v3989_v26, %v9730_v53 }
 0x3d1   :  { %8147 = vrot.lane.b32.xlu1 %v8146_v55, %s8585_s23  ;;  %v9851_v34 = vpop.permute.xlu0 %8082 }
 0x3d2   :  { %v9845_v51 = vpop.permute.xlu1 %8077 }
 0x3d4   :  { %8177 = vrot.lane.b32.xlu0 %v8176_v39, %s8585_s23 }
 0x3d5   :  { %8152 = vrot.lane.b32.xlu1 %v8151_v45, %s8585_s23  ;;  %v9861_v20 = vpop.permute.xlu0 %8092 }
 0x3d6   :  { %v9857_v15 = vpop.permute.xlu1 %8087 }
 0x3d8   :  { %8182 = vrot.lane.b32.xlu0 %v8181_v63, %s8585_s23 }
 0x3d9   :  { %8157 = vrot.lane.b32.xlu1 %v8146_v55, %s8586_s22  ;;  %v9871_v36 = vpop.permute.xlu0 %8102 }
 0x3da   :  { %v9865_v43 = vpop.permute.xlu1 %8097 }
 0x3dc   :  { %8187 = vrot.lane.b32.xlu0 %v8176_v39, %s8586_s22 }
 0x3dd   :  { %8162 = vrot.lane.b32.xlu1 %v8151_v45, %s8586_s22  ;;  %v9881_v48 = vpop.permute.xlu0 %8112 }
 0x3de   :  { %v9877_v47 = vpop.permute.xlu1 %8107 }
 0x3e0   :  { %8192 = vrot.lane.b32.xlu0 %v8181_v63, %s8586_s22 }
 0x3e1   :  { %8167 = vrot.lane.b32.xlu1 %v8146_v55, %s8587_s24 }
 0x3e4   :  { %8197 = vrot.lane.b32.xlu0 %v8176_v39, %s8587_s24 }
 0x3e5   :  { %8172 = vrot.lane.b32.xlu1 %v8151_v45, %s8587_s24 }
 0x3e8   :  { %8202 = vrot.lane.b32.xlu0 %v8181_v63, %s8587_s24 }
 0x3e9   :  { %8207 = vrot.lane.b32.xlu1 %v8206_v3, %s8585_s23 }
 0x3ec   :  { %8227 = vrot.lane.b32.xlu0 %v8226_v4, %s8585_s23 }
 0x3ed   :  { %8212 = vrot.lane.b32.xlu1 %v9634_v42, %s8587_s24 }
 0x3f0   :  { %8232 = vrot.lane.b32.xlu0 %v9634_v42, %s8587_s24 }
 0x3f1   :  { %8217 = vrot.lane.b32.xlu1 %v8206_v3, %s8586_s22 }
 0x3f4   :  { %8242 = vrot.lane.b32.xlu0 %v9690_v31, %s8588_s25  ;;  %v9818_v31 = vpack.i.bf16 %v3983_v62, %v9682_v12 }
 0x3f5   :  { %8222 = vrot.lane.b32.xlu1 %v8206_v3, %s8587_s24 }
 0x3f8   :  { %8252 = vrot.lane.b32.xlu0 %v8176_v39, %s8588_s25 }
 0x3f9   :  { %8237 = vrot.lane.b32.xlu1 %v9674_v1, %s8588_s25  ;;  %v3980_v1 = vld [vmem:[#allocation2 + $0x18] sm:$0xff] }
 0x3fa   :  { %v9811_v2 = vpack.i.bf16 %v3980_v1, %v9666_v60  ;;  %v9821_v57 = vpack.i.bf16 %v3980_v1, %v9670_v13 }
 0x3fc   :  { %8262 = vrot.lane.b32.xlu0 %v8226_v4, %s8586_s22 }
 0x3fd   :  { %8247 = vrot.lane.b32.xlu1 %v8146_v55, %s8588_s25 }
 0x400   :  { %8267 = vrot.lane.b32.xlu0 %v9634_v42, %s8588_s25 }
 0x401   :  { %8257 = vrot.lane.b32.xlu1 %v9634_v42, %s8588_s25 }
 0x404   :  { %8277 = vrot.lane.b32.xlu0 %v8181_v63, %s8588_s25  ;;  %v9890_v63 = vpack.i.bf16 %v3989_v26, %v9734_v54 }
 0x405   :  { %8272 = vrot.lane.b32.xlu1 %v8151_v45, %s8588_s25 }
 0x408   :  { %8292 = vrot.lane.b32.xlu0 %v9634_v42, %s8588_s25 }
 0x409   :  { %8282 = vrot.lane.b32.xlu1 %v8206_v3, %s8588_s25  ;;  %v8070_v3 = vunpack.i.h.bf16 %v8068_v14 }
 0x40c   :  { %8302 = vrot.lane.b32.xlu0 %v8226_v4, %s8587_s24 }
 0x40d   :  { %8287 = vrot.lane.b32.xlu1 %v9634_v42, %s8588_s25  ;;  %v3986_v42 = vld [vmem:[#allocation2 + $0x58] sm:$0xff] }
 0x40e   :  { %v9832_v50 = vpack.i.bf16 %v3986_v42, %v9720_v18  ;;  %v9843_v49 = vpack.i.bf16 %v3986_v42, %v9724_v27 }
 0x410   :  { %8307 = vrot.lane.b32.xlu0 %v9808_v17, %s8589_s26 }
 0x411   :  { %8297 = vrot.lane.b32.xlu1 %v9811_v2, %s8589_s26 }
 0x414   :  { %8317 = vrot.lane.b32.xlu0 %v9818_v31, %s8589_s26 }
 0x415   :  { %8312 = vrot.lane.b32.xlu1 %v9821_v57, %s8589_s26 }
 0x418   :  { %8327 = vrot.lane.b32.xlu0 %v9698_v5, %s8589_s26 }
 0x419   :  { %8322 = vrot.lane.b32.xlu1 %v9694_v9, %s8589_s26 }
 0x41c   :  { %8337 = vrot.lane.b32.xlu0 %v8226_v4, %s8588_s25  ;;  %v8069_v4 = vunpack.i.l.bf16 %v8068_v14 }
 0x41d   :  { %8332 = vrot.lane.b32.xlu1 %v9832_v50, %s8589_s26 }
 0x420   :  { %8342 = vrot.lane.b32.xlu0 %v9840_v16, %s8589_s26 }
 0x421   :  { %8347 = vrot.lane.b32.xlu1 %v9843_v49, %s8589_s26 }
 0x424   :  { %8362 = vrot.lane.b32.xlu0 %v9808_v17, %s8590_s27 }
 0x425   :  { %8352 = vrot.lane.b32.xlu1 %v9744_v28, %s8589_s26 }
 0x428   :  { %8372 = vrot.lane.b32.xlu0 %v9818_v31, %s8590_s27 }
 0x429   :  { %8357 = vrot.lane.b32.xlu1 %v9811_v2, %s8590_s27 }
 0x42c   :  { %8382 = vrot.lane.b32.xlu0 %v9698_v5, %s8590_s27 }
 0x42d   :  { %8367 = vrot.lane.b32.xlu1 %v9821_v57, %s8590_s27 }
 0x430   :  { %8392 = vrot.lane.b32.xlu0 %v9840_v16, %s8590_s27 }
 0x431   :  { %8377 = vrot.lane.b32.xlu1 %v9694_v9, %s8590_s27 }
 0x434   :  { %8412 = vrot.lane.b32.xlu0 %v9808_v17, %s8591_s30 }
 0x435   :  { %8387 = vrot.lane.b32.xlu1 %v9832_v50, %s8590_s27 }
 0x437   :  { %v8118_v21 = vpop.permute.xlu1 %8117 }
 0x438   :  { %8422 = vrot.lane.b32.xlu0 %v9818_v31, %s8591_s30  ;;  %v8120_v55 = vunpack.i.h.bf16 %v8118_v21  ;;  %v8119_v39 = vunpack.i.l.bf16 %v8118_v21 }
 0x439   :  { %8397 = vrot.lane.b32.xlu1 %v9843_v49, %s8590_s27 }
 0x43a   :  { %v8133_v45 = vpop.permute.xlu0 %8132  ;;  %v3322_v61 = vsel %vm190_vm1, %v8069_v4, %v8119_v39  ;;  %v3323_v59 = vsel %vm190_vm1, %v8119_v39, %v8120_v55  ;;  %v8075_v39 = vunpack.i.h.bf16 %v9835_v33 }
 0x43b   :  { %v8135_v62 = vunpack.i.h.bf16 %v8133_v45  ;;  %v8134_v1 = vunpack.i.l.bf16 %v8133_v45  ;;  %v9892_v42 = vpop.permute.xlu1 %8122 }
 0x43c   :  { %8432 = vrot.lane.b32.xlu0 %v9890_v63, %s8589_s26  ;;  %v8125_v27 = vunpack.i.h.bf16 %v9892_v42  ;;  %v8124_v54 = vunpack.i.l.bf16 %v9892_v42  ;;  %v8090_v42 = vunpack.i.h.bf16 %v9857_v15 }
 0x43d   :  { %v3324_v21 = vsel %vm190_vm1, %v8070_v3, %v8134_v1  ;;  %8402 = vrot.lane.b32.xlu1 %v9744_v28, %s8590_s27  ;;  %v3325_v26 = vsel %vm190_vm1, %v8134_v1, %v8135_v62 }
 0x43e   :  { %v8138_v44 = vpop.permute.xlu0 %8137  ;;  %v7117_v14 = vpack.c.bf16 %v3325_v26, %v3323_v59  ;;  %v7119_v24 = vpack.c.bf16 %v3324_v21, %v3322_v61  ;;  %v8074_v59 = vunpack.i.l.bf16 %v9835_v33 }
 0x43f   :  { %v9902_v45 = vpop.permute.xlu1 %8127  ;;  %v8139_v26 = vunpack.i.l.bf16 %v8138_v44 }
 0x440   :  { %8437 = vrot.lane.b32.xlu0 %v9749_v38, %s8589_s26  ;;  %7118 = vmatprep.subr.bf16.mxu0 %v7117_v14 }
 0x441   :  { %8407 = vrot.lane.b32.xlu1 %v9811_v2, %s8591_s30  ;;  %7120 = vmatpush1.bf16.msra.mxu0 %v7119_v24  ;;  %v8140_v24 = vunpack.i.h.bf16 %v8138_v44  ;;  %v8079_v44 = vunpack.i.l.bf16 %v9845_v51 }
 0x442   :  { %v9908_v3 = vpop.permute.xlu0 %8142 }
 0x443   :  { %v8148_v4 = vpop.permute.xlu1 %8147  ;;  %v3268_v7 = vsel %vm55_vm0, %v8139_v26, %v8140_v24  ;;  %v3266_v24 = vsel %vm55_vm0, %v8124_v54, %v8125_v27  ;;  %v9952_v27 = vld [vmem:[%s10953_s2 + $0x20] sm:$0xff] }
 0x444   :  { %v8149_v58 = vunpack.i.l.bf16 %v8148_v4  ;;  %8442 = vrot.lane.b32.xlu0 %v9698_v5, %s8591_s30  ;;  %v8150_v55 = vunpack.i.h.bf16 %v8148_v4 }
 0x445   :  { %8417 = vrot.lane.b32.xlu1 %v9821_v57, %s8591_s30 }
 0x446   :  { %v8178_v61 = vpop.permute.xlu0 %8177  ;;  %v4858_v14 = vsel %vm190_vm1, %v8074_v59, %v8149_v58  ;;  %v4859_v19 = vsel %vm190_vm1, %v8149_v58, %v8150_v55 }
 0x447   :  { %v8180_v62 = vunpack.i.h.bf16 %v8178_v61  ;;  %v8179_v1 = vunpack.i.l.bf16 %v8178_v61  ;;  %v8153_v21 = vpop.permute.xlu1 %8152  ;;  %v8080_v61 = vunpack.i.h.bf16 %v9845_v51 }
 0x448   :  { %v8154_v41 = vunpack.i.l.bf16 %v8153_v21  ;;  %8452 = vrot.lane.b32.xlu0 %v9840_v16, %s8591_s30  ;;  %v8155_v11 = vunpack.i.h.bf16 %v8153_v21 }
 0x449   :  { %v4860_v4 = vsel %vm190_vm1, %v8075_v39, %v8179_v1  ;;  %8427 = vrot.lane.b32.xlu1 %v9694_v9, %s8591_s30  ;;  %v4861_v33 = vsel %vm190_vm1, %v8179_v1, %v8180_v62 }
 0x44a   :  { %v8183_v52 = vpop.permute.xlu0 %8182  ;;  %v7213_v59 = vpack.c.bf16 %v4861_v33, %v4859_v19  ;;  %v7215_v37 = vpack.c.bf16 %v4860_v4, %v4858_v14  ;;  %v3326_v58 = vsel %vm190_vm1, %v8079_v44, %v8154_v41  ;;  %v3327_v19 = vsel %vm190_vm1, %v8154_v41, %v8155_v11 }
 0x44b   :  { %v8185_v39 = vunpack.i.h.bf16 %v8183_v52  ;;  %v8184_v21 = vunpack.i.l.bf16 %v8183_v52  ;;  %v9928_v30 = vpop.permute.xlu1 %8157  ;;  %v8089_v4 = vunpack.i.l.bf16 %v9857_v15  ;;  %v3267_v33 = vsel %vm55_vm0, %v8090_v42, %v8139_v26 }
 0x44c   :  { %8472 = vrot.lane.b32.xlu0 %v9890_v63, %s8590_s27  ;;  %7214 = vmatprep.subr.bf16.mxu1 %v7213_v59  ;;  %v7125_v11 = vpack.c.bf16 %v3268_v7, %v3266_v24  ;;  %v8099_v41 = vunpack.i.l.bf16 %v9865_v43  ;;  %v8145_v26 = vunpack.i.h.bf16 %v9908_v3  ;;  %v8144_v44 = vunpack.i.l.bf16 %v9908_v3 }
 0x44d   :  { %v3328_v51 = vsel %vm190_vm1, %v8080_v61, %v8184_v21  ;;  %8447 = vrot.lane.b32.xlu1 %v9832_v50, %s8591_s30  ;;  %7216 = vmatpush1.bf16.msra.mxu1 %v7215_v37  ;;  %v3329_v52 = vsel %vm190_vm1, %v8184_v21, %v8185_v39  ;;  %v3265_v15 = vsel %vm55_vm0, %v8089_v4, %v8124_v54  ;;  %v8100_v7 = vunpack.i.h.bf16 %v9865_v43 }
 0x44e   :  { %v9940_v55 = vpop.permute.xlu0 %8187  ;;  %v7121_v62 = vpack.c.bf16 %v3329_v52, %v3327_v19  ;;  %v7123_v1 = vpack.c.bf16 %v3328_v51, %v3326_v58  ;;  %v7128_v39 = vpack.c.bf16 %v3267_v33, %v3265_v15  ;;  %v8130_v19 = vunpack.i.h.bf16 %v9902_v45 }
 0x44f   :  { %v8163_v14 = vpop.permute.xlu1 %8162  ;;  %v8129_v52 = vunpack.i.l.bf16 %v9902_v45 }
 0x450   :  { %v8164_v61 = vunpack.i.l.bf16 %v8163_v14  ;;  %8477 = vrot.lane.b32.xlu0 %v9749_v38, %s8590_s27  ;;  %7122 = vmatprep.subr.bf16.mxu0 %v7121_v62  ;;  %v8165_v37 = vunpack.i.h.bf16 %v8163_v14  ;;  %v9980_v62 = vld [vmem:[%s10953_s2 + $0x28] sm:$0xff] }
 0x451   :  { %8457 = vrot.lane.b32.xlu1 %v9843_v49, %s8591_s30  ;;  %7124 = vmatpush1.bf16.msra.mxu0 %v7123_v1  ;;  %v3565_v33 = vsel %vm434_vm7, %v8129_v52, %v8130_v19 }
 0x452   :  { %v8193_v59 = vpop.permute.xlu0 %8192  ;;  %7127 = vmatprep.subr.msk.bf16.mxu0 %vm8920_vm4, %v7125_v11  ;;  %v3269_v54 = vsel %vm55_vm0, %v8099_v41, %v8164_v61  ;;  %v3270_v3 = vsel %vm55_vm0, %v8164_v61, %v8165_v37  ;;  %v10000_v11 = vld [vmem:[%s10953_s2 + $0x30] sm:$0xff] }
 0x453   :  { %v8195_v21 = vunpack.i.h.bf16 %v8193_v59  ;;  %v8194_v58 = vunpack.i.l.bf16 %v8193_v59  ;;  %v9961_v51 = vpop.permute.xlu1 %8167  ;;  %v8084_v59 = vunpack.i.l.bf16 %v9851_v34 }
 0x454   :  { %8482 = vrot.lane.b32.xlu0 %v9808_v17, %s8592_s13  ;;  %6681 = vmatmul.mubr.msk.f32.vlgmr.msra.gmra.mrb[8].mxu0 %vm207_vm3, %v9952_v27  ;;  %v3567_v17 = vsel %vm434_vm7, %v8144_v44, %v8145_v26  ;;  %v8085_v26 = vunpack.i.h.bf16 %v9851_v34  ;;  %v8189_v34 = vunpack.i.l.bf16 %v9940_v55 }
 0x455   :  { %v3271_v43 = vsel %vm55_vm0, %v8100_v7, %v8194_v58  ;;  %v3272_v42 = vsel %vm55_vm0, %v8194_v58, %v8195_v21  ;;  %8462 = vrot.lane.b32.xlu1 %v9744_v28, %s8591_s30  ;;  %7130 = vmatpush1.bf16.msk.msra.mxu0 %vm8963_vm6, %v7128_v39  ;;  %v7137_v61 = vpack.c.bf16 %v3567_v17, %v3565_v33  ;;  %v10020_v21 = vld [vmem:[%s10953_s2 + $0x38] sm:$0xff]  ;;  %v8109_v58 = vunpack.i.l.bf16 %v9877_v47 }
 0x456   :  { %v7134_v1 = vpack.c.bf16 %v3271_v43, %v3269_v54  ;;  %v9983_v24 = vpop.permute.xlu0 %8197  ;;  %3420 = vmatprep.mubr.f32.mxu0 %v9630_v22  ;;  %v7131_v14 = vpack.c.bf16 %v3272_v42, %v3270_v3  ;;  %v8190_v54 = vunpack.i.h.bf16 %v9940_v55 }
 0x457   :  { %v8173_v4 = vpop.permute.xlu1 %8172 }
 0x458   :  { %8492 = vrot.lane.b32.xlu0 %v9818_v31, %s8592_s13  ;;  %6682 = vmatmul.mubr.msk.f32.gmra.mrb[10].mxu0 %vm207_vm3, %v9980_v62  ;;  %v8175_v43 = vunpack.i.h.bf16 %v8173_v4  ;;  %v8174_v42 = vunpack.i.l.bf16 %v8173_v4 }
 0x459   :  { %8467 = vrot.lane.b32.xlu1 %v9811_v2, %s8592_s13  ;;  %7133 = vmatprep.subr.msk.bf16.mxu0 %vm8920_vm4, %v7131_v14  ;;  %v8110_v2 = vunpack.i.h.bf16 %v9877_v47  ;;  %v8160_v14 = vunpack.i.h.bf16 %v9928_v30  ;;  %v8159_v47 = vunpack.i.l.bf16 %v9928_v30  ;;  %v3564_v30 = vsel %vm434_vm7, %v8109_v58, %v8129_v52 }
 0x45a   :  { %7136 = vmatpush1.bf16.msk.msra.mxu0 %vm8963_vm6, %v7134_v1  ;;  %v8203_v37 = vpop.permute.xlu0 %8202  ;;  %3426 = vmatprep.mubr.f32.mxu0 %v9630_v22 }
 0x45b   :  { %v8208_v31 = vpop.permute.xlu1 %8207  ;;  %7139 = vmatprep.subr.msk.bf16.mxu0 %vm9024_vm9, %v7137_v61  ;;  %v8205_v41 = vunpack.i.h.bf16 %v8203_v37  ;;  %v8204_v15 = vunpack.i.l.bf16 %v8203_v37  ;;  %v3566_v19 = vsel %vm434_vm7, %v8110_v2, %v8144_v44  ;;  %v10040_v44 = vld [vmem:[%s10953_s2] sm:$0xff] }
 0x45c   :  { %8502 = vrot.lane.b32.xlu0 %v9890_v63, %s8591_s30  ;;  %6683 = vmatmul.mubr.msk.f32.gmra.mrb[12].mxu0 %vm207_vm3, %v10000_v11  ;;  %v8210_v7 = vunpack.i.h.bf16 %v8208_v31  ;;  %v8209_v39 = vunpack.i.l.bf16 %v8208_v31 }
 0x45d   :  { %8487 = vrot.lane.b32.xlu1 %v9821_v57, %s8592_s13  ;;  %3432 = vmatprep.mubr.f32.mxu0 %v9630_v22  ;;  %v3571_v33 = vsel %vm434_vm7, %v8204_v15, %v8205_v41 }
 0x45e   :  { %v8228_v3 = vpop.permute.xlu0 %8227  ;;  %v4863_v4 = vsel %vm190_vm1, %v8209_v39, %v8210_v7  ;;  %v4862_v2 = vsel %vm190_vm1, %v8084_v59, %v8209_v39  ;;  %v8095_v7 = vunpack.i.h.bf16 %v9861_v20  ;;  %v4803_v59 = vsel %vm55_vm0, %v8159_v47, %v8160_v14 }
 0x45f   :  { %v8230_v17 = vunpack.i.h.bf16 %v8228_v3  ;;  %v8229_v57 = vunpack.i.l.bf16 %v8228_v3  ;;  %v8213_v1 = vpop.permute.xlu1 %8212  ;;  %v4805_v3 = vsel %vm55_vm0, %v8189_v34, %v8190_v54  ;;  %v8094_v39 = vunpack.i.l.bf16 %v9861_v20 }
 0x460   :  { %v8215_v61 = vunpack.i.h.bf16 %v8213_v1  ;;  %v8214_v37 = vunpack.i.l.bf16 %v8213_v1  ;;  %8507 = vrot.lane.b32.xlu0 %v9749_v38, %s8591_s30  ;;  %6684 = vmatmul.mubr.msk.f32.gmra.mrb[14].mxu0 %vm207_vm3, %v10020_v21  ;;  %v3569_v1 = vsel %vm434_vm7, %v8174_v42, %v8175_v43  ;;  %v7221_v58 = vpack.c.bf16 %v4805_v3, %v4803_v59 }
 0x461   :  { %v4864_v55 = vsel %vm190_vm1, %v8085_v26, %v8229_v57  ;;  %8497 = vrot.lane.b32.xlu1 %v9694_v9, %s8592_s13  ;;  %3515 = vmatprep.mubr.f32.mxu0 %v9630_v22  ;;  %v4865_v31 = vsel %vm190_vm1, %v8229_v57, %v8230_v17  ;;  %v7140_v26 = vpack.c.bf16 %v3566_v19, %v3564_v30  ;;  %v8200_v57 = vunpack.i.h.bf16 %v9983_v24 }
 0x462   :  { %v10048_v41 = vpop.permute.xlu0 %8232  ;;  %v7217_v9 = vpack.c.bf16 %v4865_v31, %v4863_v4  ;;  %v7219_v13 = vpack.c.bf16 %v4864_v55, %v4862_v2  ;;  %v7143_v17 = vpack.c.bf16 %v3571_v33, %v3569_v1  ;;  %v3570_v45 = vsel %vm434_vm7, %v8215_v61, %v8204_v15 }
 0x463   :  { %v10052_v12 = vpop.permute.xlu1 %8217  ;;  %v3568_v52 = vsel %vm434_vm7, %v8214_v37, %v8174_v42  ;;  %v4804_v15 = vsel %vm55_vm0, %v8095_v7, %v8189_v34  ;;  %v4802_v20 = vsel %vm55_vm0, %v8094_v39, %v8159_v47  ;;  %v8105_v61 = vunpack.i.h.bf16 %v9871_v36 }
 0x464   :  { %8512 = vrot.lane.b32.xlu0 %v9698_v5, %s8592_s13  ;;  %6693 = vmatmul.mubr.msk.f32.vlgmr.msra.gmra.mrb[8].mxu0 %vm207_vm3, %v10040_v44  ;;  %v7146_v19 = vpack.c.bf16 %v3570_v45, %v3568_v52  ;;  %v7224_v34 = vpack.c.bf16 %v4804_v15, %v4802_v20  ;;  %v8220_v37 = vunpack.i.h.bf16 %v10052_v12  ;;  %v8219_v47 = vunpack.i.l.bf16 %v10052_v12 }
 0x465   :  { %8517 = vrot.lane.b32.xlu1 %v9832_v50, %s8592_s13  ;;  %7142 = vmatpush1.bf16.msk.msra.mxu0 %vm9066_vm11, %v7140_v26  ;;  %v10078_v50 = vld [vmem:[%s10953_s2 + $0x8] sm:$0xff]  ;;  %v8104_v55 = vunpack.i.l.bf16 %v9871_v36  ;;  %v8169_v12 = vunpack.i.l.bf16 %v9961_v51  ;;  %v10131_v36 = vld [vmem:[%s10953_s2 + $0x18] sm:$0xff]  ;;  %v8115_v59 = vunpack.i.h.bf16 %v9881_v48 }
 0x466   :  { %7218 = vmatprep.subr.bf16.mxu1 %v7217_v9  ;;  %7145 = vmatprep.subr.msk.bf16.mxu0 %vm9024_vm9, %v7143_v17  ;;  %v10070_v5 = vpop.permute.xlu0 %8242  ;;  %v4807_v26 = vsel %vm55_vm0, %v8219_v47, %v8220_v37 }
 0x467   :  { %7220 = vmatpush1.bf16.msra.mxu1 %v7219_v13  ;;  %v10072_v54 = vpop.permute.xlu1 %8222  ;;  %3521 = vmatprep.mubr.f32.mxu0 %v9630_v22  ;;  %v8245_v13 = vunpack.i.h.bf16 %v10070_v5  ;;  %v8244_v43 = vunpack.i.l.bf16 %v10070_v5  ;;  %v10157_v5 = vld [vmem:[%s10953_s2 + $0x40] sm:$0xff] }
 0x468   :  { %7223 = vmatprep.subr.msk.bf16.mxu1 %vm8920_vm4, %v7221_v58  ;;  %8522 = vrot.lane.b32.xlu0 %v9840_v16, %s8592_s13  ;;  %v8114_v58 = vunpack.i.l.bf16 %v9881_v48 }
 0x469   :  { %8527 = vrot.lane.b32.xlu1 %v9843_v49, %s8592_s13  ;;  %7148 = vmatpush1.bf16.msk.msra.mxu0 %vm9066_vm11, %v7146_v19  ;;  %v10103_v49 = vld [vmem:[%s10953_s2 + $0x10] sm:$0xff]  ;;  %v3729_v4 = vsel %vm597_vm12, %v8244_v43, %v8245_v13 }
 0x46a   :  { %6797 = vmatmul.mubr.msk.f32.vlgmr.msra.gmra.mrb[8].mxu1 %vm207_vm3, %v9952_v27  ;;  %v10093_v42 = vpop.permute.xlu0 %8252  ;;  %6694 = vmatmul.mubr.msk.f32.gmra.mrb[10].mxu0 %vm207_vm3, %v10078_v50  ;;  %v8199_v27 = vunpack.i.l.bf16 %v9983_v24  ;;  %v8170_v24 = vunpack.i.h.bf16 %v9961_v51  ;;  %v4806_v51 = vsel %vm55_vm0, %v8104_v55, %v8219_v47  ;;  %v8234_v55 = vunpack.i.l.bf16 %v10048_v41 }
 0x46b   :  { %7226 = vmatpush1.bf16.msk.msra.mxu1 %vm8963_vm6, %v7224_v34  ;;  %v8238_v16 = vpop.permute.xlu1 %8237  ;;  %4956 = vmatprep.mubr.f32.mxu1 %v9630_v22 }
 0x46c   :  { %v8240_v14 = vunpack.i.h.bf16 %v8238_v16  ;;  %v8239_v33 = vunpack.i.l.bf16 %v8238_v16  ;;  %8537 = vrot.lane.b32.xlu0 %v9890_v63, %s8592_s13  ;;  %3527 = vmatprep.mubr.f32.mxu0 %v9630_v22  ;;  %v5102_v19 = vsel %vm434_vm7, %v8115_v59, %v8199_v27 }
 0x46d   :  { %8532 = vrot.lane.b32.xlu1 %v9744_v28, %s8592_s13 }
 0x46e   :  { %v3727_v31 = vsel %vm597_vm12, %v8239_v33, %v8240_v14  ;;  %6798 = vmatmul.mubr.msk.f32.gmra.mrb[10].mxu1 %vm207_vm3, %v9980_v62  ;;  %v8263_v63 = vpop.permute.xlu0 %8262  ;;  %6695 = vmatmul.mubr.msk.f32.gmra.mrb[12].mxu0 %vm207_vm3, %v10103_v49  ;;  %v5103_v62 = vsel %vm434_vm7, %v8199_v27, %v8200_v57 }
 0x46f   :  { %v7149_v30 = vpack.c.bf16 %v3729_v4, %v3727_v31  ;;  %v8265_v2 = vunpack.i.h.bf16 %v8263_v63  ;;  %v8264_v28 = vunpack.i.l.bf16 %v8263_v63  ;;  %v10124_v9 = vpop.permute.xlu1 %8247  ;;  %4962 = vmatprep.mubr.f32.mxu1 %v9630_v22  ;;  %3533 = vmatprep.mubr.f32.mxu0 %v9630_v22 }
 0x470   :  { %8542 = vrot.lane.b32.xlu0 %v9749_v38, %s8592_s13  ;;  %v5101_v38 = vsel %vm434_vm7, %v8169_v12, %v8170_v24  ;;  %v8224_v24 = vunpack.i.l.bf16 %v10072_v54 }
 0x471   :  { %v4808_v3 = vsel %vm55_vm0, %v8105_v61, %v8264_v28  ;;  %v4809_v1 = vsel %vm55_vm0, %v8264_v28, %v8265_v2  ;;  %7151 = vmatprep.subr.msk.bf16.mxu0 %vm8920_vm4, %v7149_v30  ;;  %v8596_v61 = vmov 3   ;;  %v8250_v30 = vunpack.i.h.bf16 %v10124_v9 }
 0x472   :  { %v7227_v7 = vpack.c.bf16 %v4809_v1, %v4807_v26  ;;  %v7230_v17 = vpack.c.bf16 %v4808_v3, %v4806_v51  ;;  %6799 = vmatmul.mubr.msk.f32.gmra.mrb[12].mxu1 %vm207_vm3, %v10000_v11  ;;  %v10144_v45 = vpop.permute.xlu0 %8267  ;;  %6696 = vmatmul.mubr.msk.f32.gmra.mrb[14].mxu0 %vm207_vm3, %v10131_v36  ;;  %v7233_v11 = vpack.c.bf16 %v5103_v62, %v5101_v38  ;;  %v8249_v2 = vunpack.i.l.bf16 %v10124_v9 }
 0x473   :  { %v8258_v52 = vpop.permute.xlu1 %8257  ;;  %4968 = vmatprep.mubr.f32.mxu1 %v9630_v22  ;;  %3669 = vmatprep.mubr.f32.mxu0 %v9630_v22  ;;  %v5104_v28 = vsel %vm434_vm7, %v8234_v55, %v8224_v24  ;;  %v8255_v62 = vunpack.i.h.bf16 %v10093_v42  ;;  %v8254_v51 = vunpack.i.l.bf16 %v10093_v42  ;;  %v8270_v42 = vunpack.i.h.bf16 %v10144_v45  ;;  %v10297_v55 = vld [vmem:[%s10953_s2 + $0x68] sm:$0xff] }
 0x474   :  { %v8260_v39 = vunpack.i.h.bf16 %v8258_v52  ;;  %v8259_v15 = vunpack.i.l.bf16 %v8258_v52  ;;  %7229 = vmatprep.subr.msk.bf16.mxu1 %vm8920_vm4, %v7227_v7  ;;  %8546 = vset.pattern.permute.xlu1 %v8596_v61 }
 0x475   :  { %7232 = vmatpush1.bf16.msk.msra.mxu1 %vm8963_vm6, %v7230_v17  ;;  %4643 = vperm.xlu1 %8546, %v9605_v40   ;;  %v8225_v40 = vunpack.i.h.bf16 %v10072_v54  ;;  %v8235_v54 = vunpack.i.h.bf16 %v10048_v41  ;;  %v5262_v41 = vsel %vm597_vm12, %v8249_v2, %v8250_v30  ;;  %v8269_v17 = vunpack.i.l.bf16 %v10144_v45 }
 0x476   :  { %v3728_v20 = vsel %vm597_vm12, %v8260_v39, %v8244_v43  ;;  %v3726_v34 = vsel %vm597_vm12, %v8259_v15, %v8239_v33  ;;  %6800 = vmatmul.mubr.msk.f32.gmra.mrb[14].mxu1 %vm207_vm3, %v10020_v21  ;;  %v10167_v13 = vpop.permute.xlu0 %8277  ;;  %7235 = vmatprep.subr.msk.bf16.mxu1 %vm9024_vm9, %v7233_v11  ;;  %v5100_v43 = vsel %vm434_vm7, %v8114_v58, %v8169_v12  ;;  %v10181_v33 = vld [vmem:[%s10953_s2 + $0x48] sm:$0xff] }
 0x477   :  { %v7152_v16 = vpack.c.bf16 %v3728_v20, %v3726_v34  ;;  %v8280_v57 = vunpack.i.h.bf16 %v10167_v13  ;;  %v8279_v14 = vunpack.i.l.bf16 %v10167_v13  ;;  %v8273_v48 = vpop.permute.xlu1 %8272  ;;  %6709 = vmatmul.mubr.msk.f32.vlgmr.msra.gmra.mrb[8].mxu0 %vm207_vm3, %v10157_v5  ;;  %5051 = vmatprep.mubr.f32.mxu1 %v9630_v22  ;;  %v7236_v37 = vpack.c.bf16 %v5102_v19, %v5100_v43 }
 0x478   :  { %v8275_v27 = vunpack.i.h.bf16 %v8273_v48  ;;  %v8274_v21 = vunpack.i.l.bf16 %v8273_v48  ;;  %3675 = vmatprep.mubr.f32.mxu0 %v9630_v22  ;;  %8547 = vset.pattern.permute.xlu0 %v8596_v61  ;;  %v5264_v19 = vsel %vm597_vm12, %v8254_v51, %v8255_v62  ;;  %v5263_v48 = vsel %vm597_vm12, %v8270_v42, %v8254_v51  ;;  %v10276_v61 = vld [vmem:[#allocation2] sm:$0xff] }
 0x479   :  { %v3733_v47 = vsel %vm597_vm12, %v8279_v14, %v8280_v57  ;;  %7154 = vmatpush1.bf16.msk.msra.mxu0 %vm8963_vm6, %v7152_v16  ;;  %4647 = vperm.xlu0 %8547, %v9611_v0   ;;  %v5105_v0 = vsel %vm434_vm7, %v8224_v24, %v8225_v40  ;;  %v7245_v45 = vpack.c.bf16 %v5264_v19, %v5262_v41  ;;  %v10988_v19 = vld [vmem:[#allocation6_spill] sm:$0xff] }
 0x47a   :  { %v3731_v4 = vsel %vm597_vm12, %v8274_v21, %v8275_v27  ;;  %6809 = vmatmul.mubr.msk.f32.vlgmr.msra.gmra.mrb[8].mxu1 %vm207_vm3, %v10040_v44  ;;  %v10192_v31 = vpop.permute.xlu0 %8292  ;;  %v10208_v44 = vld [vmem:[%s10953_s2 + $0x50] sm:$0xff]  ;;  %4651 = vperm.xlu1 %8546, %v9619_v23   ;;  %v10229_v23 = vld [vmem:[%s10953_s2 + $0x58] sm:$0xff]  ;;  %v10983_v43 = vpack.c.bf16 %v9678_v10, %v9666_v60  ;;  %v10985_v24 = vpack.c.bf16 %v9730_v53, %v9720_v18 }
 0x47b   :  { %v7155_v63 = vpack.c.bf16 %v3733_v47, %v3731_v4  ;;  %7238 = vmatpush1.bf16.msk.msra.mxu1 %vm9066_vm11, %v7236_v37  ;;  %v10196_v12 = vpop.permute.xlu1 %8282  ;;  %6710 = vmatmul.mubr.msk.f32.gmra.mrb[10].mxu0 %vm207_vm3, %v10181_v33  ;;  %v10984_v47 = vpack.c.bf16 %v9676_v8, %v9664_v56  ;;  %v8294_v8 = vunpack.i.l.bf16 %v10192_v31  ;;  %v10986_v18 = vpack.c.bf16 %v9728_v35, %v9718_v32  ;;  %v10321_v53 = vld [vmem:[%s10953_s2 + $0x70] sm:$0xff] }
 0x47c   :  { %5057 = vmatprep.mubr.f32.mxu1 %v9630_v22  ;;  %3681 = vmatprep.mubr.f32.mxu0 %v9630_v22  ;;  %v8284_v40 = vunpack.i.l.bf16 %v10196_v12 }
 0x47d   :  { %7157 = vmatprep.subr.msk.bf16.mxu0 %vm8920_vm4, %v7155_v63  ;;  %v8285_v63 = vunpack.i.h.bf16 %v10196_v12  ;;  %v8295_v12 = vunpack.i.h.bf16 %v10192_v31 }
 0x47e   :  { %6810 = vmatmul.mubr.msk.f32.gmra.mrb[10].mxu1 %vm207_vm3, %v10078_v50  ;;  %v8303_v9 = vpop.permute.xlu0 %8302  ;;  %v5265_v35 = vsel %vm597_vm12, %v8294_v8, %v8284_v40 }
 0x47f   :  { %v8305_v26 = vunpack.i.h.bf16 %v8303_v9  ;;  %v8304_v3 = vunpack.i.l.bf16 %v8303_v9  ;;  %v8288_v1 = vpop.permute.xlu1 %8287  ;;  %6711 = vmatmul.mubr.msk.f32.gmra.mrb[12].mxu0 %vm207_vm3, %v10208_v44  ;;  %5063 = vmatprep.mubr.f32.mxu1 %v9630_v22 }
 0x480   :  { %v8290_v50 = vunpack.i.h.bf16 %v8288_v1  ;;  %v8289_v7 = vunpack.i.l.bf16 %v8288_v1  ;;  %3687 = vmatprep.mubr.f32.mxu0 %v9630_v22 }
 0x481   :  { %v5106_v38 = vsel %vm434_vm7, %v8235_v54, %v8304_v3  ;;  %v5107_v52 = vsel %vm434_vm7, %v8304_v3, %v8305_v26  ;;  %v10339_v3 = vld [vmem:[%s10953_s2 + $0x78] sm:$0xff] }
 0x482   :  { %v7239_v59 = vpack.c.bf16 %v5107_v52, %v5105_v0  ;;  %v7242_v39 = vpack.c.bf16 %v5106_v38, %v5104_v28  ;;  %v3732_v15 = vsel %vm597_vm12, %v8290_v50, %v8279_v14  ;;  %v3730_v11 = vsel %vm597_vm12, %v8289_v7, %v8274_v21  ;;  %6811 = vmatmul.mubr.msk.f32.gmra.mrb[12].mxu1 %vm207_vm3, %v10103_v49  ;;  %v10239_v58 = vpop.permute.xlu0 %8307  ;;  %v10261_v14 = vld [vmem:[%s10953_s2 + $0x60] sm:$0xff] }
 0x483   :  { %v7158_v20 = vpack.c.bf16 %v3732_v15, %v3730_v11  ;;  %v10242_v34 = vpop.permute.xlu1 %8297  ;;  %6712 = vmatmul.mubr.msk.f32.gmra.mrb[14].mxu0 %vm207_vm3, %v10229_v23  ;;  %5069 = vmatprep.mubr.f32.mxu1 %v9630_v22  ;;  %v8310_v49 = vunpack.i.h.bf16 %v10239_v58  ;;  %v8309_v13 = vunpack.i.l.bf16 %v10239_v58  ;;  %v5266_v28 = vsel %vm597_vm12, %v8284_v40, %v8285_v63  ;;  %v10987_v58 = vld [vmem:[#allocation8_spill] sm:$0xff] }
 0x484   :  { %7241 = vmatprep.subr.msk.bf16.mxu1 %vm9024_vm9, %v7239_v59  ;;  %3831 = vmatprep.mubr.f32.mxu0 %v9630_v22  ;;  %v8300_v16 = vunpack.i.h.bf16 %v10242_v34  ;;  %v8299_v57 = vunpack.i.l.bf16 %v10242_v34  ;;  %v5261_v22 = vsel %vm597_vm12, %v8269_v17, %v8249_v2  ;;  %v10364_v59 = vld [vmem:[%s10953_s2 + $0x80] sm:$0xff] }
 0x485   :  { %7160 = vmatpush1.bf16.msk.msra.mxu0 %vm8963_vm6, %v7158_v20  ;;  %7244 = vmatpush1.bf16.msk.msra.mxu1 %vm9066_vm11, %v7242_v39  ;;  %v7248_v60 = vpack.c.bf16 %v5263_v48, %v5261_v22  ;;  %v4029_v10 = vsel %vm898_vm13, %v8309_v13, %v8310_v49  ;;  %v10989_v20 = vpack.c.bf16 %v10987_v58, %v10988_v19 }
 0x486   :  { %6812 = vmatmul.mubr.msk.f32.gmra.mrb[14].mxu1 %vm207_vm3, %v10131_v36  ;;  %7162 = vmatprep.subr.bf16.mxu0 %v10983_v43  ;;  %v10270_v27 = vpop.permute.xlu0 %8317  ;;  %v8579_v36 = vld [vmem:[%s10952_s3 + $0x18] sm:$0xff]  ;;  %v4027_v37 = vsel %vm898_vm13, %v8299_v57, %v8300_v16 }
 0x487   :  { %v10272_v21 = vpop.permute.xlu1 %8312  ;;  %7247 = vmatprep.subr.msk.bf16.mxu1 %vm8920_vm4, %v7245_v45  ;;  %5204 = vmatprep.mubr.f32.mxu1 %v10276_v61  ;;  %v7169_v30 = vpack.c.bf16 %v4029_v10, %v4027_v37  ;;  %v8320_v39 = vunpack.i.h.bf16 %v10270_v27  ;;  %v8319_v34 = vunpack.i.l.bf16 %v10270_v27 }
 0x488   :  { %6725 = vmatmul.mubr.msk.f32.vlgmr.msra.gmra.mrb[8].mxu0 %vm207_vm3, %v10261_v14  ;;  %4655 = vperm.xlu1 %8546, %v8579_v36   ;;  %v8315_v45 = vunpack.i.h.bf16 %v10272_v21  ;;  %v8314_v49 = vunpack.i.l.bf16 %v10272_v21 }
 0x489   :  { %7164 = vmatpush1.bf16.msra.mxu0 %v10984_v47  ;;  %3837 = vmatprep.mubr.f32.mxu0 %v10276_v61  ;;  %v10990_v47 = vld [vmem:[#allocation7_spill] sm:$0xff] }
 0x48a   :  { %6825 = vmatmul.mubr.msk.f32.vlgmr.msra.gmra.mrb[8].mxu1 %vm207_vm3, %v10157_v5  ;;  %7166 = vmatprep.subr.bf16.mxu0 %v10985_v24  ;;  %v10304_v4 = vpop.permute.xlu0 %8327  ;;  %v5560_v10 = vsel %vm898_vm13, %v8314_v49, %v8315_v45  ;;  %v10991_v24 = vld [vmem:[#allocation5_spill] sm:$0xff] }
 0x48b   :  { %7250 = vmatpush1.bf16.msk.msra.mxu1 %vm8963_vm6, %v7248_v60  ;;  %v8323_v56 = vpop.permute.xlu1 %8322  ;;  %5210 = vmatprep.mubr.f32.mxu1 %v10276_v61  ;;  %v5562_v60 = vsel %vm898_vm13, %v8319_v34, %v8320_v39 }
 0x48c   :  { %6726 = vmatmul.mubr.msk.f32.gmra.mrb[10].mxu0 %vm207_vm3, %v10297_v55  ;;  %v8325_v9 = vunpack.i.h.bf16 %v8323_v56  ;;  %v8324_v62 = vunpack.i.l.bf16 %v8323_v56  ;;  %v10992_v56 = vpack.c.bf16 %v10990_v47, %v10991_v24 }
 0x48d   :  { %7168 = vmatpush1.bf16.msra.mxu0 %v10986_v18  ;;  %3843 = vmatprep.mubr.f32.mxu0 %v10276_v61  ;;  %v10994_v18 = vld [vmem:[#allocation10_spill] sm:$0xff] }
 0x48e   :  { %6826 = vmatmul.mubr.msk.f32.gmra.mrb[10].mxu1 %vm207_vm3, %v10181_v33  ;;  %7171 = vmatprep.subr.msk.bf16.mxu0 %vm9024_vm9, %v7169_v30  ;;  %v8338_v5 = vpop.permute.xlu0 %8337  ;;  %v4028_v17 = vsel %vm898_vm13, %v8325_v9, %v8309_v13  ;;  %v4026_v38 = vsel %vm898_vm13, %v8324_v62, %v8299_v57  ;;  %v10993_v30 = vld [vmem:[#allocation12_spill] sm:$0xff]  ;;  %v10997_v9 = vld [vmem:[#allocation9_spill] sm:$0xff] }
 0x48f   :  { %v8340_v2 = vunpack.i.h.bf16 %v8338_v5  ;;  %v8339_v54 = vunpack.i.l.bf16 %v8338_v5  ;;  %v8333_v32 = vpop.permute.xlu1 %8332  ;;  %5216 = vmatprep.mubr.f32.mxu1 %v10276_v61  ;;  %v7172_v13 = vpack.c.bf16 %v4028_v17, %v4026_v38  ;;  %v10995_v5 = vpack.c.bf16 %v10993_v30, %v10994_v18 }
 0x490   :  { %6727 = vmatmul.mubr.msk.f32.gmra.mrb[12].mxu0 %vm207_vm3, %v10321_v53  ;;  %v8335_v26 = vunpack.i.h.bf16 %v8333_v32  ;;  %v8334_v31 = vunpack.i.l.bf16 %v8333_v32 }
 0x491   :  { %v5267_v33 = vsel %vm597_vm12, %v8295_v12, %v8339_v54  ;;  %v5268_v51 = vsel %vm597_vm12, %v8339_v54, %v8340_v2  ;;  %3849 = vmatprep.mubr.f32.mxu0 %v10276_v61  ;;  %v7265_v12 = vpack.c.bf16 %v5562_v60, %v5560_v10 }
 0x492   :  { %v7251_v1 = vpack.c.bf16 %v5268_v51, %v5266_v28  ;;  %v7254_v0 = vpack.c.bf16 %v5267_v33, %v5265_v35  ;;  %6827 = vmatmul.mubr.msk.f32.gmra.mrb[12].mxu1 %vm207_vm3, %v10208_v44  ;;  %v8343_v41 = vpop.permute.xlu0 %8342  ;;  %v4031_v44 = vsel %vm898_vm13, %v8334_v31, %v8335_v26  ;;  %v10996_v28 = vld [vmem:[#allocation11_spill] sm:$0xff]  ;;  %v8330_v51 = vunpack.i.h.bf16 %v10304_v4  ;;  %v10441_v26 = vld [vmem:[%s10953_s2 + $0x98] sm:$0xff] }
 0x493   :  { %v8345_v50 = vunpack.i.h.bf16 %v8343_v41  ;;  %v8344_v7 = vunpack.i.l.bf16 %v8343_v41  ;;  %v10343_v42 = vpop.permute.xlu1 %8347  ;;  %5222 = vmatprep.mubr.f32.mxu1 %v10276_v61  ;;  %v10998_v62 = vpack.c.bf16 %v10996_v28, %v10997_v9 }
 0x494   :  { %6728 = vmatmul.mubr.msk.f32.gmra.mrb[14].mxu0 %vm207_vm3, %v10339_v3  ;;  %7253 = vmatprep.subr.msk.bf16.mxu1 %vm8920_vm4, %v7251_v1 }
 0x495   :  { %v4033_v52 = vsel %vm898_vm13, %v8344_v7, %v8345_v50  ;;  %7256 = vmatpush1.bf16.msk.msra.mxu1 %vm8963_vm6, %v7254_v0  ;;  %3945 = vmatprep.mubr.f32.mxu0 %v10276_v61  ;;  %v5561_v50 = vsel %vm898_vm13, %v8330_v51, %v8319_v34  ;;  %v10539_v51 = vld [vmem:[%s10953_s2 + $0xc0] sm:$0xff] }
 0x496   :  { %v7175_v15 = vpack.c.bf16 %v4033_v52, %v4031_v44  ;;  %6828 = vmatmul.mubr.msk.f32.gmra.mrb[14].mxu1 %vm207_vm3, %v10229_v23  ;;  %v10369_v11 = vpop.permute.xlu0 %8362  ;;  %7258 = vmatprep.subr.bf16.mxu1 %v10989_v20  ;;  %v10386_v23 = vld [vmem:[%s10953_s2 + $0x88] sm:$0xff] }
 0x497   :  { %v8353_v16 = vpop.permute.xlu1 %8352  ;;  %5365 = vmatprep.mubr.f32.mxu1 %v10276_v61  ;;  %v8365_v48 = vunpack.i.h.bf16 %v10369_v11  ;;  %v8364_v43 = vunpack.i.l.bf16 %v10369_v11 }
 0x498   :  { %v8355_v57 = vunpack.i.h.bf16 %v8353_v16  ;;  %v8354_v22 = vunpack.i.l.bf16 %v8353_v16  ;;  %6733 = vmatmul.mubr.msk.f32.vlgmr.msra.gmra.mrb[8].mxu0 %vm207_vm3, %v10364_v59 }
 0x499   :  { %7174 = vmatpush1.bf16.msk.msra.mxu0 %vm9066_vm11, %v7172_v13  ;;  %3951 = vmatprep.mubr.f32.mxu0 %v10276_v61  ;;  %v4191_v2 = vsel %vm1061_vm14, %v8364_v43, %v8365_v48  ;;  %v8349_v13 = vunpack.i.l.bf16 %v10343_v42 }
 0x49a   :  { %v4032_v27 = vsel %vm898_vm13, %v8355_v57, %v8344_v7  ;;  %v4030_v21 = vsel %vm898_vm13, %v8354_v22, %v8334_v31  ;;  %7177 = vmatprep.subr.msk.bf16.mxu0 %vm9024_vm9, %v7175_v15  ;;  %6841 = vmatmul.mubr.msk.f32.vlgmr.msra.gmra.mrb[8].mxu1 %vm207_vm3, %v10261_v14  ;;  %v10396_v36 = vpop.permute.xlu0 %8372  ;;  %v10415_v14 = vld [vmem:[%s10953_s2 + $0x90] sm:$0xff] }
 0x49b   :  { %v7178_v37 = vpack.c.bf16 %v4032_v27, %v4030_v21  ;;  %7260 = vmatpush1.bf16.msra.mxu1 %v10992_v56  ;;  %v8358_v8 = vpop.permute.xlu1 %8357  ;;  %5371 = vmatprep.mubr.f32.mxu1 %v10276_v61  ;;  %v8375_v48 = vunpack.i.h.bf16 %v10396_v36 }
 0x49c   :  { %v8360_v63 = vunpack.i.h.bf16 %v8358_v8  ;;  %v8359_v40 = vunpack.i.l.bf16 %v8358_v8  ;;  %7262 = vmatprep.subr.bf16.mxu1 %v10995_v5  ;;  %6734 = vmatmul.mubr.msk.f32.gmra.mrb[10].mxu0 %vm207_vm3, %v10386_v23 }
 0x49d   :  { %7180 = vmatpush1.bf16.msk.msra.mxu0 %vm9066_vm11, %v7178_v37  ;;  %3957 = vmatprep.mubr.f32.mxu0 %v10276_v61 }
 0x49e   :  { %v4189_v54 = vsel %vm1061_vm14, %v8359_v40, %v8360_v63  ;;  %6842 = vmatmul.mubr.msk.f32.gmra.mrb[10].mxu1 %vm207_vm3, %v10297_v55  ;;  %v10421_v32 = vpop.permute.xlu0 %8382  ;;  %v8329_v55 = vunpack.i.l.bf16 %v10304_v4  ;;  %v10517_v63 = vld [vmem:[%s10953_s2 + $0xb8] sm:$0xff] }
 0x49f   :  { %v7181_v35 = vpack.c.bf16 %v4191_v2, %v4189_v54  ;;  %7264 = vmatpush1.bf16.msra.mxu1 %v10998_v62  ;;  %v10426_v33 = vpop.permute.xlu1 %8367  ;;  %5377 = vmatprep.mubr.f32.mxu1 %v10276_v61  ;;  %v8385_v24 = vunpack.i.h.bf16 %v10421_v32 }
 0x4a0   :  { %7267 = vmatprep.subr.msk.bf16.mxu1 %vm9024_vm9, %v7265_v12  ;;  %6735 = vmatmul.mubr.msk.f32.gmra.mrb[12].mxu0 %vm207_vm3, %v10415_v14  ;;  %v5559_v41 = vsel %vm898_vm13, %v8329_v55, %v8314_v49  ;;  %v8350_v49 = vunpack.i.h.bf16 %v10343_v42  ;;  %v10498_v42 = vld [vmem:[%s10953_s2 + $0xb0] sm:$0xff]  ;;  %v8370_v60 = vunpack.i.h.bf16 %v10426_v33  ;;  %v8369_v10 = vunpack.i.l.bf16 %v10426_v33 }
 0x4a1   :  { %7183 = vmatprep.subr.msk.bf16.mxu0 %vm8920_vm4, %v7181_v35  ;;  %3963 = vmatprep.mubr.f32.mxu0 %v10276_v61  ;;  %v7268_v19 = vpack.c.bf16 %v5561_v50, %v5559_v41  ;;  %v8384_v12 = vunpack.i.l.bf16 %v10421_v32 }
 0x4a2   :  { %6843 = vmatmul.mubr.msk.f32.gmra.mrb[12].mxu1 %vm207_vm3, %v10321_v53  ;;  %v10445_v31 = vpop.permute.xlu0 %8392  ;;  %v10456_v53 = vld [vmem:[%s10953_s2 + $0xa0] sm:$0xff]  ;;  %v5564_v22 = vsel %vm898_vm13, %v8349_v13, %v8350_v49  ;;  %v5721_v9 = vsel %vm1061_vm14, %v8369_v10, %v8370_v60 }
 0x4a3   :  { %v8378_v1 = vpop.permute.xlu1 %8377  ;;  %5383 = vmatprep.mubr.f32.mxu1 %v10276_v61  ;;  %v8395_v7 = vunpack.i.h.bf16 %v10445_v31  ;;  %v8394_v17 = vunpack.i.l.bf16 %v10445_v31  ;;  %v5720_v50 = vsel %vm1061_vm14, %v8384_v12, %v8369_v10  ;;  %v10609_v12 = vld [vmem:[%s10953_s2 + $0xd8] sm:$0xff] }
 0x4a4   :  { %v8380_v0 = vunpack.i.h.bf16 %v8378_v1  ;;  %v8379_v4 = vunpack.i.l.bf16 %v8378_v1  ;;  %6736 = vmatmul.mubr.msk.f32.gmra.mrb[14].mxu0 %vm207_vm3, %v10441_v26 }
 0x4a5   :  { %4131 = vmatprep.mubr.f32.mxu0 %v10276_v61  ;;  %v4195_v20 = vsel %vm1061_vm14, %v8394_v17, %v8395_v7 }
 0x4a6   :  { %v4190_v38 = vsel %vm1061_vm14, %v8380_v0, %v8364_v43  ;;  %v4188_v44 = vsel %vm1061_vm14, %v8379_v4, %v8359_v40  ;;  %6844 = vmatmul.mubr.msk.f32.gmra.mrb[14].mxu1 %vm207_vm3, %v10339_v3  ;;  %v10464_v52 = vpop.permute.xlu0 %8412  ;;  %v10475_v3 = vld [vmem:[%s10953_s2 + $0xa8] sm:$0xff] }
 0x4a7   :  { %v7184_v39 = vpack.c.bf16 %v4190_v38, %v4188_v44  ;;  %v8388_v15 = vpop.permute.xlu1 %8387  ;;  %5478 = vmatprep.mubr.f32.mxu1 %v10276_v61  ;;  %v8415_v56 = vunpack.i.h.bf16 %v10464_v52  ;;  %v8414_v40 = vunpack.i.l.bf16 %v10464_v52  ;;  %v10565_v52 = vld [vmem:[%s10953_s2 + $0xc8] sm:$0xff] }
 0x4a8   :  { %v8390_v11 = vunpack.i.h.bf16 %v8388_v15  ;;  %v8389_v58 = vunpack.i.l.bf16 %v8388_v15  ;;  %6749 = vmatmul.mubr.msk.f32.vlgmr.msra.gmra.mrb[8].mxu0 %vm207_vm3, %v10456_v53 }
 0x4a9   :  { %7186 = vmatpush1.bf16.msk.msra.mxu0 %vm8963_vm6, %v7184_v39  ;;  %4137 = vmatprep.mubr.f32.mxu0 %v10276_v61  ;;  %v4358_v4 = vsel %vm1229_vm15, %v8414_v40, %v8415_v56 }
 0x4aa   :  { %v4193_v34 = vsel %vm1061_vm14, %v8389_v58, %v8390_v11  ;;  %6849 = vmatmul.mubr.msk.f32.vlgmr.msra.gmra.mrb[8].mxu1 %vm207_vm3, %v10364_v59  ;;  %v10481_v45 = vpop.permute.xlu0 %8422 }
 0x4ab   :  { %v7187_v16 = vpack.c.bf16 %v4195_v20, %v4193_v34  ;;  %7270 = vmatpush1.bf16.msk.msra.mxu1 %vm9066_vm11, %v7268_v19  ;;  %v10487_v57 = vpop.permute.xlu1 %8397  ;;  %5484 = vmatprep.mubr.f32.mxu1 %v10276_v61 }
 0x4ac   :  { %6750 = vmatmul.mubr.msk.f32.gmra.mrb[10].mxu0 %vm207_vm3, %v10475_v3  ;;  %v8399_v19 = vunpack.i.l.bf16 %v10487_v57 }
 0x4ad   :  { %7189 = vmatprep.subr.msk.bf16.mxu0 %vm8920_vm4, %v7187_v16  ;;  %4143 = vmatprep.mubr.f32.mxu0 %v10276_v61  ;;  %v8425_v16 = vunpack.i.h.bf16 %v10481_v45 }
 0x4ae   :  { %v8433_v59 = vpop.permute.xlu0 %8432  ;;  %6850 = vmatmul.mubr.msk.f32.gmra.mrb[10].mxu1 %vm207_vm3, %v10386_v23  ;;  %v8374_v23 = vunpack.i.l.bf16 %v10396_v36 }
 0x4af   :  { %v8435_v43 = vunpack.i.h.bf16 %v8433_v59  ;;  %v8434_v27 = vunpack.i.l.bf16 %v8433_v59  ;;  %v8403_v21 = vpop.permute.xlu1 %8402  ;;  %5490 = vmatprep.mubr.f32.mxu1 %v10276_v61 }
 0x4b0   :  { %v8405_v37 = vunpack.i.h.bf16 %v8403_v21  ;;  %v8404_v47 = vunpack.i.l.bf16 %v8403_v21  ;;  %6751 = vmatmul.mubr.msk.f32.gmra.mrb[12].mxu0 %vm207_vm3, %v10498_v42  ;;  %v5723_v55 = vsel %vm1061_vm14, %v8374_v23, %v8375_v48  ;;  %v5722_v41 = vsel %vm1061_vm14, %v8385_v24, %v8374_v23 }
 0x4b1   :  { %v5566_v8 = vsel %vm898_vm13, %v8434_v27, %v8435_v43  ;;  %4149 = vmatprep.mubr.f32.mxu0 %v10276_v61  ;;  %v7277_v7 = vpack.c.bf16 %v5723_v55, %v5721_v9  ;;  %v10587_v43 = vld [vmem:[%s10953_s2 + $0xd0] sm:$0xff] }
 0x4b2   :  { %v7271_v30 = vpack.c.bf16 %v5566_v8, %v5564_v22  ;;  %v4194_v18 = vsel %vm1061_vm14, %v8405_v37, %v8394_v17  ;;  %v4192_v36 = vsel %vm1061_vm14, %v8404_v47, %v8389_v58  ;;  %v8438_v5 = vpop.permute.xlu0 %8437  ;;  %6851 = vmatmul.mubr.msk.f32.gmra.mrb[12].mxu1 %vm207_vm3, %v10415_v14  ;;  %v8400_v58 = vunpack.i.h.bf16 %v10487_v57 }
 0x4b3   :  { %v7190_v2 = vpack.c.bf16 %v4194_v18, %v4192_v36  ;;  %v8440_v54 = vunpack.i.h.bf16 %v8438_v5  ;;  %v8439_v35 = vunpack.i.l.bf16 %v8438_v5  ;;  %v8408_v28 = vpop.permute.xlu1 %8407  ;;  %5496 = vmatprep.mubr.f32.mxu1 %v10276_v61  ;;  %v8424_v37 = vunpack.i.l.bf16 %v10481_v45 }
 0x4b4   :  { %v8410_v62 = vunpack.i.h.bf16 %v8408_v28  ;;  %v8409_v33 = vunpack.i.l.bf16 %v8408_v28  ;;  %7273 = vmatprep.subr.msk.bf16.mxu1 %vm9024_vm9, %v7271_v30  ;;  %6752 = vmatmul.mubr.msk.f32.gmra.mrb[14].mxu0 %vm207_vm3, %v10517_v63  ;;  %v5725_v47 = vsel %vm1061_vm14, %v8399_v19, %v8400_v58 }
 0x4b5   :  { %v5563_v14 = vsel %vm898_vm13, %v8439_v35, %v8349_v13  ;;  %v5565_v32 = vsel %vm898_vm13, %v8440_v54, %v8434_v27  ;;  %7192 = vmatpush1.bf16.msk.msra.mxu0 %vm8963_vm6, %v7190_v2  ;;  %4293 = vmatprep.mubr.f32.mxu0 %v10276_v61 }
 0x4b6   :  { %v7274_v31 = vpack.c.bf16 %v5565_v32, %v5563_v14  ;;  %v10542_v1 = vpop.permute.xlu0 %8442  ;;  %6852 = vmatmul.mubr.msk.f32.gmra.mrb[14].mxu1 %vm207_vm3, %v10441_v26  ;;  %v4356_v0 = vsel %vm1229_vm15, %v8409_v33, %v8410_v62  ;;  %v7280_v26 = vpack.c.bf16 %v5722_v41, %v5720_v50 }
 0x4b7   :  { %v10550_v17 = vpop.permute.xlu1 %8417  ;;  %v7193_v38 = vpack.c.bf16 %v4358_v4, %v4356_v0  ;;  %5663 = vmatprep.mubr.f32.mxu1 %v10276_v61  ;;  %v8445_v23 = vunpack.i.h.bf16 %v10542_v1  ;;  %v8444_v24 = vunpack.i.l.bf16 %v10542_v1 }
 0x4b8   :  { %7276 = vmatpush1.bf16.msk.msra.mxu1 %vm9066_vm11, %v7274_v31  ;;  %6765 = vmatmul.mubr.msk.f32.vlgmr.msra.gmra.mrb[8].mxu0 %vm207_vm3, %v10539_v51  ;;  %v8420_v27 = vunpack.i.h.bf16 %v10550_v17  ;;  %v8419_v21 = vunpack.i.l.bf16 %v10550_v17 }
 0x4b9   :  { %7194 = vmatprep.subr.bf16.mxu0 %v7193_v38  ;;  %7279 = vmatprep.subr.msk.bf16.mxu1 %vm8920_vm4, %v7277_v7 }
 0x4ba   :  { %v10559_v44 = vpop.permute.xlu0 %8452  ;;  %4299 = vmatprep.mubr.f32.mxu0 %v10276_v61  ;;  %v5886_v2 = vsel %vm1229_vm15, %v8419_v21, %v8420_v27  ;;  %v5885_v28 = vsel %vm1229_vm15, %v8444_v24, %v8419_v21 }
 0x4bb   :  { %v8428_v39 = vpop.permute.xlu1 %8427  ;;  %6865 = vmatmul.mubr.msk.f32.vlgmr.msra.gmra.mrb[8].mxu1 %vm207_vm3, %v10456_v53  ;;  %v8455_v20 = vunpack.i.h.bf16 %v10559_v44  ;;  %v8454_v34 = vunpack.i.l.bf16 %v10559_v44  ;;  %v6769_v44 = vld [vmem:[%s10953_s2 + $0xe0] sm:$0xff] }
 0x4bc   :  { %v8430_v15 = vunpack.i.h.bf16 %v8428_v39  ;;  %v8429_v11 = vunpack.i.l.bf16 %v8428_v39  ;;  %7282 = vmatpush1.bf16.msk.msra.mxu1 %vm8963_vm6, %v7280_v26  ;;  %5669 = vmatprep.mubr.f32.mxu1 %v10276_v61 }
 0x4bd   :  { %6766 = vmatmul.mubr.msk.f32.gmra.mrb[10].mxu0 %vm207_vm3, %v10565_v52  ;;  %v4362_v30 = vsel %vm1229_vm15, %v8454_v34, %v8455_v20 }
 0x4be   :  { %v4357_v53 = vsel %vm1229_vm15, %v8430_v15, %v8414_v40  ;;  %v4355_v49 = vsel %vm1229_vm15, %v8429_v11, %v8409_v33  ;;  %v8473_v13 = vpop.permute.xlu0 %8472  ;;  %4305 = vmatprep.mubr.f32.mxu0 %v10276_v61  ;;  %v5888_v33 = vsel %vm1229_vm15, %v8424_v37, %v8425_v16 }
 0x4bf   :  { %v7195_v59 = vpack.c.bf16 %v4357_v53, %v4355_v49  ;;  %v8475_v22 = vunpack.i.h.bf16 %v8473_v13  ;;  %v8474_v48 = vunpack.i.l.bf16 %v8473_v13  ;;  %v8448_v57 = vpop.permute.xlu1 %8447  ;;  %6866 = vmatmul.mubr.msk.f32.gmra.mrb[10].mxu1 %vm207_vm3, %v10475_v3  ;;  %v7289_v14 = vpack.c.bf16 %v5888_v33, %v5886_v2 }
 0x4c0   :  { %v8450_v60 = vunpack.i.h.bf16 %v8448_v57  ;;  %v8449_v10 = vunpack.i.l.bf16 %v8448_v57  ;;  %5675 = vmatprep.mubr.f32.mxu1 %v10276_v61 }
 0x4c1   :  { %v5727_v3 = vsel %vm1061_vm14, %v8474_v48, %v8475_v22  ;;  %7196 = vmatpush1.bf16.msra.mxu0 %v7195_v59 }
 0x4c2   :  { %v7283_v56 = vpack.c.bf16 %v5727_v3, %v5725_v47  ;;  %v8478_v8 = vpop.permute.xlu0 %8477  ;;  %v4360_v40 = vsel %vm1229_vm15, %v8449_v10, %v8450_v60  ;;  %6767 = vmatmul.mubr.msk.f32.gmra.mrb[12].mxu0 %vm207_vm3, %v10587_v43 }
 0x4c3   :  { %v8480_v18 = vunpack.i.h.bf16 %v8478_v8  ;;  %v8479_v45 = vunpack.i.l.bf16 %v8478_v8  ;;  %v10601_v36 = vpop.permute.xlu1 %8457  ;;  %6867 = vmatmul.mubr.msk.f32.gmra.mrb[12].mxu1 %vm207_vm3, %v10498_v42  ;;  %v7197_v5 = vpack.c.bf16 %v4362_v30, %v4360_v40  ;;  %4311 = vmatprep.mubr.f32.mxu0 %v10276_v61  ;;  %v5887_v42 = vsel %vm1229_vm15, %v8445_v23, %v8424_v37 }
 0x4c4   :  { %7285 = vmatprep.subr.msk.bf16.mxu1 %vm8920_vm4, %v7283_v56  ;;  %5681 = vmatprep.mubr.f32.mxu1 %v10276_v61  ;;  %v7291_v31 = vpack.c.bf16 %v5887_v42, %v5885_v28  ;;  %v8460_v38 = vunpack.i.h.bf16 %v10601_v36  ;;  %v8459_v26 = vunpack.i.l.bf16 %v10601_v36 }
 0x4c5   :  { %v5724_v54 = vsel %vm1061_vm14, %v8479_v45, %v8399_v19  ;;  %v5726_v35 = vsel %vm1061_vm14, %v8480_v18, %v8474_v48  ;;  %7198 = vmatprep.subr.bf16.mxu0 %v7197_v5  ;;  %v6770_v48 = vld [vmem:[%s10953_s2 + $0xe8] sm:$0xff]  ;;  %v6771_v5 = vld [vmem:[%s10953_s2 + $0xf0] sm:$0xff] }
 0x4c6   :  { %v7286_v9 = vpack.c.bf16 %v5726_v35, %v5724_v54  ;;  %v10619_v62 = vpop.permute.xlu0 %8482  ;;  %6768 = vmatmul.mubr.msk.f32.gmra.mrb[14].mxu0 %vm207_vm3, %v10609_v12  ;;  %v5890_v49 = vsel %vm1229_vm15, %v8459_v26, %v8460_v38 }
 0x4c7   :  { %v8463_v25 = vpop.permute.xlu1 %8462  ;;  %6868 = vmatmul.mubr.msk.f32.gmra.mrb[14].mxu1 %vm207_vm3, %v10517_v63  ;;  %4447 = vmatprep.mubr.f32.mxu0 %v10276_v61  ;;  %v8485_v1 = vunpack.i.h.bf16 %v10619_v62  ;;  %v8484_v0 = vunpack.i.l.bf16 %v10619_v62 }
 0x4c8   :  { %v8465_v32 = vunpack.i.h.bf16 %v8463_v25  ;;  %v8464_v55 = vunpack.i.l.bf16 %v8463_v25  ;;  %7288 = vmatpush1.bf16.msk.msra.mxu1 %vm8963_vm6, %v7286_v9  ;;  %5824 = vmatprep.mubr.f32.mxu1 %v10276_v61  ;;  %v6772_v25 = vld [vmem:[%s10953_s2 + $0xf8] sm:$0xff] }
 0x4c9   :  { %7290 = vmatprep.subr.bf16.mxu1 %v7289_v14  ;;  %v4507_v39 = vsel %vm1379_vm2, %v8484_v0, %v8485_v1 }
 0x4ca   :  { %v4361_v4 = vsel %vm1229_vm15, %v8465_v32, %v8454_v34  ;;  %v4359_v63 = vsel %vm1229_vm15, %v8464_v55, %v8449_v10  ;;  %v10634_v41 = vpop.permute.xlu0 %8492 }
 0x4cb   :  { %v7199_v50 = vpack.c.bf16 %v4361_v4, %v4359_v63  ;;  %v8468_v7 = vpop.permute.xlu1 %8467  ;;  %6881 = vmatmul.mubr.msk.f32.vlgmr.msra.gmra.mrb[8].mxu1 %vm207_vm3, %v10539_v51  ;;  %v8495_v16 = vunpack.i.h.bf16 %v10634_v41  ;;  %v8494_v59 = vunpack.i.l.bf16 %v10634_v41 }
 0x4cc   :  { %v8470_v6 = vunpack.i.h.bf16 %v8468_v7  ;;  %v8469_v17 = vunpack.i.l.bf16 %v8468_v7  ;;  %7292 = vmatpush1.bf16.msra.mxu1 %v7291_v31  ;;  %5830 = vmatprep.mubr.f32.mxu1 %v10276_v61 }
 0x4cd   :  { %7200 = vmatpush1.bf16.msra.mxu0 %v7199_v50  ;;  %v6037_v3 = vsel %vm1379_vm2, %v8494_v59, %v8495_v16 }
 0x4ce   :  { %v4505_v15 = vsel %vm1379_vm2, %v8469_v17, %v8470_v6  ;;  %v8503_v11 = vpop.permute.xlu0 %8502 }
 0x4cf   :  { %v7201_v51 = vpack.c.bf16 %v4507_v39, %v4505_v15  ;;  %v8505_v58 = vunpack.i.h.bf16 %v8503_v11  ;;  %v8504_v19 = vunpack.i.l.bf16 %v8503_v11  ;;  %v8488_v20 = vpop.permute.xlu1 %8487  ;;  %6882 = vmatmul.mubr.msk.f32.gmra.mrb[10].mxu1 %vm207_vm3, %v10565_v52 }
 0x4d0   :  { %v8490_v34 = vunpack.i.h.bf16 %v8488_v20  ;;  %v8489_v53 = vunpack.i.l.bf16 %v8488_v20  ;;  %5836 = vmatprep.mubr.f32.mxu1 %v10276_v61  ;;  %6773 = vmatmul.mubr.msk.f32.vlgmr.msra.gmra.mrb[8].mxu0 %vm207_vm3, %v6769_v44  ;;  %v6777_v20 = vld [vmem:[%s10953_s2 + $0x100] sm:$0xff] }
 0x4d1   :  { %7203 = vmatprep.subr.msk.bf16.mxu0 %vm9024_vm9, %v7201_v51  ;;  %v5892_v13 = vsel %vm1229_vm15, %v8504_v19, %v8505_v58  ;;  %4453 = vmatprep.mubr.f32.mxu0 %v10276_v61 }
 0x4d2   :  { %v8508_v52 = vpop.permute.xlu0 %8507  ;;  %v7293_v22 = vpack.c.bf16 %v5892_v13, %v5890_v49  ;;  %v6035_v60 = vsel %vm1379_vm2, %v8489_v53, %v8490_v34 }
 0x4d3   :  { %v8510_v57 = vunpack.i.h.bf16 %v8508_v52  ;;  %v8509_v27 = vunpack.i.l.bf16 %v8508_v52  ;;  %v8498_v21 = vpop.permute.xlu1 %8497  ;;  %6883 = vmatmul.mubr.msk.f32.gmra.mrb[12].mxu1 %vm207_vm3, %v10587_v43  ;;  %v7297_v40 = vpack.c.bf16 %v6037_v3, %v6035_v60 }
 0x4d4   :  { %v8500_v10 = vunpack.i.h.bf16 %v8498_v21  ;;  %v8499_v37 = vunpack.i.l.bf16 %v8498_v21  ;;  %7294 = vmatprep.subr.bf16.mxu1 %v7293_v22  ;;  %5842 = vmatprep.mubr.f32.mxu1 %v10276_v61 }
 0x4d5   :  { %v5889_v47 = vsel %vm1229_vm15, %v8509_v27, %v8459_v26  ;;  %v5891_v23 = vsel %vm1229_vm15, %v8510_v57, %v8504_v19  ;;  %6774 = vmatmul.mubr.msk.f32.gmra.mrb[10].mxu0 %vm207_vm3, %v6770_v48 }
 0x4d6   :  { %v7295_v24 = vpack.c.bf16 %v5891_v23, %v5889_v47  ;;  %v4506_v56 = vsel %vm1379_vm2, %v8500_v10, %v8484_v0  ;;  %v4504_v43 = vsel %vm1379_vm2, %v8499_v37, %v8469_v17  ;;  %v8513_v8 = vpop.permute.xlu0 %8512  ;;  %4459 = vmatprep.mubr.f32.mxu0 %v10276_v61 }
 0x4d7   :  { %v7204_v30 = vpack.c.bf16 %v4506_v56, %v4504_v43  ;;  %v8515_v18 = vunpack.i.h.bf16 %v8513_v8  ;;  %v8514_v45 = vunpack.i.l.bf16 %v8513_v8  ;;  %v8518_v36 = vpop.permute.xlu1 %8517  ;;  %6884 = vmatmul.mubr.msk.f32.gmra.mrb[14].mxu1 %vm207_vm3, %v10609_v12 }
 0x4d8   :  { %7296 = vmatpush1.bf16.msra.mxu1 %v7295_v24  ;;  %5977 = vmatprep.mubr.f32.mxu1 %v10276_v61  ;;  %v8520_v35 = vunpack.i.h.bf16 %v8518_v36  ;;  %v8519_v42 = vunpack.i.l.bf16 %v8518_v36 }
 0x4d9   :  { %v6034_v2 = vsel %vm1379_vm2, %v8514_v45, %v8489_v53  ;;  %v6036_v54 = vsel %vm1379_vm2, %v8515_v18, %v8494_v59  ;;  %7206 = vmatpush1.bf16.msk.msra.mxu0 %vm9066_vm11, %v7204_v30  ;;  %7299 = vmatprep.subr.msk.bf16.mxu1 %vm9024_vm9, %v7297_v40  ;;  %v6780_v53 = vld [vmem:[%s10953_s2 + $0x118] sm:$0xff] }
 0x4da   :  { %v7300_v12 = vpack.c.bf16 %v6036_v54, %v6034_v2  ;;  %v8523_v28 = vpop.permute.xlu0 %8522  ;;  %6775 = vmatmul.mubr.msk.f32.gmra.mrb[12].mxu0 %vm207_vm3, %v6771_v5  ;;  %v4509_v14 = vsel %vm1379_vm2, %v8519_v42, %v8520_v35 }
 0x4db   :  { %v8525_v9 = vunpack.i.h.bf16 %v8523_v28  ;;  %v8524_v62 = vunpack.i.l.bf16 %v8523_v28  ;;  %v8528_v33 = vpop.permute.xlu1 %8527  ;;  %6889 = vmatmul.mubr.msk.f32.vlgmr.msra.gmra.mrb[8].mxu1 %vm207_vm3, %v6769_v44  ;;  %4465 = vmatprep.mubr.f32.mxu0 %v10276_v61 }
 0x4dc   :  { %7302 = vmatpush1.bf16.msk.msra.mxu1 %vm9066_vm11, %v7300_v12  ;;  %5983 = vmatprep.mubr.f32.mxu1 %v10276_v61  ;;  %v8530_v55 = vunpack.i.h.bf16 %v8528_v33  ;;  %v8529_v31 = vunpack.i.l.bf16 %v8528_v33 }
 0x4dd   :  { %v4511_v32 = vsel %vm1379_vm2, %v8524_v62, %v8525_v9 }
 0x4de   :  { %v7207_v1 = vpack.c.bf16 %v4511_v32, %v4509_v14  ;;  %v8538_v0 = vpop.permute.xlu0 %8537  ;;  %6776 = vmatmul.mubr.msk.f32.gmra.mrb[14].mxu0 %vm207_vm3, %v6772_v25  ;;  %v6039_v6 = vsel %vm1379_vm2, %v8529_v31, %v8530_v55 }
 0x4df   :  { %v8540_v4 = vunpack.i.h.bf16 %v8538_v0  ;;  %v8539_v63 = vunpack.i.l.bf16 %v8538_v0  ;;  %v8533_v41 = vpop.permute.xlu1 %8532  ;;  %6890 = vmatmul.mubr.msk.f32.gmra.mrb[10].mxu1 %vm207_vm3, %v6770_v48  ;;  %4609 = vmatprep.mubr.f32.mxu0 %v10276_v61 }
 0x4e0   :  { %v8535_v50 = vunpack.i.h.bf16 %v8533_v41  ;;  %v8534_v7 = vunpack.i.l.bf16 %v8533_v41  ;;  %7209 = vmatprep.subr.msk.bf16.mxu0 %vm9024_vm9, %v7207_v1  ;;  %5989 = vmatprep.mubr.f32.mxu1 %v10276_v61 }
 0x4e1   :  { %v6041_v17 = vsel %vm1379_vm2, %v8539_v63, %v8540_v4 }
 0x4e2   :  { %v7303_v38 = vpack.c.bf16 %v6041_v17, %v6039_v6  ;;  %v4510_v26 = vsel %vm1379_vm2, %v8535_v50, %v8524_v62  ;;  %v4508_v44 = vsel %vm1379_vm2, %v8534_v7, %v8519_v42  ;;  %v8543_v39 = vpop.permute.xlu0 %8542 }
 0x4e3   :  { %v7210_v15 = vpack.c.bf16 %v4510_v26, %v4508_v44  ;;  %v8545_v11 = vunpack.i.h.bf16 %v8543_v39  ;;  %v8544_v51 = vunpack.i.l.bf16 %v8543_v39  ;;  %6891 = vmatmul.mubr.msk.f32.gmra.mrb[12].mxu1 %vm207_vm3, %v6771_v5 }
 0x4e4   :  { %7305 = vmatprep.subr.msk.bf16.mxu1 %vm9024_vm9, %v7303_v38  ;;  %5995 = vmatprep.mubr.f32.mxu1 %v10276_v61 }
 0x4e5   :  { %v6038_v58 = vsel %vm1379_vm2, %v8544_v51, %v8529_v31  ;;  %v6040_v19 = vsel %vm1379_vm2, %v8545_v11, %v8539_v63  ;;  %7212 = vmatpush1.bf16.msk.msra.mxu0 %vm9066_vm11, %v7210_v15 }
 0x4e6   :  { %v7306_v34 = vpack.c.bf16 %v6040_v19, %v6038_v58 }
 0x4e7   :  { %6892 = vmatmul.mubr.msk.f32.gmra.mrb[14].mxu1 %vm207_vm3, %v6772_v25 }
 0x4e8   :  { %6789 = vmatmul.mubr.msk.f32.vlgmr.msra.gmra.mrb[8].mxu0 %vm207_vm3, %v6777_v20  ;;  %7308 = vmatpush1.bf16.msk.msra.mxu1 %vm9066_vm11, %v7306_v34 }
 0x4e9   :  { %4615 = vmatprep.mubr.f32.mxu0 %v10276_v61  ;;  %6138 = vmatprep.mubr.f32.mxu1 %v10276_v61 }
 0x4eb   :  { %6905 = vmatmul.mubr.msk.f32.vlgmr.msra.gmra.mrb[8].mxu1 %vm207_vm3, %v6777_v20 }
 0x4ec   :  { %6790 = vmatmul.mubr.msk.f32.gmra.mrb[10].mxu0 %vm207_vm3, %v6778_v46  ;;  %6144 = vmatprep.mubr.f32.mxu1 %v10276_v61 }
 0x4ed   :  { %4621 = vmatprep.mubr.f32.mxu0 %v10276_v61 }
 0x4ef   :  { %6906 = vmatmul.mubr.msk.f32.gmra.mrb[10].mxu1 %vm207_vm3, %v6778_v46 }
 0x4f0   :  { %6791 = vmatmul.mubr.msk.f32.gmra.mrb[12].mxu0 %vm207_vm3, %v6779_v29  ;;  %6150 = vmatprep.mubr.f32.mxu1 %v10276_v61 }
 0x4f1   :  { %4627 = vmatprep.mubr.f32.mxu0 %v10276_v61 }
 0x4f3   :  { %6907 = vmatmul.mubr.msk.f32.gmra.mrb[12].mxu1 %vm207_vm3, %v6779_v29 }
 0x4f4   :  { %6792 = vmatmul.mubr.msk.f32.gmra.mrb[14].mxu0 %vm207_vm3, %v6780_v53  ;;  %6156 = vmatprep.mubr.f32.mxu1 %v10276_v61  ;;  %v4644_v49 = vpop.permute.xlu1 %4643 }
 0x4f7   :  { %6908 = vmatmul.mubr.msk.f32.gmra.mrb[14].mxu1 %vm207_vm3, %v6780_v53 }
 0x4f8   :  { %v4648_v22 = vpop.permute.xlu0 %4647 }
 0x4f9   :  { %v4652_v3 = vpop.permute.xlu1 %4651 }
 0x507   :  { %v4656_v28 = vpop.permute.xlu1 %4655 }
 0x5bb   :  { %v4611_v13 = vpop.f32.mrb[8].mxu0 }
 0x5bc   :  { %v10742_v16 = vadd.f32 %v4644_v49, %v4611_v13  ;;  %v4613_v59 = vpop.f32.mrb[9].mxu0 }
 0x5bd   :  { %v10744_v52 = vadd.f32 %v4644_v49, %v4613_v59 }
 0x5be   :  { %v4690_v48 = vmul.f32 %v10742_v16, %v10742_v16  ;;  %v6140_v57 = vpop.f32.mrb[8].mxu1 }
 0x5bf   :  { %v4691_v27 = vmul.f32 %v10744_v52, %v10744_v52  ;;  %v4617_v21 = vpop.f32.mrb[10].mxu0  ;;  %v6142_v60 = vpop.f32.mrb[9].mxu1  ;;  %v4674_v61 = vadd.f32 %v10744_v52, %v10742_v16  ;;  %v10760_v30 = vadd.f32 %v6140_v57, %v4644_v49 }
 0x5c0   :  { %v10752_v10 = vadd.f32 %v4648_v22, %v4617_v21  ;;  %v4619_v37 = vpop.f32.mrb[11].mxu0  ;;  %v10762_v18 = vadd.f32 %v6142_v60, %v4644_v49 }
 0x5c1   :  { %v10754_v47 = vadd.f32 %v4648_v22, %v4619_v37  ;;  %4675 = vadd.xlane.f32.xlu0 %v4674_v61  ;;  %v4698_v23 = vadd.f32 %v4691_v27, %v4690_v48  ;;  %v6204_v0 = vmul.f32 %v10760_v30, %v10760_v30  ;;  %v8597_v48 = vmov 4  }
 0x5c2   :  { %v4692_v24 = vmul.f32 %v10752_v10, %v10752_v10  ;;  %v6146_v56 = vpop.f32.mrb[10].mxu1  ;;  %v6188_v33 = vadd.f32 %v10762_v18, %v10760_v30  ;;  %v6205_v4 = vmul.f32 %v10762_v18, %v10762_v18  ;;  %8548 = vset.pattern.permute.xlu0 %v8597_v48  ;;  %8549 = vset.pattern.permute.xlu1 %v8597_v48 }
 0x5c3   :  { %v4693_v43 = vmul.f32 %v10754_v47, %v10754_v47  ;;  %4699 = vadd.xlane.f32.xlu1 %v4698_v23  ;;  %v4623_v8 = vpop.f32.mrb[12].mxu0  ;;  %v6148_v40 = vpop.f32.mrb[11].mxu1  ;;  %v4677_v54 = vadd.f32 %v10754_v47, %v10752_v10  ;;  %v10786_v63 = vadd.f32 %v6146_v56, %v4648_v22 }
 0x5c4   :  { %v10764_v45 = vadd.f32 %v4652_v3, %v4623_v8  ;;  %v4625_v36 = vpop.f32.mrb[13].mxu0  ;;  %v10788_v41 = vadd.f32 %v6148_v40, %v4648_v22  ;;  %v6212_v6 = vadd.f32 %v6205_v4, %v6204_v0 }
 0x5c5   :  { %v10766_v5 = vadd.f32 %v4652_v3, %v4625_v36  ;;  %v4701_v2 = vadd.f32 %v4693_v43, %v4692_v24  ;;  %v6206_v15 = vmul.f32 %v10786_v63, %v10786_v63 }
 0x5c6   :  { %v6152_v35 = vpop.f32.mrb[12].mxu1  ;;  %v4694_v9 = vmul.f32 %v10764_v45, %v10764_v45  ;;  %v6191_v17 = vadd.f32 %v10788_v41, %v10786_v63  ;;  %v6207_v11 = vmul.f32 %v10788_v41, %v10788_v41 }
 0x5c7   :  { %4702 = vadd.xlane.f32.xlu0 %v4701_v2  ;;  %4678 = vadd.xlane.f32.xlu1 %v4677_v54  ;;  %v4629_v42 = vpop.f32.mrb[14].mxu0  ;;  %v6154_v12 = vpop.f32.mrb[13].mxu1  ;;  %v4695_v25 = vmul.f32 %v10766_v5, %v10766_v5  ;;  %v4680_v55 = vadd.f32 %v10766_v5, %v10764_v45  ;;  %v10794_v38 = vadd.f32 %v6152_v35, %v4652_v3 }
 0x5c8   :  { %v4631_v62 = vpop.f32.mrb[15].mxu0  ;;  %v10776_v14 = vadd.f32 %v4656_v28, %v4629_v42  ;;  %v10800_v39 = vadd.f32 %v6154_v12, %v4652_v3  ;;  %v6215_v53 = vadd.f32 %v6207_v11, %v6206_v15 }
 0x5c9   :  { %v10778_v32 = vadd.f32 %v4656_v28, %v4631_v62  ;;  %v4704_v50 = vadd.f32 %v4695_v25, %v4694_v9  ;;  %v6208_v51 = vmul.f32 %v10794_v38, %v10794_v38 }
 0x5ca   :  { %v6158_v31 = vpop.f32.mrb[14].mxu1  ;;  %v4696_v26 = vmul.f32 %v10776_v14, %v10776_v14  ;;  %v6209_v58 = vmul.f32 %v10800_v39, %v10800_v39  ;;  %v6194_v19 = vadd.f32 %v10800_v39, %v10794_v38 }
 0x5cb   :  { %6189 = vadd.xlane.f32.xlu1 %v6188_v33  ;;  %4681 = vadd.xlane.f32.xlu0 %v4680_v55  ;;  %v6160_v1 = vpop.f32.mrb[15].mxu1  ;;  %v4683_v7 = vadd.f32 %v10778_v32, %v10776_v14  ;;  %v4697_v44 = vmul.f32 %v10778_v32, %v10778_v32  ;;  %v10812_v34 = vadd.f32 %v6158_v31, %v4656_v28 }
 0x5cc   :  { %v10814_v46 = vadd.f32 %v6160_v1, %v4656_v28  ;;  %v6218_v29 = vadd.f32 %v6209_v58, %v6208_v51 }
 0x5cd   :  { %v4707_v20 = vadd.f32 %v4697_v44, %v4696_v26  ;;  %v6210_v49 = vmul.f32 %v10812_v34, %v10812_v34 }
 0x5ce   :  { %v6211_v13 = vmul.f32 %v10814_v46, %v10814_v46  ;;  %v6197_v59 = vadd.f32 %v10814_v46, %v10812_v34 }
 0x5cf   :  { %4705 = vadd.xlane.f32.xlu1 %v4704_v50  ;;  %4684 = vadd.xlane.f32.xlu0 %v4683_v7 }
 0x5d0   :  { %v6221_v22 = vadd.f32 %v6211_v13, %v6210_v49  ;;  %v8580_v49 = vld [vmem:[%s10952_s3] sm:$0xff] }
 0x5d3   :  { %6213 = vadd.xlane.f32.xlu1 %v6212_v6  ;;  %6192 = vadd.xlane.f32.xlu0 %v6191_v17 }
 0x5d7   :  { %6195 = vadd.xlane.f32.xlu1 %v6194_v19  ;;  %4708 = vadd.xlane.f32.xlu0 %v4707_v20 }
 0x5db   :  { %6219 = vadd.xlane.f32.xlu1 %v6218_v29  ;;  %6216 = vadd.xlane.f32.xlu0 %v6215_v53 }
 0x5df   :  { %6198 = vadd.xlane.f32.xlu0 %v6197_v59 }
 0x5e3   :  { %6222 = vadd.xlane.f32.xlu0 %v6221_v22 }
 0x64e   :  { %v4676_v57 = vpop.xlane.xlu0 %4675 }
 0x650   :  { %v4700_v27 = vpop.xlane.xlu1 %4699 }
 0x654   :  { %v4703_v21 = vpop.xlane.xlu0 %4702  ;;  %v4679_v60 = vpop.xlane.xlu1 %4678 }
 0x658   :  { %v6190_v61 = vpop.xlane.xlu1 %6189  ;;  %v4682_v37 = vpop.xlane.xlu0 %4681 }
 0x659   :  { %v6200_v23 = vadd.f32 %v6190_v61, %v4676_v57  ;;  %v8582_v61 = vld [vmem:[%s10952_s3 + $0x8] sm:$0xff] }
 0x65b   :  { %v6228_v56 = vmul.f32 0.001953125, %v6200_v23 }
 0x65c   :  { %v4706_v3 = vpop.xlane.xlu1 %4705  ;;  %v4685_v24 = vpop.xlane.xlu0 %4684 }
 0x65d   :  { %v6236_v36 = vmul.f32 %v6228_v56, %v6228_v56 }
 0x660   :  { %v6214_v43 = vpop.xlane.xlu1 %6213  ;;  %v6193_v8 = vpop.xlane.xlu0 %6192 }
 0x661   :  { %v6224_v40 = vadd.f32 %v6214_v43, %v4700_v27  ;;  %v6201_v54 = vadd.f32 %v6193_v8, %v4679_v60 }
 0x663   :  { %v6232_v2 = vmul.f32 0.001953125, %v6224_v40  ;;  %v6229_v62 = vmul.f32 0.001953125, %v6201_v54  ;;  %v8598_v40 = vmov 5  }
 0x664   :  { %v6196_v35 = vpop.xlane.xlu1 %6195  ;;  %v4709_v42 = vpop.xlane.xlu0 %4708 }
 0x665   :  { %v6240_v12 = vsub.f32 %v6232_v2, %v6236_v36  ;;  %v6202_v28 = vadd.f32 %v6196_v35, %v4682_v37  ;;  %v6237_v0 = vmul.f32 %v6229_v62, %v6229_v62 }
 0x667   :  { %v6244_v9 = vadd.f32 1e-05, %v6240_v12  ;;  %v6230_v33 = vmul.f32 0.001953125, %v6202_v28 }
 0x668   :  { %v6220_v25 = vpop.xlane.xlu1 %6219  ;;  %v6217_v55 = vpop.xlane.xlu0 %6216 }
 0x669   :  { %8560 = vrsqrt.f32 %v6244_v9  ;;  %v6226_v31 = vadd.f32 %v6220_v25, %v4706_v3  ;;  %v6225_v1 = vadd.f32 %v6217_v55, %v4703_v21  ;;  %v6238_v4 = vmul.f32 %v6230_v33, %v6230_v33  ;;  %v8581_v21 = vld [vmem:[%s10952_s3 + $0x10] sm:$0xff] }
 0x66b   :  { %v6234_v50 = vmul.f32 0.001953125, %v6226_v31  ;;  %v6233_v7 = vmul.f32 0.001953125, %v6225_v1 }
 0x66c   :  { %v6199_v6 = vpop.xlane.xlu0 %6198 }
 0x66d   :  { %v6242_v17 = vsub.f32 %v6234_v50, %v6238_v4  ;;  %v6241_v26 = vsub.f32 %v6233_v7, %v6237_v0  ;;  %v6203_v44 = vadd.f32 %v6199_v6, %v4685_v24  ;;  %v6344_v4 = vld [vmem:[%s10950_s0] sm:$0xff]  ;;  %v6345_v50 = vld [vmem:[%s10950_s0 + $0x8] sm:$0xff] }
 0x66e   :  { %v6909_v7 = vld [vmem:[%s10950_s0 + $0x40] sm:$0xff] }
 0x66f   :  { %v6246_v15 = vadd.f32 1e-05, %v6242_v17  ;;  %v6245_v11 = vadd.f32 1e-05, %v6241_v26  ;;  %v6231_v51 = vmul.f32 0.001953125, %v6203_v44 }
 0x670   :  { %v6223_v58 = vpop.xlane.xlu0 %6222 }
 0x671   :  { %8562 = vrsqrt.f32 %v6246_v15  ;;  %v6227_v19 = vadd.f32 %v6223_v58, %v4709_v42  ;;  %v6239_v29 = vmul.f32 %v6231_v51, %v6231_v51 }
 0x672   :  { %8564 = vrsqrt.f32 %v6245_v11 }
 0x673   :  { %v8561_v20 = vpop.eup %8560  ;;  %v6235_v53 = vmul.f32 0.001953125, %v6227_v19 }
 0x674   :  { %v6252_v13 = vmul.f32 %v8580_v49, %v8561_v20 }
 0x675   :  { %v6243_v59 = vsub.f32 %v6235_v53, %v6239_v29 }
 0x676   :  { %v6256_v22 = vmul.f32 %v6252_v13, %v6228_v56  ;;  %v8583_v56 = vld [vmem:[%s10952_s3 + $0x18] sm:$0xff] }
 0x677   :  { %v6247_v48 = vadd.f32 1e-05, %v6243_v59 }
 0x678   :  { %6264 = vrot.lane.b32.xlu1 %v6256_v22, %s8588_s25 }
 0x679   :  { %8566 = vrsqrt.f32 %v6247_v48 }
 0x67b   :  { %v8563_v57 = vpop.eup %8562 }
 0x67c   :  { %v8565_v27 = vpop.eup %8564  ;;  %v6254_v60 = vmul.f32 %v8581_v21, %v8563_v57 }
 0x67d   :  { %v6253_v37 = vmul.f32 %v8582_v61, %v8565_v27  ;;  %v6346_v27 = vld [vmem:[%s10950_s0 + $0x10] sm:$0xff] }
 0x67e   :  { %v6258_v23 = vmul.f32 %v6254_v60, %v6230_v33 }
 0x67f   :  { %v6257_v3 = vmul.f32 %v6253_v37, %v6229_v62 }
 0x680   :  { %6268 = vrot.lane.b32.xlu1 %v6258_v23, %s8588_s25 }
 0x681   :  { %6266 = vrot.lane.b32.xlu0 %v6257_v3, %s8588_s25 }
 0x683   :  { %v8567_v24 = vpop.eup %8566 }
 0x684   :  { %v6255_v43 = vmul.f32 %v8583_v56, %v8567_v24  ;;  %v6347_v24 = vld [vmem:[%s10950_s0 + $0x18] sm:$0xff] }
 0x685   :  { %6290 = vperm.xlu0 %8548, %v6252_v13  }
 0x686   :  { %v6259_v8 = vmul.f32 %v6255_v43, %v6231_v51 }
 0x688   :  { %6270 = vrot.lane.b32.xlu1 %v6259_v8, %s8588_s25 }
 0x689   :  { %6305 = vperm.xlu0 %8548, %v6255_v43  }
 0x68c   :  { %6295 = vperm.xlu1 %8549, %v6253_v37  }
 0x68d   :  { %8551 = vset.pattern.permute.xlu0 %v8598_v40 }
 0x690   :  { %6300 = vperm.xlu1 %8549, %v6254_v60  }
 0x694   :  { %8550 = vset.pattern.permute.xlu1 %v8598_v40 }
 0x6ea   :  { %v6265_v36 = vpop.permute.xlu1 %6264 }
 0x6eb   :  { %v6276_v2 = vsub.f32 %v8580_v49, %v6265_v36 }
 0x6ed   :  { %6318 = vperm.xlu1 %8550, %v6276_v2  }
 0x6f2   :  { %v6269_v54 = vpop.permute.xlu1 %6268 }
 0x6f3   :  { %v6278_v35 = vsub.f32 %v8581_v21, %v6269_v54  ;;  %v6267_v42 = vpop.permute.xlu0 %6266 }
 0x6f4   :  { %v6277_v12 = vsub.f32 %v8582_v61, %v6267_v42 }
 0x6f5   :  { %6328 = vperm.xlu1 %8550, %v6278_v35  }
 0x6f6   :  { %6323 = vperm.xlu0 %8551, %v6277_v12  }
 0x6fa   :  { %v6271_v28 = vpop.permute.xlu1 %6270 }
 0x6fb   :  { %v6279_v9 = vsub.f32 %v8583_v56, %v6271_v28 }
 0x6fd   :  { %6333 = vperm.xlu1 %8550, %v6279_v9  }
 0x704   :  { %v6291_v33 = vpop.permute.xlu0 %6290 }
 0x705   :  { %v6308_v55 = vmul.f32 %v6291_v33, %v10742_v16  ;;  %v6309_v31 = vmul.f32 %v6291_v33, %v10744_v52  ;;  %v6384_v1 = vmul.f32 %v6291_v33, %v10760_v30  ;;  %v6385_v0 = vmul.f32 %v6291_v33, %v10762_v18  ;;  %v6910_v16 = vld [vmem:[%s10950_s0 + $0x48] sm:$0xff] }
 0x708   :  { %v6306_v51 = vpop.permute.xlu0 %6305 }
 0x70b   :  { %v6296_v62 = vpop.permute.xlu1 %6295 }
 0x70c   :  { %v6310_v48 = vmul.f32 %v6296_v62, %v10752_v10  ;;  %v6311_v57 = vmul.f32 %v6296_v62, %v10754_v47  ;;  %v6386_v21 = vmul.f32 %v6296_v62, %v10786_v63  ;;  %v6387_v60 = vmul.f32 %v6296_v62, %v10788_v41  ;;  %v6911_v10 = vld [vmem:[%s10950_s0 + $0x50] sm:$0xff]  ;;  %v6912_v47 = vld [vmem:[%s10950_s0 + $0x58] sm:$0xff] }
 0x70f   :  { %v6301_v25 = vpop.permute.xlu1 %6300 }
 0x710   :  { %v6312_v53 = vmul.f32 %v6301_v25, %v10764_v45  ;;  %v6313_v49 = vmul.f32 %v6301_v25, %v10766_v5  ;;  %v6388_v13 = vmul.f32 %v6301_v25, %v10794_v38  ;;  %v6389_v59 = vmul.f32 %v6301_v25, %v10800_v39  ;;  %v6348_v45 = vld [vmem:[%s10950_s0 + $0x20] sm:$0xff]  ;;  %v6349_v5 = vld [vmem:[%s10950_s0 + $0x28] sm:$0xff] }
 0x711   :  { %v6913_v38 = vld [vmem:[%s10950_s0 + $0x60] sm:$0xff]  ;;  %v6914_v39 = vld [vmem:[%s10950_s0 + $0x68] sm:$0xff] }
 0x76c   :  { %v6319_v52 = vpop.permute.xlu1 %6318 }
 0x76d   :  { %v6336_v30 = vadd.f32 %v6319_v52, %v6308_v55  ;;  %v6337_v6 = vadd.f32 %v6319_v52, %v6309_v31  ;;  %v6392_v18 = vadd.f32 %v6384_v1, %v6319_v52  ;;  %v6393_v17 = vadd.f32 %v6385_v0, %v6319_v52 }
 0x76e   :  { %v6391_v52 = vmul.f32 %v6306_v51, %v10814_v46 }
 0x76f   :  { %v6352_v26 = vadd.f32 %v6344_v4, %v6336_v30  ;;  %v6353_v44 = vadd.f32 %v6345_v50, %v6337_v6  ;;  %v6408_v15 = vadd.f32 %v6909_v7, %v6392_v18  ;;  %v6409_v11 = vadd.f32 %v6910_v16, %v6393_v17  ;;  %v6350_v4 = vld [vmem:[%s10950_s0 + $0x30] sm:$0xff] }
 0x770   :  { %v6314_v50 = vmul.f32 %v6306_v51, %v10776_v14  ;;  %v6315_v7 = vmul.f32 %v6306_v51, %v10778_v32  ;;  %v6390_v16 = vmul.f32 %v6306_v51, %v10812_v34  ;;  %v6351_v14 = vld [vmem:[%s10950_s0 + $0x38] sm:$0xff]  ;;  %v6915_v32 = vld [vmem:[%s10950_s0 + $0x70] sm:$0xff] }
 0x771   :  { %v6360_v58 = vmax.f32 %v6352_v26, 0.0  ;;  %v6361_v19 = vmax.f32 %v6353_v44, 0.0  ;;  %v6416_v20 = vmax.f32 %v6408_v15, 0.0  ;;  %v6417_v29 = vmax.f32 %v6409_v11, 0.0  ;;  %v6916_v34 = vld [vmem:[%s10950_s0 + $0x78] sm:$0xff] }
 0x773   :  { %6368 = vst [vmem:[%s10954_s4] sm:$0xff] %v6360_v58  ;;  %6369 = vst [vmem:[%s10954_s4 + $0x8] sm:$0xff] %v6361_v19 }
 0x774   :  { %6917 = vst [vmem:[%s10954_s4 + $0x40] sm:$0xff] %v6416_v20  ;;  %6918 = vst [vmem:[%s10954_s4 + $0x48] sm:$0xff] %v6417_v29  ;;  %v6329_v22 = vpop.permute.xlu1 %6328 }
 0x775   :  { %v6340_v61 = vadd.f32 %v6329_v22, %v6312_v53  ;;  %v6341_v37 = vadd.f32 %v6329_v22, %v6313_v49  ;;  %v6396_v23 = vadd.f32 %v6388_v13, %v6329_v22  ;;  %v6397_v3 = vadd.f32 %v6389_v59, %v6329_v22  ;;  %v6324_v56 = vpop.permute.xlu0 %6323 }
 0x776   :  { %v6338_v63 = vadd.f32 %v6324_v56, %v6310_v48  ;;  %v6339_v43 = vadd.f32 %v6324_v56, %v6311_v57  ;;  %v6394_v41 = vadd.f32 %v6386_v21, %v6324_v56  ;;  %v6395_v8 = vadd.f32 %v6387_v60, %v6324_v56 }
 0x777   :  { %v6356_v40 = vadd.f32 %v6348_v45, %v6340_v61  ;;  %v6357_v36 = vadd.f32 %v6349_v5, %v6341_v37  ;;  %v6412_v2 = vadd.f32 %v6913_v38, %v6396_v23  ;;  %v6413_v54 = vadd.f32 %v6914_v39, %v6397_v3 }
 0x778   :  { %v6354_v35 = vadd.f32 %v6346_v27, %v6338_v63  ;;  %v6355_v42 = vadd.f32 %v6347_v24, %v6339_v43  ;;  %v6410_v12 = vadd.f32 %v6911_v10, %v6394_v41  ;;  %v6411_v28 = vadd.f32 %v6912_v47, %v6395_v8 }
 0x779   :  { %v6364_v9 = vmax.f32 %v6356_v40, 0.0  ;;  %v6365_v62 = vmax.f32 %v6357_v36, 0.0  ;;  %v6420_v33 = vmax.f32 %v6412_v2, 0.0  ;;  %v6421_v25 = vmax.f32 %v6413_v54, 0.0 }
 0x77a   :  { %v6362_v55 = vmax.f32 %v6354_v35, 0.0  ;;  %v6363_v31 = vmax.f32 %v6355_v42, 0.0  ;;  %v6418_v1 = vmax.f32 %v6410_v12, 0.0  ;;  %v6419_v0 = vmax.f32 %v6411_v28, 0.0 }
 0x77b   :  { %6372 = vst [vmem:[%s10954_s4 + $0x20] sm:$0xff] %v6364_v9  ;;  %6373 = vst [vmem:[%s10954_s4 + $0x28] sm:$0xff] %v6365_v62 }
 0x77c   :  { %6921 = vst [vmem:[%s10954_s4 + $0x60] sm:$0xff] %v6420_v33  ;;  %6922 = vst [vmem:[%s10954_s4 + $0x68] sm:$0xff] %v6421_v25  ;;  %v6334_v46 = vpop.permute.xlu1 %6333 }
 0x77d   :  { %6370 = vst [vmem:[%s10954_s4 + $0x10] sm:$0xff] %v6362_v55  ;;  %6371 = vst [vmem:[%s10954_s4 + $0x18] sm:$0xff] %v6363_v31  ;;  %v6342_v30 = vadd.f32 %v6334_v46, %v6314_v50  ;;  %v6343_v6 = vadd.f32 %v6334_v46, %v6315_v7  ;;  %v6398_v18 = vadd.f32 %v6390_v16, %v6334_v46 }
 0x77e   :  { %6919 = vst [vmem:[%s10954_s4 + $0x50] sm:$0xff] %v6418_v1  ;;  %6920 = vst [vmem:[%s10954_s4 + $0x58] sm:$0xff] %v6419_v0  ;;  %v6399_v17 = vadd.f32 %v6391_v52, %v6334_v46 }
 0x77f   :  { %v6358_v26 = vadd.f32 %v6350_v4, %v6342_v30  ;;  %v6359_v44 = vadd.f32 %v6351_v14, %v6343_v6  ;;  %v6414_v15 = vadd.f32 %v6915_v32, %v6398_v18 }
 0x780   :  { %v6415_v11 = vadd.f32 %v6916_v34, %v6399_v17 }
 0x781   :  { %v6366_v51 = vmax.f32 %v6358_v26, 0.0  ;;  %v6367_v58 = vmax.f32 %v6359_v44, 0.0  ;;  %v6422_v19 = vmax.f32 %v6414_v15, 0.0 }
 0x782   :  { %v6423_v20 = vmax.f32 %v6415_v11, 0.0 }
 0x783   :  { %6374 = vst [vmem:[%s10954_s4 + $0x30] sm:$0xff] %v6366_v51  ;;  %6375 = vst [vmem:[%s10954_s4 + $0x38] sm:$0xff] %v6367_v58 }
 0x784   :  { %6923 = vst [vmem:[%s10954_s4 + $0x70] sm:$0xff] %v6422_v19  ;;  %6924 = vst [vmem:[%s10954_s4 + $0x78] sm:$0xff] %v6423_v20 }

</bundles_post_ra>
